<compile_context>
chip_gen: v7x
topology: tpu7x:2x2x1
jax: 0.10.0
libtpu: 0.0.40
codegen_flags: <defaults>
</compile_context>

<pallas_src>
import jax
import jax.numpy as jnp
from jax.experimental import pallas as pl
from jax.experimental.pallas import tpu as pltpu


# --------------------------- in-kernel helpers -----------------------------

def _elu(v):
    # ELU(alpha=1) in f32.  exp argument is clamped so the (discarded) v>0
    # branch cannot overflow; matches F.elu / expm1 to well below tolerance.
    return jnp.where(v > 0.0, v, jnp.exp(jnp.minimum(v, 0.0)) - 1.0)


def _rows_to_hwc(y, H, W):
    """(H*W, C) row-major spatial -> (H, W, C). Leading-dim ops + concat only."""
    return jnp.concatenate([y[h * W:(h + 1) * W, :][None] for h in range(H)],
                           axis=0)


def _conv3x3_s2_elu(m_hwc, w, b):
    """3x3 stride-2 pad-1 conv (+bias, ELU) of an (H, W, C) map.

    Returns the result as a flat (Ho*Wo, C_out) f32 array (row-major spatial).
    Patch column order is (kh, kw, c_in), matching the offline weight reshape.
    Only static slices, concatenates and leading-dim reshape-splits are used.
    """
    H, W, C = m_hwc.shape
    Ho, Wo = H // 2, W // 2

    # Row zero-pad (leading-dim concat only; no column pad needed).
    zrow = jnp.zeros((1, W, C), m_hwc.dtype)
    mrp = jnp.concatenate([zrow, m_hwc, zrow], axis=0)            # (H+2, W, C)

    # Column parity subsample, shared between the kw=0 and kw=2 taps.
    evn = jnp.concatenate([mrp[:, 2 * j:2 * j + 1, :] for j in range(Wo)],
                          axis=1)                                 # cols 0,2,...
    odd = jnp.concatenate([mrp[:, 2 * j + 1:2 * j + 2, :] for j in range(Wo)],
                          axis=1)                                 # cols 1,3,...
    zcol = jnp.zeros((H + 2, 1, C), m_hwc.dtype)
    cols = [jnp.concatenate([zcol, odd[:, :Wo - 1, :]], axis=1),  # kw=0
            evn,                                                  # kw=1
            odd]                                                  # kw=2

    # Row subsample per kh via the (proven) leading-dim reshape-split trick.
    taps = []
    for kh in range(3):
        for kw in range(3):
            t = cols[kw][kh:kh + H].reshape(Ho, 2, Wo, C)[:, 0]   # (Ho, Wo, C)
            taps.append(t)
    pm = jnp.concatenate(taps, axis=2)                            # (Ho, Wo, 9C)
    pm = jnp.concatenate([pm[h] for h in range(Ho)], axis=0)      # (Ho*Wo, 9C)

    acc = jnp.dot(pm, w, preferred_element_type=jnp.float32) + b  # f32
    return _elu(acc)                                              # (Ho*Wo, Cout)


# Packed-slab row offsets (all multiples of 8 so every slice is tile-aligned).
_OFF_W1 = 0          # rows   0:16   (w1 is 9 real rows, padded to 16)
_OFF_W2 = 16         # rows  16:304
_OFF_W3 = 304        # rows 304:592
_OFF_W4 = 592        # rows 592:880
_OFF_WH = 880        # rows 880:1008 (4 head blocks of 32 rows each)
_OFF_B = 1008        # rows 1008:1016 (b1, b2, b3, b4, bh, pad...)
_SLAB_ROWS = 1016


# ------------------------------ fused kernel -------------------------------

def _actor_critic_kernel(p_ref, w_ref, o_ref):
    # p_ref: (1, 256, 9) conv1 im2col of this sample (built in the wrapper).
    # w_ref: (1016, 32) packed f32 parameter slab (resident across the grid).
    # o_ref: (1, 1, 32) fused head output (col 0 = critic, cols 1..na = actor).
    pm1 = p_ref[0]                                                # (256, 9)

    # conv1: single f32 MXU dot (K=9) + bias + ELU.
    y = _elu(jnp.dot(pm1, w_ref[_OFF_W1:_OFF_W1 + 9, :],
                     preferred_element_type=jnp.float32)
             + w_ref[_OFF_B + 0:_OFF_B + 1, :])                   # (256, 32)

    # conv2..conv4, all f32.
    y = _conv3x3_s2_elu(_rows_to_hwc(y, 16, 16),
                        w_ref[_OFF_W2:_OFF_W3, :],
                        w_ref[_OFF_B + 1:_OFF_B + 2, :])          # (64, 32)
    y = _conv3x3_s2_elu(_rows_to_hwc(y, 8, 8),
                        w_ref[_OFF_W3:_OFF_W4, :],
                        w_ref[_OFF_B + 2:_OFF_B + 3, :])          # (16, 32)
    y = _conv3x3_s2_elu(_rows_to_hwc(y, 4, 4),
                        w_ref[_OFF_W4:_OFF_WH, :],
                        w_ref[_OFF_B + 3:_OFF_B + 4, :])          # (4, 32)

    # Fused critic+actor head: 4 accumulated (1,32)@(32,32) dots (the head
    # weight was permuted offline to this per-position block layout), no
    # 128-wide lane concat.
    acc = w_ref[_OFF_B + 4:_OFF_B + 5, :]                         # (1, 32) bias
    for p in range(4):
        acc = acc + jnp.dot(y[p:p + 1, :],
                            w_ref[_OFF_WH + 32 * p:_OFF_WH + 32 * (p + 1), :],
                            preferred_element_type=jnp.float32)
    o_ref[0] = acc


# ------------------------------ host wrapper -------------------------------

def actor_critic_forward(observation, slab, n_actions):
    """(B, 32, 32) observations -> (critic (B,1), actor (B,n_actions))."""
    x = observation.astype(jnp.float32)
    B = x.shape[0]

    # conv1 im2col in the wrapper (plain XLA on a tiny tensor); tap order
    # (kh, kw) matches the offline w1 reshape, spatial order is row-major.
    xp = jnp.pad(x, ((0, 0), (1, 1), (1, 1)))                     # (B, 34, 34)
    taps = [xp[:, kh:kh + 32:2, kw:kw + 32:2]
            for kh in range(3) for kw in range(3)]                # 9 x (B,16,16)
    pm1 = jnp.stack(taps, axis=-1).reshape(B, 256, 9)

    out = pl.pallas_call(
        _actor_critic_kernel,
        out_shape=jax.ShapeDtypeStruct((B, 1, 32), jnp.float32),
        grid=(B,),
        in_specs=[
            pl.BlockSpec((1, 256, 9), lambda i: (i, 0, 0)),       # per-sample
            pl.BlockSpec((_SLAB_ROWS, 32), lambda i: (0, 0)),     # resident
        ],
        out_specs=pl.BlockSpec((1, 1, 32), lambda i: (i, 0, 0)),
        compiler_params=pltpu.CompilerParams(
            dimension_semantics=("parallel",)),                   # 2 TCs on v7x
    )(pm1, slab)

    out = out[:, 0, :]
    return out[:, :1], out[:, 1:1 + n_actions]


# -------------------------- params (torch layout) --------------------------

def init_params(key, n_inputs=1, n_actions=4):
    keys = jax.random.split(key, 12)
    convs = []
    c_in = n_inputs
    for li in range(4):
        w = 0.1 * jax.random.normal(keys[2 * li], (32, c_in, 3, 3), jnp.float32)
        b = 0.1 * jax.random.normal(keys[2 * li + 1], (32,), jnp.float32)
        convs.append((w, b))
        c_in = 32
    D = 32 * 2 * 2
    wc = 0.1 * jax.random.normal(keys[8], (1, D), jnp.float32)
    bc = 0.1 * jax.random.normal(keys[9], (1,), jnp.float32)
    wa = 0.1 * jax.random.normal(keys[10], (n_actions, D), jnp.float32)
    ba = 0.1 * jax.random.normal(keys[11], (n_actions,), jnp.float32)
    return {"convs": convs, "critic": (wc, bc), "actor": (wa, ba)}


def prep_params(params, n_actions=4):
    """Offline packing of every weight/bias into one f32 (1016, 32) slab."""
    pieces = []
    conv2d = []
    for (w, _) in params["convs"]:
        co, ci, kh, kw = w.shape
        # rows ordered (kh, kw, ci) to match the in-kernel patch column order.
        conv2d.append(jnp.transpose(w, (2, 3, 1, 0)).reshape(kh * kw * ci, co))
    pieces.append(jnp.pad(conv2d[0], ((0, 16 - 9), (0, 0))))      # rows 0:16
    pieces.append(conv2d[1])                                      # 16:304
    pieces.append(conv2d[2])                                      # 304:592
    pieces.append(conv2d[3])                                      # 592:880

    wc, bc = params["critic"]
    wa, ba = params["actor"]
    wcomb = jnp.concatenate([wc, wa], axis=0)                     # (1+na, 128)
    for p in range(4):                                            # 880:1008
        cols = 4 * jnp.arange(32) + p            # NCHW flat index of (c, pos p)
        blk = jnp.transpose(wcomb[:, cols])                       # (32, 1+na)
        pieces.append(jnp.pad(blk, ((0, 0), (0, 32 - (1 + n_actions)))))

    bias_block = jnp.zeros((8, 32), jnp.float32)                  # 1008:1016
    for li, (_, b) in enumerate(params["convs"]):
        bias_block = bias_block.at[li].set(b)
    bh = jnp.concatenate([bc, ba])
    bias_block = bias_block.at[4, :1 + n_actions].set(bh)
    pieces.append(bias_block)

    slab = jnp.concatenate(pieces, axis=0).astype(jnp.float32)
    assert slab.shape == (_SLAB_ROWS, 32)
    return slab


# ------------------------------ f32 reference ------------------------------

def reference_forward(observation, params):
    x = jnp.reshape(observation, (-1, 1, 32, 32)).astype(jnp.float32)
    for (w, b) in params["convs"]:
        y = jax.lax.conv_general_dilated(
            x, w, window_strides=(2, 2), padding=((1, 1), (1, 1)),
            dimension_numbers=("NCHW", "OIHW", "NCHW"))
        y = y + b.reshape(1, -1, 1, 1)
        x = jnp.where(y > 0, y, jnp.expm1(y))
    feat = x.reshape(x.shape[0], -1)
    wc, bc = params["critic"]
    wa, ba = params["actor"]
    return feat @ wc.T + bc, feat @ wa.T + ba


# ---------------------------------- main ------------------------------------

if __name__ == "__main__":
    key = jax.random.PRNGKey(0)
    k_obs, k_par = jax.random.split(key)

    B, n_actions = 8, 4
    # Batch of 32x32 single-channel frames (the module's forward() works on
    # one frame reshaped to 1x1x32x32; batching amortizes the fixed overhead).
    observations = jax.random.normal(k_obs, (B, 32, 32), jnp.float32)
    params = init_params(k_par, n_inputs=1, n_actions=n_actions)
    slab = prep_params(params, n_actions=n_actions)

    fwd = jax.jit(actor_critic_forward, static_argnames=("n_actions",))
    critic, actor = fwd(observations, slab, n_actions=n_actions)
    critic = jax.block_until_ready(critic)
    actor = jax.block_until_ready(actor)

    c_ref, a_ref = reference_forward(observations, params)
    assert critic.shape == (B, 1) and actor.shape == (B, n_actions)
    # f32 end-to-end -> tight tolerance (only summation-order / expm1 noise).
    assert jnp.allclose(critic, c_ref, rtol=1e-3, atol=1e-3), (critic, c_ref)
    assert jnp.allclose(actor, a_ref, rtol=1e-3, atol=1e-3), (actor, a_ref)

    print("KERNEL_OK")
</pallas_src>

<mosaic_0001>
module attributes {stable_mosaic.version = 11 : i64} {
  func.func @_actor_critic_kernel(%arg0: i32, %arg1: memref<1x256x9xf32, #tpu.memory_space<vmem>>, %arg2: memref<1016x32xf32, #tpu.memory_space<vmem>>, %arg3: memref<1x1x32xf32, #tpu.memory_space<vmem>>) attributes {dimension_semantics = [#tpu.dimension_semantics<parallel>], iteration_bounds = array<i64: 8>, scalar_prefetch = 0 : i64, scratch_operands = 0 : i64, tpu.core_type = #tpu.core_type<tc>, window_params = [{transform_indices = @transform_0, window_bounds = array<i64: 1, 256, 9>}, {pipeline_mode = #tpu.pipeline_mode<synchronous>, transform_indices = @transform_1, window_bounds = array<i64: 1016, 32>}, {transform_indices = @transform_2, window_bounds = array<i64: 1, 1, 32>}]} {
    %c0 = arith.constant 0 : index
    %c0_0 = arith.constant 0 : index
    %c0_1 = arith.constant 0 : index
    %0 = vector.load %arg1[%c0, %c0_0, %c0_1] : memref<1x256x9xf32, #tpu.memory_space<vmem>>, vector<1x256x9xf32>
    %1 = vector.shape_cast %0 : vector<1x256x9xf32> to vector<256x9xf32>
    %c0_2 = arith.constant 0 : index
    %c0_3 = arith.constant 0 : index
    %2 = vector.load %arg2[%c0_2, %c0_3] : memref<1016x32xf32, #tpu.memory_space<vmem>>, vector<9x32xf32>
    %cst = arith.constant dense<0.000000e+00> : vector<256x32xf32>
    %3 = tpu.matmul %1, %2, %cst {dimension_numbers = #tpu.dot_dimension_numbers<[1], [0], [0], [1], [0, 0, 1, 1], [], []>} : vector<256x9xf32>, vector<9x32xf32>, vector<256x32xf32> -> vector<256x32xf32>
    %c1008 = arith.constant 1008 : index
    %c0_4 = arith.constant 0 : index
    %4 = vector.load %arg2[%c1008, %c0_4] : memref<1016x32xf32, #tpu.memory_space<vmem>>, vector<1x32xf32>
    %5 = vector.broadcast %4 : vector<1x32xf32> to vector<256x32xf32>
    %6 = arith.addf %3, %5 : vector<256x32xf32>
    %cst_5 = arith.constant 0.000000e+00 : f32
    %7 = vector.broadcast %cst_5 : f32 to vector<256x32xf32>
    %8 = arith.cmpf ogt, %6, %7 : vector<256x32xf32>
    %cst_6 = arith.constant 0.000000e+00 : f32
    %9 = vector.broadcast %cst_6 : f32 to vector<256x32xf32>
    %10 = arith.minimumf %6, %9 : vector<256x32xf32>
    %11 = math.exp %10 : vector<256x32xf32>
    %cst_7 = arith.constant 1.000000e+00 : f32
    %12 = vector.broadcast %cst_7 : f32 to vector<256x32xf32>
    %13 = arith.subf %11, %12 : vector<256x32xf32>
    %14 = arith.select %8, %6, %13 : vector<256x32xi1>, vector<256x32xf32>
    %15 = vector.extract_strided_slice %14 {offsets = [0, 0], sizes = [16, 32], strides = [1, 1]} : vector<256x32xf32> to vector<16x32xf32>
    %16 = vector.shape_cast %15 : vector<16x32xf32> to vector<1x16x32xf32>
    %17 = vector.extract_strided_slice %14 {offsets = [16, 0], sizes = [16, 32], strides = [1, 1]} : vector<256x32xf32> to vector<16x32xf32>
    %18 = vector.shape_cast %17 : vector<16x32xf32> to vector<1x16x32xf32>
    %19 = vector.extract_strided_slice %14 {offsets = [32, 0], sizes = [16, 32], strides = [1, 1]} : vector<256x32xf32> to vector<16x32xf32>
    %20 = vector.shape_cast %19 : vector<16x32xf32> to vector<1x16x32xf32>
    %21 = vector.extract_strided_slice %14 {offsets = [48, 0], sizes = [16, 32], strides = [1, 1]} : vector<256x32xf32> to vector<16x32xf32>
    %22 = vector.shape_cast %21 : vector<16x32xf32> to vector<1x16x32xf32>
    %23 = vector.extract_strided_slice %14 {offsets = [64, 0], sizes = [16, 32], strides = [1, 1]} : vector<256x32xf32> to vector<16x32xf32>
    %24 = vector.shape_cast %23 : vector<16x32xf32> to vector<1x16x32xf32>
    %25 = vector.extract_strided_slice %14 {offsets = [80, 0], sizes = [16, 32], strides = [1, 1]} : vector<256x32xf32> to vector<16x32xf32>
    %26 = vector.shape_cast %25 : vector<16x32xf32> to vector<1x16x32xf32>
    %27 = vector.extract_strided_slice %14 {offsets = [96, 0], sizes = [16, 32], strides = [1, 1]} : vector<256x32xf32> to vector<16x32xf32>
    %28 = vector.shape_cast %27 : vector<16x32xf32> to vector<1x16x32xf32>
    %29 = vector.extract_strided_slice %14 {offsets = [112, 0], sizes = [16, 32], strides = [1, 1]} : vector<256x32xf32> to vector<16x32xf32>
    %30 = vector.shape_cast %29 : vector<16x32xf32> to vector<1x16x32xf32>
    %31 = vector.extract_strided_slice %14 {offsets = [128, 0], sizes = [16, 32], strides = [1, 1]} : vector<256x32xf32> to vector<16x32xf32>
    %32 = vector.shape_cast %31 : vector<16x32xf32> to vector<1x16x32xf32>
    %33 = vector.extract_strided_slice %14 {offsets = [144, 0], sizes = [16, 32], strides = [1, 1]} : vector<256x32xf32> to vector<16x32xf32>
    %34 = vector.shape_cast %33 : vector<16x32xf32> to vector<1x16x32xf32>
    %35 = vector.extract_strided_slice %14 {offsets = [160, 0], sizes = [16, 32], strides = [1, 1]} : vector<256x32xf32> to vector<16x32xf32>
    %36 = vector.shape_cast %35 : vector<16x32xf32> to vector<1x16x32xf32>
    %37 = vector.extract_strided_slice %14 {offsets = [176, 0], sizes = [16, 32], strides = [1, 1]} : vector<256x32xf32> to vector<16x32xf32>
    %38 = vector.shape_cast %37 : vector<16x32xf32> to vector<1x16x32xf32>
    %39 = vector.extract_strided_slice %14 {offsets = [192, 0], sizes = [16, 32], strides = [1, 1]} : vector<256x32xf32> to vector<16x32xf32>
    %40 = vector.shape_cast %39 : vector<16x32xf32> to vector<1x16x32xf32>
    %41 = vector.extract_strided_slice %14 {offsets = [208, 0], sizes = [16, 32], strides = [1, 1]} : vector<256x32xf32> to vector<16x32xf32>
    %42 = vector.shape_cast %41 : vector<16x32xf32> to vector<1x16x32xf32>
    %43 = vector.extract_strided_slice %14 {offsets = [224, 0], sizes = [16, 32], strides = [1, 1]} : vector<256x32xf32> to vector<16x32xf32>
    %44 = vector.shape_cast %43 : vector<16x32xf32> to vector<1x16x32xf32>
    %45 = vector.extract_strided_slice %14 {offsets = [240, 0], sizes = [16, 32], strides = [1, 1]} : vector<256x32xf32> to vector<16x32xf32>
    %46 = vector.shape_cast %45 : vector<16x32xf32> to vector<1x16x32xf32>
    %47 = tpu.concatenate %16, %18, %20, %22, %24, %26, %28, %30, %32, %34, %36, %38, %40, %42, %44, %46 in 0 : vector<1x16x32xf32>, vector<1x16x32xf32>, vector<1x16x32xf32>, vector<1x16x32xf32>, vector<1x16x32xf32>, vector<1x16x32xf32>, vector<1x16x32xf32>, vector<1x16x32xf32>, vector<1x16x32xf32>, vector<1x16x32xf32>, vector<1x16x32xf32>, vector<1x16x32xf32>, vector<1x16x32xf32>, vector<1x16x32xf32>, vector<1x16x32xf32>, vector<1x16x32xf32> -> vector<16x16x32xf32>
    %c16 = arith.constant 16 : index
    %c0_8 = arith.constant 0 : index
    %48 = vector.load %arg2[%c16, %c0_8] : memref<1016x32xf32, #tpu.memory_space<vmem>>, vector<288x32xf32>
    %c1009 = arith.constant 1009 : index
    %c0_9 = arith.constant 0 : index
    %49 = vector.load %arg2[%c1009, %c0_9] : memref<1016x32xf32, #tpu.memory_space<vmem>>, vector<1x32xf32>
    %cst_10 = arith.constant 0.000000e+00 : f32
    %50 = vector.broadcast %cst_10 : f32 to vector<1x16x32xf32>
    %51 = tpu.concatenate %50, %47, %50 in 0 : vector<1x16x32xf32>, vector<16x16x32xf32>, vector<1x16x32xf32> -> vector<18x16x32xf32>
    %52 = vector.extract_strided_slice %51 {offsets = [0, 0, 0], sizes = [18, 1, 32], strides = [1, 1, 1]} : vector<18x16x32xf32> to vector<18x1x32xf32>
    %53 = vector.extract_strided_slice %51 {offsets = [0, 2, 0], sizes = [18, 1, 32], strides = [1, 1, 1]} : vector<18x16x32xf32> to vector<18x1x32xf32>
    %54 = vector.extract_strided_slice %51 {offsets = [0, 4, 0], sizes = [18, 1, 32], strides = [1, 1, 1]} : vector<18x16x32xf32> to vector<18x1x32xf32>
    %55 = vector.extract_strided_slice %51 {offsets = [0, 6, 0], sizes = [18, 1, 32], strides = [1, 1, 1]} : vector<18x16x32xf32> to vector<18x1x32xf32>
    %56 = vector.extract_strided_slice %51 {offsets = [0, 8, 0], sizes = [18, 1, 32], strides = [1, 1, 1]} : vector<18x16x32xf32> to vector<18x1x32xf32>
    %57 = vector.extract_strided_slice %51 {offsets = [0, 10, 0], sizes = [18, 1, 32], strides = [1, 1, 1]} : vector<18x16x32xf32> to vector<18x1x32xf32>
    %58 = vector.extract_strided_slice %51 {offsets = [0, 12, 0], sizes = [18, 1, 32], strides = [1, 1, 1]} : vector<18x16x32xf32> to vector<18x1x32xf32>
    %59 = vector.extract_strided_slice %51 {offsets = [0, 14, 0], sizes = [18, 1, 32], strides = [1, 1, 1]} : vector<18x16x32xf32> to vector<18x1x32xf32>
    %60 = tpu.concatenate %52, %53, %54, %55, %56, %57, %58, %59 in 1 : vector<18x1x32xf32>, vector<18x1x32xf32>, vector<18x1x32xf32>, vector<18x1x32xf32>, vector<18x1x32xf32>, vector<18x1x32xf32>, vector<18x1x32xf32>, vector<18x1x32xf32> -> vector<18x8x32xf32>
    %61 = vector.extract_strided_slice %51 {offsets = [0, 1, 0], sizes = [18, 1, 32], strides = [1, 1, 1]} : vector<18x16x32xf32> to vector<18x1x32xf32>
    %62 = vector.extract_strided_slice %51 {offsets = [0, 3, 0], sizes = [18, 1, 32], strides = [1, 1, 1]} : vector<18x16x32xf32> to vector<18x1x32xf32>
    %63 = vector.extract_strided_slice %51 {offsets = [0, 5, 0], sizes = [18, 1, 32], strides = [1, 1, 1]} : vector<18x16x32xf32> to vector<18x1x32xf32>
    %64 = vector.extract_strided_slice %51 {offsets = [0, 7, 0], sizes = [18, 1, 32], strides = [1, 1, 1]} : vector<18x16x32xf32> to vector<18x1x32xf32>
    %65 = vector.extract_strided_slice %51 {offsets = [0, 9, 0], sizes = [18, 1, 32], strides = [1, 1, 1]} : vector<18x16x32xf32> to vector<18x1x32xf32>
    %66 = vector.extract_strided_slice %51 {offsets = [0, 11, 0], sizes = [18, 1, 32], strides = [1, 1, 1]} : vector<18x16x32xf32> to vector<18x1x32xf32>
    %67 = vector.extract_strided_slice %51 {offsets = [0, 13, 0], sizes = [18, 1, 32], strides = [1, 1, 1]} : vector<18x16x32xf32> to vector<18x1x32xf32>
    %68 = vector.extract_strided_slice %51 {offsets = [0, 15, 0], sizes = [18, 1, 32], strides = [1, 1, 1]} : vector<18x16x32xf32> to vector<18x1x32xf32>
    %69 = tpu.concatenate %61, %62, %63, %64, %65, %66, %67, %68 in 1 : vector<18x1x32xf32>, vector<18x1x32xf32>, vector<18x1x32xf32>, vector<18x1x32xf32>, vector<18x1x32xf32>, vector<18x1x32xf32>, vector<18x1x32xf32>, vector<18x1x32xf32> -> vector<18x8x32xf32>
    %cst_11 = arith.constant 0.000000e+00 : f32
    %70 = vector.broadcast %cst_11 : f32 to vector<18x1x32xf32>
    %71 = vector.extract_strided_slice %69 {offsets = [0, 0, 0], sizes = [18, 7, 32], strides = [1, 1, 1]} : vector<18x8x32xf32> to vector<18x7x32xf32>
    %72 = tpu.concatenate %70, %71 in 1 : vector<18x1x32xf32>, vector<18x7x32xf32> -> vector<18x8x32xf32>
    %73 = vector.extract_strided_slice %72 {offsets = [0, 0, 0], sizes = [16, 8, 32], strides = [1, 1, 1]} : vector<18x8x32xf32> to vector<16x8x32xf32>
    %74 = vector.shape_cast %73 : vector<16x8x32xf32> to vector<8x2x8x32xf32>
    %75 = vector.extract_strided_slice %74 {offsets = [0, 0, 0, 0], sizes = [8, 1, 8, 32], strides = [1, 1, 1, 1]} : vector<8x2x8x32xf32> to vector<8x1x8x32xf32>
    %76 = vector.shape_cast %75 : vector<8x1x8x32xf32> to vector<8x8x32xf32>
    %77 = vector.extract_strided_slice %60 {offsets = [0, 0, 0], sizes = [16, 8, 32], strides = [1, 1, 1]} : vector<18x8x32xf32> to vector<16x8x32xf32>
    %78 = vector.shape_cast %77 : vector<16x8x32xf32> to vector<8x2x8x32xf32>
    %79 = vector.extract_strided_slice %78 {offsets = [0, 0, 0, 0], sizes = [8, 1, 8, 32], strides = [1, 1, 1, 1]} : vector<8x2x8x32xf32> to vector<8x1x8x32xf32>
    %80 = vector.shape_cast %79 : vector<8x1x8x32xf32> to vector<8x8x32xf32>
    %81 = vector.extract_strided_slice %69 {offsets = [0, 0, 0], sizes = [16, 8, 32], strides = [1, 1, 1]} : vector<18x8x32xf32> to vector<16x8x32xf32>
    %82 = vector.shape_cast %81 : vector<16x8x32xf32> to vector<8x2x8x32xf32>
    %83 = vector.extract_strided_slice %82 {offsets = [0, 0, 0, 0], sizes = [8, 1, 8, 32], strides = [1, 1, 1, 1]} : vector<8x2x8x32xf32> to vector<8x1x8x32xf32>
    %84 = vector.shape_cast %83 : vector<8x1x8x32xf32> to vector<8x8x32xf32>
    %85 = vector.extract_strided_slice %72 {offsets = [1, 0, 0], sizes = [16, 8, 32], strides = [1, 1, 1]} : vector<18x8x32xf32> to vector<16x8x32xf32>
    %86 = vector.shape_cast %85 : vector<16x8x32xf32> to vector<8x2x8x32xf32>
    %87 = vector.extract_strided_slice %86 {offsets = [0, 0, 0, 0], sizes = [8, 1, 8, 32], strides = [1, 1, 1, 1]} : vector<8x2x8x32xf32> to vector<8x1x8x32xf32>
    %88 = vector.shape_cast %87 : vector<8x1x8x32xf32> to vector<8x8x32xf32>
    %89 = vector.extract_strided_slice %60 {offsets = [1, 0, 0], sizes = [16, 8, 32], strides = [1, 1, 1]} : vector<18x8x32xf32> to vector<16x8x32xf32>
    %90 = vector.shape_cast %89 : vector<16x8x32xf32> to vector<8x2x8x32xf32>
    %91 = vector.extract_strided_slice %90 {offsets = [0, 0, 0, 0], sizes = [8, 1, 8, 32], strides = [1, 1, 1, 1]} : vector<8x2x8x32xf32> to vector<8x1x8x32xf32>
    %92 = vector.shape_cast %91 : vector<8x1x8x32xf32> to vector<8x8x32xf32>
    %93 = vector.extract_strided_slice %69 {offsets = [1, 0, 0], sizes = [16, 8, 32], strides = [1, 1, 1]} : vector<18x8x32xf32> to vector<16x8x32xf32>
    %94 = vector.shape_cast %93 : vector<16x8x32xf32> to vector<8x2x8x32xf32>
    %95 = vector.extract_strided_slice %94 {offsets = [0, 0, 0, 0], sizes = [8, 1, 8, 32], strides = [1, 1, 1, 1]} : vector<8x2x8x32xf32> to vector<8x1x8x32xf32>
    %96 = vector.shape_cast %95 : vector<8x1x8x32xf32> to vector<8x8x32xf32>
    %97 = vector.extract_strided_slice %72 {offsets = [2, 0, 0], sizes = [16, 8, 32], strides = [1, 1, 1]} : vector<18x8x32xf32> to vector<16x8x32xf32>
    %98 = vector.shape_cast %97 : vector<16x8x32xf32> to vector<8x2x8x32xf32>
    %99 = vector.extract_strided_slice %98 {offsets = [0, 0, 0, 0], sizes = [8, 1, 8, 32], strides = [1, 1, 1, 1]} : vector<8x2x8x32xf32> to vector<8x1x8x32xf32>
    %100 = vector.shape_cast %99 : vector<8x1x8x32xf32> to vector<8x8x32xf32>
    %101 = vector.extract_strided_slice %60 {offsets = [2, 0, 0], sizes = [16, 8, 32], strides = [1, 1, 1]} : vector<18x8x32xf32> to vector<16x8x32xf32>
    %102 = vector.shape_cast %101 : vector<16x8x32xf32> to vector<8x2x8x32xf32>
    %103 = vector.extract_strided_slice %102 {offsets = [0, 0, 0, 0], sizes = [8, 1, 8, 32], strides = [1, 1, 1, 1]} : vector<8x2x8x32xf32> to vector<8x1x8x32xf32>
    %104 = vector.shape_cast %103 : vector<8x1x8x32xf32> to vector<8x8x32xf32>
    %105 = vector.extract_strided_slice %69 {offsets = [2, 0, 0], sizes = [16, 8, 32], strides = [1, 1, 1]} : vector<18x8x32xf32> to vector<16x8x32xf32>
    %106 = vector.shape_cast %105 : vector<16x8x32xf32> to vector<8x2x8x32xf32>
    %107 = vector.extract_strided_slice %106 {offsets = [0, 0, 0, 0], sizes = [8, 1, 8, 32], strides = [1, 1, 1, 1]} : vector<8x2x8x32xf32> to vector<8x1x8x32xf32>
    %108 = vector.shape_cast %107 : vector<8x1x8x32xf32> to vector<8x8x32xf32>
    %109 = tpu.concatenate %76, %80, %84, %88, %92, %96, %100, %104, %108 in 2 : vector<8x8x32xf32>, vector<8x8x32xf32>, vector<8x8x32xf32>, vector<8x8x32xf32>, vector<8x8x32xf32>, vector<8x8x32xf32>, vector<8x8x32xf32>, vector<8x8x32xf32>, vector<8x8x32xf32> -> vector<8x8x288xf32>
    %110 = vector.extract_strided_slice %109 {offsets = [0, 0, 0], sizes = [1, 8, 288], strides = [1, 1, 1]} : vector<8x8x288xf32> to vector<1x8x288xf32>
    %111 = vector.shape_cast %110 : vector<1x8x288xf32> to vector<8x288xf32>
    %112 = vector.extract_strided_slice %109 {offsets = [1, 0, 0], sizes = [1, 8, 288], strides = [1, 1, 1]} : vector<8x8x288xf32> to vector<1x8x288xf32>
    %113 = vector.shape_cast %112 : vector<1x8x288xf32> to vector<8x288xf32>
    %114 = vector.extract_strided_slice %109 {offsets = [2, 0, 0], sizes = [1, 8, 288], strides = [1, 1, 1]} : vector<8x8x288xf32> to vector<1x8x288xf32>
    %115 = vector.shape_cast %114 : vector<1x8x288xf32> to vector<8x288xf32>
    %116 = vector.extract_strided_slice %109 {offsets = [3, 0, 0], sizes = [1, 8, 288], strides = [1, 1, 1]} : vector<8x8x288xf32> to vector<1x8x288xf32>
    %117 = vector.shape_cast %116 : vector<1x8x288xf32> to vector<8x288xf32>
    %118 = vector.extract_strided_slice %109 {offsets = [4, 0, 0], sizes = [1, 8, 288], strides = [1, 1, 1]} : vector<8x8x288xf32> to vector<1x8x288xf32>
    %119 = vector.shape_cast %118 : vector<1x8x288xf32> to vector<8x288xf32>
    %120 = vector.extract_strided_slice %109 {offsets = [5, 0, 0], sizes = [1, 8, 288], strides = [1, 1, 1]} : vector<8x8x288xf32> to vector<1x8x288xf32>
    %121 = vector.shape_cast %120 : vector<1x8x288xf32> to vector<8x288xf32>
    %122 = vector.extract_strided_slice %109 {offsets = [6, 0, 0], sizes = [1, 8, 288], strides = [1, 1, 1]} : vector<8x8x288xf32> to vector<1x8x288xf32>
    %123 = vector.shape_cast %122 : vector<1x8x288xf32> to vector<8x288xf32>
    %124 = vector.extract_strided_slice %109 {offsets = [7, 0, 0], sizes = [1, 8, 288], strides = [1, 1, 1]} : vector<8x8x288xf32> to vector<1x8x288xf32>
    %125 = vector.shape_cast %124 : vector<1x8x288xf32> to vector<8x288xf32>
    %126 = tpu.concatenate %111, %113, %115, %117, %119, %121, %123, %125 in 0 : vector<8x288xf32>, vector<8x288xf32>, vector<8x288xf32>, vector<8x288xf32>, vector<8x288xf32>, vector<8x288xf32>, vector<8x288xf32>, vector<8x288xf32> -> vector<64x288xf32>
    %cst_12 = arith.constant dense<0.000000e+00> : vector<64x32xf32>
    %127 = tpu.matmul %126, %48, %cst_12 {dimension_numbers = #tpu.dot_dimension_numbers<[1], [0], [0], [1], [0, 0, 1, 1], [], []>} : vector<64x288xf32>, vector<288x32xf32>, vector<64x32xf32> -> vector<64x32xf32>
    %128 = vector.broadcast %49 : vector<1x32xf32> to vector<64x32xf32>
    %129 = arith.addf %127, %128 : vector<64x32xf32>
    %cst_13 = arith.constant 0.000000e+00 : f32
    %130 = vector.broadcast %cst_13 : f32 to vector<64x32xf32>
    %131 = arith.cmpf ogt, %129, %130 : vector<64x32xf32>
    %cst_14 = arith.constant 0.000000e+00 : f32
    %132 = vector.broadcast %cst_14 : f32 to vector<64x32xf32>
    %133 = arith.minimumf %129, %132 : vector<64x32xf32>
    %134 = math.exp %133 : vector<64x32xf32>
    %cst_15 = arith.constant 1.000000e+00 : f32
    %135 = vector.broadcast %cst_15 : f32 to vector<64x32xf32>
    %136 = arith.subf %134, %135 : vector<64x32xf32>
    %137 = arith.select %131, %129, %136 : vector<64x32xi1>, vector<64x32xf32>
    %138 = vector.extract_strided_slice %137 {offsets = [0, 0], sizes = [8, 32], strides = [1, 1]} : vector<64x32xf32> to vector<8x32xf32>
    %139 = vector.shape_cast %138 : vector<8x32xf32> to vector<1x8x32xf32>
    %140 = vector.extract_strided_slice %137 {offsets = [8, 0], sizes = [8, 32], strides = [1, 1]} : vector<64x32xf32> to vector<8x32xf32>
    %141 = vector.shape_cast %140 : vector<8x32xf32> to vector<1x8x32xf32>
    %142 = vector.extract_strided_slice %137 {offsets = [16, 0], sizes = [8, 32], strides = [1, 1]} : vector<64x32xf32> to vector<8x32xf32>
    %143 = vector.shape_cast %142 : vector<8x32xf32> to vector<1x8x32xf32>
    %144 = vector.extract_strided_slice %137 {offsets = [24, 0], sizes = [8, 32], strides = [1, 1]} : vector<64x32xf32> to vector<8x32xf32>
    %145 = vector.shape_cast %144 : vector<8x32xf32> to vector<1x8x32xf32>
    %146 = vector.extract_strided_slice %137 {offsets = [32, 0], sizes = [8, 32], strides = [1, 1]} : vector<64x32xf32> to vector<8x32xf32>
    %147 = vector.shape_cast %146 : vector<8x32xf32> to vector<1x8x32xf32>
    %148 = vector.extract_strided_slice %137 {offsets = [40, 0], sizes = [8, 32], strides = [1, 1]} : vector<64x32xf32> to vector<8x32xf32>
    %149 = vector.shape_cast %148 : vector<8x32xf32> to vector<1x8x32xf32>
    %150 = vector.extract_strided_slice %137 {offsets = [48, 0], sizes = [8, 32], strides = [1, 1]} : vector<64x32xf32> to vector<8x32xf32>
    %151 = vector.shape_cast %150 : vector<8x32xf32> to vector<1x8x32xf32>
    %152 = vector.extract_strided_slice %137 {offsets = [56, 0], sizes = [8, 32], strides = [1, 1]} : vector<64x32xf32> to vector<8x32xf32>
    %153 = vector.shape_cast %152 : vector<8x32xf32> to vector<1x8x32xf32>
    %154 = tpu.concatenate %139, %141, %143, %145, %147, %149, %151, %153 in 0 : vector<1x8x32xf32>, vector<1x8x32xf32>, vector<1x8x32xf32>, vector<1x8x32xf32>, vector<1x8x32xf32>, vector<1x8x32xf32>, vector<1x8x32xf32>, vector<1x8x32xf32> -> vector<8x8x32xf32>
    %c304 = arith.constant 304 : index
    %c0_16 = arith.constant 0 : index
    %155 = vector.load %arg2[%c304, %c0_16] : memref<1016x32xf32, #tpu.memory_space<vmem>>, vector<288x32xf32>
    %c1010 = arith.constant 1010 : index
    %c0_17 = arith.constant 0 : index
    %156 = vector.load %arg2[%c1010, %c0_17] : memref<1016x32xf32, #tpu.memory_space<vmem>>, vector<1x32xf32>
    %cst_18 = arith.constant 0.000000e+00 : f32
    %157 = vector.broadcast %cst_18 : f32 to vector<1x8x32xf32>
    %158 = tpu.concatenate %157, %154, %157 in 0 : vector<1x8x32xf32>, vector<8x8x32xf32>, vector<1x8x32xf32> -> vector<10x8x32xf32>
    %159 = vector.extract_strided_slice %158 {offsets = [0, 0, 0], sizes = [10, 1, 32], strides = [1, 1, 1]} : vector<10x8x32xf32> to vector<10x1x32xf32>
    %160 = vector.extract_strided_slice %158 {offsets = [0, 2, 0], sizes = [10, 1, 32], strides = [1, 1, 1]} : vector<10x8x32xf32> to vector<10x1x32xf32>
    %161 = vector.extract_strided_slice %158 {offsets = [0, 4, 0], sizes = [10, 1, 32], strides = [1, 1, 1]} : vector<10x8x32xf32> to vector<10x1x32xf32>
    %162 = vector.extract_strided_slice %158 {offsets = [0, 6, 0], sizes = [10, 1, 32], strides = [1, 1, 1]} : vector<10x8x32xf32> to vector<10x1x32xf32>
    %163 = tpu.concatenate %159, %160, %161, %162 in 1 : vector<10x1x32xf32>, vector<10x1x32xf32>, vector<10x1x32xf32>, vector<10x1x32xf32> -> vector<10x4x32xf32>
    %164 = vector.extract_strided_slice %158 {offsets = [0, 1, 0], sizes = [10, 1, 32], strides = [1, 1, 1]} : vector<10x8x32xf32> to vector<10x1x32xf32>
    %165 = vector.extract_strided_slice %158 {offsets = [0, 3, 0], sizes = [10, 1, 32], strides = [1, 1, 1]} : vector<10x8x32xf32> to vector<10x1x32xf32>
    %166 = vector.extract_strided_slice %158 {offsets = [0, 5, 0], sizes = [10, 1, 32], strides = [1, 1, 1]} : vector<10x8x32xf32> to vector<10x1x32xf32>
    %167 = vector.extract_strided_slice %158 {offsets = [0, 7, 0], sizes = [10, 1, 32], strides = [1, 1, 1]} : vector<10x8x32xf32> to vector<10x1x32xf32>
    %168 = tpu.concatenate %164, %165, %166, %167 in 1 : vector<10x1x32xf32>, vector<10x1x32xf32>, vector<10x1x32xf32>, vector<10x1x32xf32> -> vector<10x4x32xf32>
    %cst_19 = arith.constant 0.000000e+00 : f32
    %169 = vector.broadcast %cst_19 : f32 to vector<10x1x32xf32>
    %170 = vector.extract_strided_slice %168 {offsets = [0, 0, 0], sizes = [10, 3, 32], strides = [1, 1, 1]} : vector<10x4x32xf32> to vector<10x3x32xf32>
    %171 = tpu.concatenate %169, %170 in 1 : vector<10x1x32xf32>, vector<10x3x32xf32> -> vector<10x4x32xf32>
    %172 = vector.extract_strided_slice %171 {offsets = [0, 0, 0], sizes = [8, 4, 32], strides = [1, 1, 1]} : vector<10x4x32xf32> to vector<8x4x32xf32>
    %173 = vector.shape_cast %172 : vector<8x4x32xf32> to vector<4x2x4x32xf32>
    %174 = vector.extract_strided_slice %173 {offsets = [0, 0, 0, 0], sizes = [4, 1, 4, 32], strides = [1, 1, 1, 1]} : vector<4x2x4x32xf32> to vector<4x1x4x32xf32>
    %175 = vector.shape_cast %174 : vector<4x1x4x32xf32> to vector<4x4x32xf32>
    %176 = vector.extract_strided_slice %163 {offsets = [0, 0, 0], sizes = [8, 4, 32], strides = [1, 1, 1]} : vector<10x4x32xf32> to vector<8x4x32xf32>
    %177 = vector.shape_cast %176 : vector<8x4x32xf32> to vector<4x2x4x32xf32>
    %178 = vector.extract_strided_slice %177 {offsets = [0, 0, 0, 0], sizes = [4, 1, 4, 32], strides = [1, 1, 1, 1]} : vector<4x2x4x32xf32> to vector<4x1x4x32xf32>
    %179 = vector.shape_cast %178 : vector<4x1x4x32xf32> to vector<4x4x32xf32>
    %180 = vector.extract_strided_slice %168 {offsets = [0, 0, 0], sizes = [8, 4, 32], strides = [1, 1, 1]} : vector<10x4x32xf32> to vector<8x4x32xf32>
    %181 = vector.shape_cast %180 : vector<8x4x32xf32> to vector<4x2x4x32xf32>
    %182 = vector.extract_strided_slice %181 {offsets = [0, 0, 0, 0], sizes = [4, 1, 4, 32], strides = [1, 1, 1, 1]} : vector<4x2x4x32xf32> to vector<4x1x4x32xf32>
    %183 = vector.shape_cast %182 : vector<4x1x4x32xf32> to vector<4x4x32xf32>
    %184 = vector.extract_strided_slice %171 {offsets = [1, 0, 0], sizes = [8, 4, 32], strides = [1, 1, 1]} : vector<10x4x32xf32> to vector<8x4x32xf32>
    %185 = vector.shape_cast %184 : vector<8x4x32xf32> to vector<4x2x4x32xf32>
    %186 = vector.extract_strided_slice %185 {offsets = [0, 0, 0, 0], sizes = [4, 1, 4, 32], strides = [1, 1, 1, 1]} : vector<4x2x4x32xf32> to vector<4x1x4x32xf32>
    %187 = vector.shape_cast %186 : vector<4x1x4x32xf32> to vector<4x4x32xf32>
    %188 = vector.extract_strided_slice %163 {offsets = [1, 0, 0], sizes = [8, 4, 32], strides = [1, 1, 1]} : vector<10x4x32xf32> to vector<8x4x32xf32>
    %189 = vector.shape_cast %188 : vector<8x4x32xf32> to vector<4x2x4x32xf32>
    %190 = vector.extract_strided_slice %189 {offsets = [0, 0, 0, 0], sizes = [4, 1, 4, 32], strides = [1, 1, 1, 1]} : vector<4x2x4x32xf32> to vector<4x1x4x32xf32>
    %191 = vector.shape_cast %190 : vector<4x1x4x32xf32> to vector<4x4x32xf32>
    %192 = vector.extract_strided_slice %168 {offsets = [1, 0, 0], sizes = [8, 4, 32], strides = [1, 1, 1]} : vector<10x4x32xf32> to vector<8x4x32xf32>
    %193 = vector.shape_cast %192 : vector<8x4x32xf32> to vector<4x2x4x32xf32>
    %194 = vector.extract_strided_slice %193 {offsets = [0, 0, 0, 0], sizes = [4, 1, 4, 32], strides = [1, 1, 1, 1]} : vector<4x2x4x32xf32> to vector<4x1x4x32xf32>
    %195 = vector.shape_cast %194 : vector<4x1x4x32xf32> to vector<4x4x32xf32>
    %196 = vector.extract_strided_slice %171 {offsets = [2, 0, 0], sizes = [8, 4, 32], strides = [1, 1, 1]} : vector<10x4x32xf32> to vector<8x4x32xf32>
    %197 = vector.shape_cast %196 : vector<8x4x32xf32> to vector<4x2x4x32xf32>
    %198 = vector.extract_strided_slice %197 {offsets = [0, 0, 0, 0], sizes = [4, 1, 4, 32], strides = [1, 1, 1, 1]} : vector<4x2x4x32xf32> to vector<4x1x4x32xf32>
    %199 = vector.shape_cast %198 : vector<4x1x4x32xf32> to vector<4x4x32xf32>
    %200 = vector.extract_strided_slice %163 {offsets = [2, 0, 0], sizes = [8, 4, 32], strides = [1, 1, 1]} : vector<10x4x32xf32> to vector<8x4x32xf32>
    %201 = vector.shape_cast %200 : vector<8x4x32xf32> to vector<4x2x4x32xf32>
    %202 = vector.extract_strided_slice %201 {offsets = [0, 0, 0, 0], sizes = [4, 1, 4, 32], strides = [1, 1, 1, 1]} : vector<4x2x4x32xf32> to vector<4x1x4x32xf32>
    %203 = vector.shape_cast %202 : vector<4x1x4x32xf32> to vector<4x4x32xf32>
    %204 = vector.extract_strided_slice %168 {offsets = [2, 0, 0], sizes = [8, 4, 32], strides = [1, 1, 1]} : vector<10x4x32xf32> to vector<8x4x32xf32>
    %205 = vector.shape_cast %204 : vector<8x4x32xf32> to vector<4x2x4x32xf32>
    %206 = vector.extract_strided_slice %205 {offsets = [0, 0, 0, 0], sizes = [4, 1, 4, 32], strides = [1, 1, 1, 1]} : vector<4x2x4x32xf32> to vector<4x1x4x32xf32>
    %207 = vector.shape_cast %206 : vector<4x1x4x32xf32> to vector<4x4x32xf32>
    %208 = tpu.concatenate %175, %179, %183, %187, %191, %195, %199, %203, %207 in 2 : vector<4x4x32xf32>, vector<4x4x32xf32>, vector<4x4x32xf32>, vector<4x4x32xf32>, vector<4x4x32xf32>, vector<4x4x32xf32>, vector<4x4x32xf32>, vector<4x4x32xf32>, vector<4x4x32xf32> -> vector<4x4x288xf32>
    %209 = vector.extract_strided_slice %208 {offsets = [0, 0, 0], sizes = [1, 4, 288], strides = [1, 1, 1]} : vector<4x4x288xf32> to vector<1x4x288xf32>
    %210 = vector.shape_cast %209 : vector<1x4x288xf32> to vector<4x288xf32>
    %211 = vector.extract_strided_slice %208 {offsets = [1, 0, 0], sizes = [1, 4, 288], strides = [1, 1, 1]} : vector<4x4x288xf32> to vector<1x4x288xf32>
    %212 = vector.shape_cast %211 : vector<1x4x288xf32> to vector<4x288xf32>
    %213 = vector.extract_strided_slice %208 {offsets = [2, 0, 0], sizes = [1, 4, 288], strides = [1, 1, 1]} : vector<4x4x288xf32> to vector<1x4x288xf32>
    %214 = vector.shape_cast %213 : vector<1x4x288xf32> to vector<4x288xf32>
    %215 = vector.extract_strided_slice %208 {offsets = [3, 0, 0], sizes = [1, 4, 288], strides = [1, 1, 1]} : vector<4x4x288xf32> to vector<1x4x288xf32>
    %216 = vector.shape_cast %215 : vector<1x4x288xf32> to vector<4x288xf32>
    %217 = tpu.concatenate %210, %212, %214, %216 in 0 : vector<4x288xf32>, vector<4x288xf32>, vector<4x288xf32>, vector<4x288xf32> -> vector<16x288xf32>
    %cst_20 = arith.constant dense<0.000000e+00> : vector<16x32xf32>
    %218 = tpu.matmul %217, %155, %cst_20 {dimension_numbers = #tpu.dot_dimension_numbers<[1], [0], [0], [1], [0, 0, 1, 1], [], []>} : vector<16x288xf32>, vector<288x32xf32>, vector<16x32xf32> -> vector<16x32xf32>
    %219 = vector.broadcast %156 : vector<1x32xf32> to vector<16x32xf32>
    %220 = arith.addf %218, %219 : vector<16x32xf32>
    %cst_21 = arith.constant 0.000000e+00 : f32
    %221 = vector.broadcast %cst_21 : f32 to vector<16x32xf32>
    %222 = arith.cmpf ogt, %220, %221 : vector<16x32xf32>
    %cst_22 = arith.constant 0.000000e+00 : f32
    %223 = vector.broadcast %cst_22 : f32 to vector<16x32xf32>
    %224 = arith.minimumf %220, %223 : vector<16x32xf32>
    %225 = math.exp %224 : vector<16x32xf32>
    %cst_23 = arith.constant 1.000000e+00 : f32
    %226 = vector.broadcast %cst_23 : f32 to vector<16x32xf32>
    %227 = arith.subf %225, %226 : vector<16x32xf32>
    %228 = arith.select %222, %220, %227 : vector<16x32xi1>, vector<16x32xf32>
    %229 = vector.extract_strided_slice %228 {offsets = [0, 0], sizes = [4, 32], strides = [1, 1]} : vector<16x32xf32> to vector<4x32xf32>
    %230 = vector.shape_cast %229 : vector<4x32xf32> to vector<1x4x32xf32>
    %231 = vector.extract_strided_slice %228 {offsets = [4, 0], sizes = [4, 32], strides = [1, 1]} : vector<16x32xf32> to vector<4x32xf32>
    %232 = vector.shape_cast %231 : vector<4x32xf32> to vector<1x4x32xf32>
    %233 = vector.extract_strided_slice %228 {offsets = [8, 0], sizes = [4, 32], strides = [1, 1]} : vector<16x32xf32> to vector<4x32xf32>
    %234 = vector.shape_cast %233 : vector<4x32xf32> to vector<1x4x32xf32>
    %235 = vector.extract_strided_slice %228 {offsets = [12, 0], sizes = [4, 32], strides = [1, 1]} : vector<16x32xf32> to vector<4x32xf32>
    %236 = vector.shape_cast %235 : vector<4x32xf32> to vector<1x4x32xf32>
    %237 = tpu.concatenate %230, %232, %234, %236 in 0 : vector<1x4x32xf32>, vector<1x4x32xf32>, vector<1x4x32xf32>, vector<1x4x32xf32> -> vector<4x4x32xf32>
    %c592 = arith.constant 592 : index
    %c0_24 = arith.constant 0 : index
    %238 = vector.load %arg2[%c592, %c0_24] : memref<1016x32xf32, #tpu.memory_space<vmem>>, vector<288x32xf32>
    %c1011 = arith.constant 1011 : index
    %c0_25 = arith.constant 0 : index
    %239 = vector.load %arg2[%c1011, %c0_25] : memref<1016x32xf32, #tpu.memory_space<vmem>>, vector<1x32xf32>
    %cst_26 = arith.constant 0.000000e+00 : f32
    %240 = vector.broadcast %cst_26 : f32 to vector<1x4x32xf32>
    %241 = tpu.concatenate %240, %237, %240 in 0 : vector<1x4x32xf32>, vector<4x4x32xf32>, vector<1x4x32xf32> -> vector<6x4x32xf32>
    %242 = vector.extract_strided_slice %241 {offsets = [0, 0, 0], sizes = [6, 1, 32], strides = [1, 1, 1]} : vector<6x4x32xf32> to vector<6x1x32xf32>
    %243 = vector.extract_strided_slice %241 {offsets = [0, 2, 0], sizes = [6, 1, 32], strides = [1, 1, 1]} : vector<6x4x32xf32> to vector<6x1x32xf32>
    %244 = tpu.concatenate %242, %243 in 1 : vector<6x1x32xf32>, vector<6x1x32xf32> -> vector<6x2x32xf32>
    %245 = vector.extract_strided_slice %241 {offsets = [0, 1, 0], sizes = [6, 1, 32], strides = [1, 1, 1]} : vector<6x4x32xf32> to vector<6x1x32xf32>
    %246 = vector.extract_strided_slice %241 {offsets = [0, 3, 0], sizes = [6, 1, 32], strides = [1, 1, 1]} : vector<6x4x32xf32> to vector<6x1x32xf32>
    %247 = tpu.concatenate %245, %246 in 1 : vector<6x1x32xf32>, vector<6x1x32xf32> -> vector<6x2x32xf32>
    %cst_27 = arith.constant 0.000000e+00 : f32
    %248 = vector.broadcast %cst_27 : f32 to vector<6x1x32xf32>
    %249 = vector.extract_strided_slice %247 {offsets = [0, 0, 0], sizes = [6, 1, 32], strides = [1, 1, 1]} : vector<6x2x32xf32> to vector<6x1x32xf32>
    %250 = tpu.concatenate %248, %249 in 1 : vector<6x1x32xf32>, vector<6x1x32xf32> -> vector<6x2x32xf32>
    %251 = vector.extract_strided_slice %250 {offsets = [0, 0, 0], sizes = [4, 2, 32], strides = [1, 1, 1]} : vector<6x2x32xf32> to vector<4x2x32xf32>
    %252 = vector.shape_cast %251 : vector<4x2x32xf32> to vector<2x2x2x32xf32>
    %253 = vector.extract_strided_slice %252 {offsets = [0, 0, 0, 0], sizes = [2, 1, 2, 32], strides = [1, 1, 1, 1]} : vector<2x2x2x32xf32> to vector<2x1x2x32xf32>
    %254 = vector.shape_cast %253 : vector<2x1x2x32xf32> to vector<2x2x32xf32>
    %255 = vector.extract_strided_slice %244 {offsets = [0, 0, 0], sizes = [4, 2, 32], strides = [1, 1, 1]} : vector<6x2x32xf32> to vector<4x2x32xf32>
    %256 = vector.shape_cast %255 : vector<4x2x32xf32> to vector<2x2x2x32xf32>
    %257 = vector.extract_strided_slice %256 {offsets = [0, 0, 0, 0], sizes = [2, 1, 2, 32], strides = [1, 1, 1, 1]} : vector<2x2x2x32xf32> to vector<2x1x2x32xf32>
    %258 = vector.shape_cast %257 : vector<2x1x2x32xf32> to vector<2x2x32xf32>
    %259 = vector.extract_strided_slice %247 {offsets = [0, 0, 0], sizes = [4, 2, 32], strides = [1, 1, 1]} : vector<6x2x32xf32> to vector<4x2x32xf32>
    %260 = vector.shape_cast %259 : vector<4x2x32xf32> to vector<2x2x2x32xf32>
    %261 = vector.extract_strided_slice %260 {offsets = [0, 0, 0, 0], sizes = [2, 1, 2, 32], strides = [1, 1, 1, 1]} : vector<2x2x2x32xf32> to vector<2x1x2x32xf32>
    %262 = vector.shape_cast %261 : vector<2x1x2x32xf32> to vector<2x2x32xf32>
    %263 = vector.extract_strided_slice %250 {offsets = [1, 0, 0], sizes = [4, 2, 32], strides = [1, 1, 1]} : vector<6x2x32xf32> to vector<4x2x32xf32>
    %264 = vector.shape_cast %263 : vector<4x2x32xf32> to vector<2x2x2x32xf32>
    %265 = vector.extract_strided_slice %264 {offsets = [0, 0, 0, 0], sizes = [2, 1, 2, 32], strides = [1, 1, 1, 1]} : vector<2x2x2x32xf32> to vector<2x1x2x32xf32>
    %266 = vector.shape_cast %265 : vector<2x1x2x32xf32> to vector<2x2x32xf32>
    %267 = vector.extract_strided_slice %244 {offsets = [1, 0, 0], sizes = [4, 2, 32], strides = [1, 1, 1]} : vector<6x2x32xf32> to vector<4x2x32xf32>
    %268 = vector.shape_cast %267 : vector<4x2x32xf32> to vector<2x2x2x32xf32>
    %269 = vector.extract_strided_slice %268 {offsets = [0, 0, 0, 0], sizes = [2, 1, 2, 32], strides = [1, 1, 1, 1]} : vector<2x2x2x32xf32> to vector<2x1x2x32xf32>
    %270 = vector.shape_cast %269 : vector<2x1x2x32xf32> to vector<2x2x32xf32>
    %271 = vector.extract_strided_slice %247 {offsets = [1, 0, 0], sizes = [4, 2, 32], strides = [1, 1, 1]} : vector<6x2x32xf32> to vector<4x2x32xf32>
    %272 = vector.shape_cast %271 : vector<4x2x32xf32> to vector<2x2x2x32xf32>
    %273 = vector.extract_strided_slice %272 {offsets = [0, 0, 0, 0], sizes = [2, 1, 2, 32], strides = [1, 1, 1, 1]} : vector<2x2x2x32xf32> to vector<2x1x2x32xf32>
    %274 = vector.shape_cast %273 : vector<2x1x2x32xf32> to vector<2x2x32xf32>
    %275 = vector.extract_strided_slice %250 {offsets = [2, 0, 0], sizes = [4, 2, 32], strides = [1, 1, 1]} : vector<6x2x32xf32> to vector<4x2x32xf32>
    %276 = vector.shape_cast %275 : vector<4x2x32xf32> to vector<2x2x2x32xf32>
    %277 = vector.extract_strided_slice %276 {offsets = [0, 0, 0, 0], sizes = [2, 1, 2, 32], strides = [1, 1, 1, 1]} : vector<2x2x2x32xf32> to vector<2x1x2x32xf32>
    %278 = vector.shape_cast %277 : vector<2x1x2x32xf32> to vector<2x2x32xf32>
    %279 = vector.extract_strided_slice %244 {offsets = [2, 0, 0], sizes = [4, 2, 32], strides = [1, 1, 1]} : vector<6x2x32xf32> to vector<4x2x32xf32>
    %280 = vector.shape_cast %279 : vector<4x2x32xf32> to vector<2x2x2x32xf32>
    %281 = vector.extract_strided_slice %280 {offsets = [0, 0, 0, 0], sizes = [2, 1, 2, 32], strides = [1, 1, 1, 1]} : vector<2x2x2x32xf32> to vector<2x1x2x32xf32>
    %282 = vector.shape_cast %281 : vector<2x1x2x32xf32> to vector<2x2x32xf32>
    %283 = vector.extract_strided_slice %247 {offsets = [2, 0, 0], sizes = [4, 2, 32], strides = [1, 1, 1]} : vector<6x2x32xf32> to vector<4x2x32xf32>
    %284 = vector.shape_cast %283 : vector<4x2x32xf32> to vector<2x2x2x32xf32>
    %285 = vector.extract_strided_slice %284 {offsets = [0, 0, 0, 0], sizes = [2, 1, 2, 32], strides = [1, 1, 1, 1]} : vector<2x2x2x32xf32> to vector<2x1x2x32xf32>
    %286 = vector.shape_cast %285 : vector<2x1x2x32xf32> to vector<2x2x32xf32>
    %287 = tpu.concatenate %254, %258, %262, %266, %270, %274, %278, %282, %286 in 2 : vector<2x2x32xf32>, vector<2x2x32xf32>, vector<2x2x32xf32>, vector<2x2x32xf32>, vector<2x2x32xf32>, vector<2x2x32xf32>, vector<2x2x32xf32>, vector<2x2x32xf32>, vector<2x2x32xf32> -> vector<2x2x288xf32>
    %288 = vector.extract_strided_slice %287 {offsets = [0, 0, 0], sizes = [1, 2, 288], strides = [1, 1, 1]} : vector<2x2x288xf32> to vector<1x2x288xf32>
    %289 = vector.shape_cast %288 : vector<1x2x288xf32> to vector<2x288xf32>
    %290 = vector.extract_strided_slice %287 {offsets = [1, 0, 0], sizes = [1, 2, 288], strides = [1, 1, 1]} : vector<2x2x288xf32> to vector<1x2x288xf32>
    %291 = vector.shape_cast %290 : vector<1x2x288xf32> to vector<2x288xf32>
    %292 = tpu.concatenate %289, %291 in 0 : vector<2x288xf32>, vector<2x288xf32> -> vector<4x288xf32>
    %cst_28 = arith.constant dense<0.000000e+00> : vector<4x32xf32>
    %293 = tpu.matmul %292, %238, %cst_28 {dimension_numbers = #tpu.dot_dimension_numbers<[1], [0], [0], [1], [0, 0, 1, 1], [], []>} : vector<4x288xf32>, vector<288x32xf32>, vector<4x32xf32> -> vector<4x32xf32>
    %294 = vector.broadcast %239 : vector<1x32xf32> to vector<4x32xf32>
    %295 = arith.addf %293, %294 : vector<4x32xf32>
    %cst_29 = arith.constant 0.000000e+00 : f32
    %296 = vector.broadcast %cst_29 : f32 to vector<4x32xf32>
    %297 = arith.cmpf ogt, %295, %296 : vector<4x32xf32>
    %cst_30 = arith.constant 0.000000e+00 : f32
    %298 = vector.broadcast %cst_30 : f32 to vector<4x32xf32>
    %299 = arith.minimumf %295, %298 : vector<4x32xf32>
    %300 = math.exp %299 : vector<4x32xf32>
    %cst_31 = arith.constant 1.000000e+00 : f32
    %301 = vector.broadcast %cst_31 : f32 to vector<4x32xf32>
    %302 = arith.subf %300, %301 : vector<4x32xf32>
    %303 = arith.select %297, %295, %302 : vector<4x32xi1>, vector<4x32xf32>
    %c1012 = arith.constant 1012 : index
    %c0_32 = arith.constant 0 : index
    %304 = vector.load %arg2[%c1012, %c0_32] : memref<1016x32xf32, #tpu.memory_space<vmem>>, vector<1x32xf32>
    %305 = vector.extract_strided_slice %303 {offsets = [0, 0], sizes = [1, 32], strides = [1, 1]} : vector<4x32xf32> to vector<1x32xf32>
    %c880 = arith.constant 880 : index
    %c0_33 = arith.constant 0 : index
    %306 = vector.load %arg2[%c880, %c0_33] : memref<1016x32xf32, #tpu.memory_space<vmem>>, vector<32x32xf32>
    %cst_34 = arith.constant dense<0.000000e+00> : vector<1x32xf32>
    %307 = tpu.matmul %305, %306, %cst_34 {dimension_numbers = #tpu.dot_dimension_numbers<[1], [0], [0], [1], [0, 0, 1, 1], [], []>} : vector<1x32xf32>, vector<32x32xf32>, vector<1x32xf32> -> vector<1x32xf32>
    %308 = arith.addf %304, %307 : vector<1x32xf32>
    %309 = vector.extract_strided_slice %303 {offsets = [1, 0], sizes = [1, 32], strides = [1, 1]} : vector<4x32xf32> to vector<1x32xf32>
    %c912 = arith.constant 912 : index
    %c0_35 = arith.constant 0 : index
    %310 = vector.load %arg2[%c912, %c0_35] : memref<1016x32xf32, #tpu.memory_space<vmem>>, vector<32x32xf32>
    %cst_36 = arith.constant dense<0.000000e+00> : vector<1x32xf32>
    %311 = tpu.matmul %309, %310, %cst_36 {dimension_numbers = #tpu.dot_dimension_numbers<[1], [0], [0], [1], [0, 0, 1, 1], [], []>} : vector<1x32xf32>, vector<32x32xf32>, vector<1x32xf32> -> vector<1x32xf32>
    %312 = arith.addf %308, %311 : vector<1x32xf32>
    %313 = vector.extract_strided_slice %303 {offsets = [2, 0], sizes = [1, 32], strides = [1, 1]} : vector<4x32xf32> to vector<1x32xf32>
    %c944 = arith.constant 944 : index
    %c0_37 = arith.constant 0 : index
    %314 = vector.load %arg2[%c944, %c0_37] : memref<1016x32xf32, #tpu.memory_space<vmem>>, vector<32x32xf32>
    %cst_38 = arith.constant dense<0.000000e+00> : vector<1x32xf32>
    %315 = tpu.matmul %313, %314, %cst_38 {dimension_numbers = #tpu.dot_dimension_numbers<[1], [0], [0], [1], [0, 0, 1, 1], [], []>} : vector<1x32xf32>, vector<32x32xf32>, vector<1x32xf32> -> vector<1x32xf32>
    %316 = arith.addf %312, %315 : vector<1x32xf32>
    %317 = vector.extract_strided_slice %303 {offsets = [3, 0], sizes = [1, 32], strides = [1, 1]} : vector<4x32xf32> to vector<1x32xf32>
    %c976 = arith.constant 976 : index
    %c0_39 = arith.constant 0 : index
    %318 = vector.load %arg2[%c976, %c0_39] : memref<1016x32xf32, #tpu.memory_space<vmem>>, vector<32x32xf32>
    %cst_40 = arith.constant dense<0.000000e+00> : vector<1x32xf32>
    %319 = tpu.matmul %317, %318, %cst_40 {dimension_numbers = #tpu.dot_dimension_numbers<[1], [0], [0], [1], [0, 0, 1, 1], [], []>} : vector<1x32xf32>, vector<32x32xf32>, vector<1x32xf32> -> vector<1x32xf32>
    %320 = arith.addf %316, %319 : vector<1x32xf32>
    %c0_41 = arith.constant 0 : index
    %c0_42 = arith.constant 0 : index
    %c0_43 = arith.constant 0 : index
    %321 = vector.load %arg3[%c0_41, %c0_42, %c0_43] : memref<1x1x32xf32, #tpu.memory_space<vmem>>, vector<1x1x32xf32>
    %322 = vector.shape_cast %321 : vector<1x1x32xf32> to vector<1x32xf32>
    %323 = vector.shape_cast %320 : vector<1x32xf32> to vector<1x1x32xf32>
    tpu.vector_store %arg3[%c0_41, %c0_42, %c0_43], %323 {strides = array<i32>} : memref<1x1x32xf32, #tpu.memory_space<vmem>>, vector<1x1x32xf32>,
    return
  }
  func.func @transform_0(%arg0: i32) -> (i32, i32, i32) {
    %c0_i32 = arith.constant 0 : i32
    %c0_i32_0 = arith.constant 0 : i32
    %c0_i32_1 = arith.constant 0 : i32
    return %arg0, %c0_i32, %c0_i32_0 : i32, i32, i32
  }
  func.func @transform_1(%arg0: i32) -> (i32, i32) {
    %c0_i32 = arith.constant 0 : i32
    %c0_i32_0 = arith.constant 0 : i32
    %c0_i32_1 = arith.constant 0 : i32
    return %c0_i32, %c0_i32_0 : i32, i32
  }
  func.func @transform_2(%arg0: i32) -> (i32, i32, i32) {
    %c0_i32 = arith.constant 0 : i32
    %c0_i32_0 = arith.constant 0 : i32
    %c0_i32_1 = arith.constant 0 : i32
    return %arg0, %c0_i32, %c0_i32_0 : i32, i32, i32
  }
}

</mosaic_0001>

<bundles_post_ra>
// kernel: actor_critic_forward.1
= control target key start
LH: loop header
LB: loop body
LE: loop exit
PB: predicated region body
PF: predicated region fallthrough
CT: control target
= control target key end

     0   :  { %s3958_s9 = smov 0   ;;  %s6186_s0 = inlined_call_operand.vmem [shape: f32[8,256,9], index: 0, kind: input, shape index: {}]   ;;  %s6187_s1 = inlined_call_operand.vmem [shape: f32[1016,32], index: 1, kind: input, shape index: {}]   ;;  %s6188_s2 = inlined_call_operand.vmem [shape: f32[8,1,32], index: 2, kind: output, shape index: {}]  }
   0x1 LB: > { %s3011_s10 = sadd.s32 4294967295, %s3934_s9   ;;  %p3015_p0 = scmp.ge.s32.totalorder %s3934_s9, 1  ;;  %s3934_s9 = sphi %s3958_s9, %s12_s9  }
   0x2   : > { %p112_p1 = scmp.lt.s32.totalorder %s3934_s9, 9 }
   0x4   : > { %p113_p2 = pnand %p3015_p0, %p112_p1 }
   0x6   : > { %116 = sbr.rel (%p113_p2) target bundleno = 1767 (0x6e7), region = 28 }
   0xd   : > { %v172_v0 = vld [vmem:[%s6187_s1] sm:$0xff]  ;;  %v173_v1 = vld [vmem:[%s6187_s1 + $0x8] sm:$0x1]  ;;  %vm276_vm0 = vcmask 1040384   ;;  %p132_p3 = scmp.lt.s32.totalorder %s3011_s10, 7  ;;  %vm3936_vm1 = vmmov 1  }
   0xe   : > { %v3460_v2 = vpack.c.bf16 %v173_v1, %v172_v0  ;;  %vm3461_vm2 = vmpackc.low %vm276_vm0, %vm3936_vm1  ;;  %vm179_vm3 = vcmask 72704   ;;  %v6189_v35 = vmov 0.0   ;;  %vm1022_vm4 = vcmask 1041408   ;;  %v4053_v39 = vld [vmem:[%s6187_s1 + $0x3f0] ss:$0 sm:$0xff]  ;;  %s3938_s21 = smov 32  }
   0xf   : > { %s6363_s10 = smov (!%p132_p3, %s3011_s10), 7  ;;  %v751_v36 = vrot.slane %v6189_v35, 1  ;;  %v785_v37 = vrot.slane %v6189_v35, 2  ;;  %v819_v40 = vrot.slane %v6189_v35, 3  ;;  %vm1040_vm5 = vcmask 1042432   ;;  %s3939_s22 = smov 96  }
  0x10   : > { %3462 = vmatprep.subr.msk.bf16.mxu0 %vm3461_vm2, %v3460_v2  ;;  %3608 = vmatprep.subr.msk.bf16.mxu1 %vm3461_vm2, %v3460_v2  ;;  %s3115_s15 = sshll.u32 %s6363_s10, 8  ;;  %v869_v51 = vrot.slane %v6189_v35, 4  ;;  %vm1058_vm6 = vcmask 1043456   ;;  %v903_v59 = vrot.slane %v6189_v35, 5  ;;  %vm1076_vm7 = vcmask 1044480   ;;  %s3940_s23 = smov 64  }
  0x11   : > { %3465 = vmatpush3.bf16.msk.msra.mxu0 %vm3461_vm2, %v3460_v2  ;;  %3609 = vmatpush3.bf16.msk.msra.mxu1 %vm3461_vm2, %v3460_v2  ;;  %s3979_s18 = scalar_lea.vmem %s6186_s0, %s3115_s15  ;;  %v4048_v38 = vsel %vm276_vm0, 0.0, %v751_v36  ;;  %v4065_v48 = vsel %vm276_vm0, %v751_v36, %v785_v37  ;;  %vm1094_vm8 = vcmask 1045504   ;;  %vm1112_vm9 = vcmask 1046528   ;;  %s139_s20 = scalar_lea.vmem %s6188_s2, %s6363_s10 }
  0x12   : > { %v140_v3 = vld [vmem:[%s3979_s18] sm:$0xff]  ;;  %v141_v5 = vld [vmem:[%s3979_s18 + $0x8] sm:$0xff]  ;;  %v142_v7 = vld [vmem:[%s3979_s18 + $0x10] sm:$0xff]  ;;  %6212 = vst [vmem:[#allocation2_spill] sm:$0xff] %v4048_v38  ;;  %v1023_v43 = vsel %vm1022_vm4, %v4048_v38, %v785_v37  ;;  %v1179_v60 = vsel %vm1022_vm4, %v4065_v48, %v819_v40 }
  0x13   : > { %v156_v4 = vld [vmem:[%s3979_s18 + $0x80] sm:$0xff]  ;;  %3326 = vmatprep.mubr.msk.f32.mxu0 %vm179_vm3, %v140_v3  ;;  %v157_v6 = vld [vmem:[%s3979_s18 + $0x88] sm:$0xff]  ;;  %v158_v8 = vld [vmem:[%s3979_s18 + $0x90] sm:$0xff]  ;;  %6213 = vst [vmem:[#allocation3_spill] sm:$0xff] %v4065_v48  ;;  %v4077_v54 = vsel %vm1040_vm5, %v1023_v43, %v819_v40 }
  0x14   : > { %3350 = vmatprep.mubr.msk.f32.mxu1 %vm179_vm3, %v156_v4  ;;  %3327 = vmatmul.mubr.msk.f32.vlgmr.msra.gmra.mrb[0].mxu0 %vm179_vm3, %v141_v5  ;;  %v143_v9 = vld [vmem:[%s3979_s18 + $0x18] sm:$0xff]  ;;  %v144_v11 = vld [vmem:[%s3979_s18 + $0x20] sm:$0xff]  ;;  %v145_v13 = vld [vmem:[%s3979_s18 + $0x28] sm:$0xff]  ;;  %6214 = vst [vmem:[#allocation4_spill] sm:$0xff] %v4077_v54 }
  0x15   : > { %3351 = vmatmul.mubr.msk.f32.vlgmr.msra.gmra.mrb[0].mxu1 %vm179_vm3, %v157_v6  ;;  %3329 = vmatprep.mubr.msk.f32.mxu0 %vm179_vm3, %v142_v7  ;;  %v159_v10 = vld [vmem:[%s3979_s18 + $0x98] sm:$0xff]  ;;  %v160_v12 = vld [vmem:[%s3979_s18 + $0xa0] sm:$0xff]  ;;  %v161_v14 = vld [vmem:[%s3979_s18 + $0xa8] sm:$0xff]  ;;  %v1059_v6 = vsel %vm1058_vm6, %v4077_v54, %v869_v51 }
  0x16   : > { %3353 = vmatprep.mubr.msk.f32.mxu1 %vm179_vm3, %v158_v8  ;;  %v146_v15 = vld [vmem:[%s3979_s18 + $0x30] sm:$0xff]  ;;  %v147_v17 = vld [vmem:[%s3979_s18 + $0x38] sm:$0xff]  ;;  %v148_v19 = vld [vmem:[%s3979_s18 + $0x40] sm:$0xff] }
  0x17   : > { %v162_v16 = vld [vmem:[%s3979_s18 + $0xb0] sm:$0xff]  ;;  %v163_v18 = vld [vmem:[%s3979_s18 + $0xb8] sm:$0xff]  ;;  %v164_v20 = vld [vmem:[%s3979_s18 + $0xc0] sm:$0xff] }
  0x18   : > { %3330 = vmatmul.mubr.msk.f32.gmra.mrb[2].mxu0 %vm179_vm3, %v143_v9  ;;  %v149_v21 = vld [vmem:[%s3979_s18 + $0x48] sm:$0xff]  ;;  %v150_v23 = vld [vmem:[%s3979_s18 + $0x50] sm:$0xff]  ;;  %v151_v25 = vld [vmem:[%s3979_s18 + $0x58] sm:$0xff] }
  0x19   : > { %3354 = vmatmul.mubr.msk.f32.gmra.mrb[2].mxu1 %vm179_vm3, %v159_v10  ;;  %3332 = vmatprep.mubr.msk.f32.mxu0 %vm179_vm3, %v144_v11  ;;  %v165_v22 = vld [vmem:[%s3979_s18 + $0xc8] sm:$0xff]  ;;  %v166_v24 = vld [vmem:[%s3979_s18 + $0xd0] sm:$0xff]  ;;  %v167_v26 = vld [vmem:[%s3979_s18 + $0xd8] sm:$0xff] }
  0x1a   : > { %3356 = vmatprep.mubr.msk.f32.mxu1 %vm179_vm3, %v160_v12  ;;  %v152_v27 = vld [vmem:[%s3979_s18 + $0x60] sm:$0xff]  ;;  %v153_v29 = vld [vmem:[%s3979_s18 + $0x68] sm:$0xff]  ;;  %v154_v31 = vld [vmem:[%s3979_s18 + $0x70] sm:$0xff] }
  0x1b   : > { %v168_v28 = vld [vmem:[%s3979_s18 + $0xe0] sm:$0xff]  ;;  %v169_v30 = vld [vmem:[%s3979_s18 + $0xe8] sm:$0xff]  ;;  %v170_v32 = vld [vmem:[%s3979_s18 + $0xf0] sm:$0xff] }
  0x1c   : > { %3333 = vmatmul.mubr.msk.f32.gmra.mrb[4].mxu0 %vm179_vm3, %v145_v13  ;;  %v155_v33 = vld [vmem:[%s3979_s18 + $0x78] sm:$0xff]  ;;  %v4102_v13 = vsel %vm1040_vm5, %v1179_v60, %v869_v51 }
  0x1d   : > { %3357 = vmatmul.mubr.msk.f32.gmra.mrb[4].mxu1 %vm179_vm3, %v161_v14  ;;  %3335 = vmatprep.mubr.msk.f32.mxu0 %vm179_vm3, %v146_v15  ;;  %v171_v34 = vld [vmem:[%s3979_s18 + $0xf8] sm:$0xff]  ;;  %6215 = vst [vmem:[#allocation5_spill] sm:$0xff] %v4102_v13 }
  0x1e   : > { %3359 = vmatprep.mubr.msk.f32.mxu1 %vm179_vm3, %v162_v16 }
  0x20   : > { %3336 = vmatmul.mubr.msk.f32.gmra.mrb[6].mxu0 %vm179_vm3, %v147_v17  ;;  %v937_v17 = vrot.slane %v6189_v35, 6 }
  0x21   : > { %3360 = vmatmul.mubr.msk.f32.gmra.mrb[6].mxu1 %vm179_vm3, %v163_v18  ;;  %3338 = vmatprep.mubr.msk.f32.mxu0 %vm179_vm3, %v148_v19  ;;  %v1077_v18 = vsel %vm1076_vm7, %v1059_v6, %v903_v59 }
  0x22   : > { %3362 = vmatprep.mubr.msk.f32.mxu1 %vm179_vm3, %v164_v20  ;;  %v1095_v37 = vsel %vm1094_vm8, %v1077_v18, %v937_v17 }
  0x24   : > { %3339 = vmatmul.mubr.msk.f32.gmra.mrb[8].mxu0 %vm179_vm3, %v149_v21 }
  0x25   : > { %3363 = vmatmul.mubr.msk.f32.gmra.mrb[8].mxu1 %vm179_vm3, %v165_v22  ;;  %3341 = vmatprep.mubr.msk.f32.mxu0 %vm179_vm3, %v150_v23  ;;  %v1213_v22 = vsel %vm1058_vm6, %v4102_v13, %v903_v59 }
  0x26   : > { %3365 = vmatprep.mubr.msk.f32.mxu1 %vm179_vm3, %v166_v24 }
  0x28   : > { %3342 = vmatmul.mubr.msk.f32.gmra.mrb[10].mxu0 %vm179_vm3, %v151_v25 }
  0x29   : > { %3366 = vmatmul.mubr.msk.f32.gmra.mrb[10].mxu1 %vm179_vm3, %v167_v26  ;;  %3344 = vmatprep.mubr.msk.f32.mxu0 %vm179_vm3, %v152_v27 }
  0x2a   : > { %3368 = vmatprep.mubr.msk.f32.mxu1 %vm179_vm3, %v168_v28 }
  0x2c   : > { %3345 = vmatmul.mubr.msk.f32.gmra.mrb[12].mxu0 %vm179_vm3, %v153_v29 }
  0x2d   : > { %3369 = vmatmul.mubr.msk.f32.gmra.mrb[12].mxu1 %vm179_vm3, %v169_v30  ;;  %3347 = vmatprep.mubr.msk.f32.mxu0 %vm179_vm3, %v154_v31 }
  0x2e   : > { %3371 = vmatprep.mubr.msk.f32.mxu1 %vm179_vm3, %v170_v32  ;;  %v971_v32 = vrot.slane %v6189_v35, 7 }
  0x30   : > { %3348 = vmatmul.mubr.msk.f32.gmra.mrb[14].mxu0 %vm179_vm3, %v155_v33  ;;  %v1230_v33 = vsel %vm1076_vm7, %v1213_v22, %v937_v17 }
  0x31   : > { %3372 = vmatmul.mubr.msk.f32.gmra.mrb[14].mxu1 %vm179_vm3, %v171_v34 }
  0xe7   : > { %v3328_v41 = vpop.f32.mrb[0].mxu0 }
  0xe8   : > { %v3352_v42 = vpop.f32.mrb[0].mxu1  ;;  %v4059_v44 = vadd.f32 %v3328_v41, %v4053_v39  ;;  %v346_v46 = vpop.f32.mrb[1].mxu0 }
  0xe9   : > { %v4062_v45 = vadd.f32 %v3352_v42, %v4053_v39  ;;  %v426_v47 = vpop.f32.mrb[1].mxu1  ;;  %v4068_v49 = vadd.f32 %v4053_v39, %v346_v46 }
  0xea   : > { %v4071_v50 = vadd.f32 %v4053_v39, %v426_v47  ;;  %v538_v52 = vmin.f32 %v4059_v44, 0.0  ;;  %vm506_vm10 = vcmp.gt.f32.partialorder %v4059_v44, 0.0 }
  0xeb   : > { %v554_v53 = vmin.f32 %v4062_v45, 0.0  ;;  %v537_v55 = vmin.f32 %v4068_v49, 0.0  ;;  %v3331_v57 = vpop.f32.mrb[2].mxu0  ;;  %vm522_vm11 = vcmp.gt.f32.partialorder %v4062_v45, 0.0  ;;  %vm505_vm12 = vcmp.gt.f32.partialorder %v4068_v49, 0.0 }
  0xec   : > { %v553_v56 = vmin.f32 %v4071_v50, 0.0  ;;  %v3355_v58 = vpop.f32.mrb[2].mxu1  ;;  %v571_v61 = vmul.f32 1.442695, %v538_v52  ;;  %v4085_v63 = vadd.f32 %v3331_v57, %v4053_v39  ;;  %v356_v1 = vpop.f32.mrb[3].mxu0  ;;  %vm521_vm13 = vcmp.gt.f32.partialorder %v4071_v50, 0.0 }
  0xed   : > { %v603_v62 = vmul.f32 1.442695, %v554_v53  ;;  %v4088_v0 = vadd.f32 %v3355_v58, %v4053_v39  ;;  %v436_v2 = vpop.f32.mrb[3].mxu1  ;;  %v569_v3 = vmul.f32 1.442695, %v537_v55  ;;  %v4091_v5 = vadd.f32 %v4053_v39, %v356_v1 }
  0xee   : > { %v601_v4 = vmul.f32 1.442695, %v553_v56  ;;  %3842 = vpow2.f32 %v571_v61  ;;  %v540_v7 = vmin.f32 %v4085_v63, 0.0  ;;  %v4097_v8 = vadd.f32 %v4053_v39, %v436_v2 }
  0xef   : > { %3844 = vpow2.f32 %v603_v62  ;;  %v556_v9 = vmin.f32 %v4088_v0, 0.0  ;;  %v539_v10 = vmin.f32 %v4091_v5, 0.0  ;;  %v3334_v11 = vpop.f32.mrb[4].mxu0  ;;  %v1247_v53 = vsel %vm1094_vm8, %v1230_v33, %v971_v32 }
  0xf0   : > { %v3358_v12 = vpop.f32.mrb[4].mxu1  ;;  %3846 = vpow2.f32 %v569_v3  ;;  %v366_v14 = vpop.f32.mrb[5].mxu0  ;;  %v575_v16 = vmul.f32 1.442695, %v540_v7  ;;  %v555_v20 = vmin.f32 %v4097_v8, 0.0  ;;  %v4113_v24 = vadd.f32 %v3334_v11, %v4053_v39 }
  0xf1   : > { %v446_v15 = vpop.f32.mrb[5].mxu1  ;;  %3848 = vpow2.f32 %v601_v4  ;;  %v573_v19 = vmul.f32 1.442695, %v539_v10  ;;  %v4108_v21 = vadd.f32 %v4053_v39, %v366_v14  ;;  %v607_v23 = vmul.f32 1.442695, %v556_v9 }
  0xf2   : > { %v4116_v25 = vadd.f32 %v4053_v39, %v446_v15  ;;  %v4119_v28 = vadd.f32 %v3358_v12, %v4053_v39  ;;  %3850 = vpow2.f32 %v575_v16  ;;  %v605_v34 = vmul.f32 1.442695, %v555_v20 }
  0xf3   : > { %v3337_v26 = vpop.f32.mrb[6].mxu0  ;;  %v541_v31 = vmin.f32 %v4108_v21, 0.0  ;;  %3852 = vpow2.f32 %v573_v19  ;;  %v542_v40 = vmin.f32 %v4113_v24, 0.0  ;;  %v4140_v58 = vsel %vm1112_vm9, %v1095_v37, %v971_v32 }
  0xf4   : > { %v3361_v27 = vpop.f32.mrb[6].mxu1  ;;  %v376_v29 = vpop.f32.mrb[7].mxu0  ;;  %v557_v36 = vmin.f32 %v4116_v25, 0.0  ;;  %3854 = vpow2.f32 %v607_v23  ;;  %v558_v47 = vmin.f32 %v4119_v28, 0.0  ;;  %v4147_v2 = vsel %vm1112_vm9, %v1247_v53, 0.0 }
  0xf5   : > { %v4121_v30 = vpop.f32.mrb[7].mxu1  ;;  %v577_v41 = vmul.f32 1.442695, %v541_v31  ;;  %3856 = vpow2.f32 %v605_v34  ;;  %v579_v61 = vmul.f32 1.442695, %v542_v40  ;;  %v4151_v4 = vadd.f32 %v3337_v26, %v4053_v39 }
  0xf6   : > { %v609_v57 = vmul.f32 1.442695, %v557_v36  ;;  %v611_v3 = vmul.f32 1.442695, %v558_v47  ;;  %v4154_v6 = vadd.f32 %v3361_v27, %v4053_v39  ;;  %vm508_vm14 = vcmp.gt.f32.partialorder %v4085_v63, 0.0 }
  0xf7   : > { %v4129_v42 = vpop.f32.mrb[8].mxu0  ;;  %3858 = vpow2.f32 %v577_v41  ;;  %vm507_vm15 = vcmp.gt.f32.partialorder %v4091_v5, 0.0  ;;  %vm524_vm1 = vcmp.gt.f32.partialorder %v4088_v0, 0.0  ;;  %v4172_v18 = vadd.f32 %v4053_v39, %v376_v29 }
  0xf8   : > { %v4131_v43 = vpop.f32.mrb[8].mxu1  ;;  %v3843_v46 = vpop.eup %3842  ;;  %3860 = vpow2.f32 %v609_v57  ;;  %v544_v23 = vmin.f32 %v4151_v4, 0.0  ;;  %v560_v26 = vmin.f32 %v4154_v6, 0.0  ;;  %vm523_vm2 = vcmp.gt.f32.partialorder %v4097_v8, 0.0 }
  0xf9   : > { %v4134_v51 = vpop.f32.mrb[9].mxu0  ;;  %v4136_v52 = vpop.f32.mrb[9].mxu1  ;;  %v3053_v10 = vadd.f32 -1.0, %v3843_v46  ;;  %3862 = vpow2.f32 %v579_v61  ;;  %vm509_vm3 = vcmp.gt.f32.partialorder %v4108_v21, 0.0 }
  0xfa   : > { %v3845_v55 = vpop.eup %3844  ;;  %3864 = vpow2.f32 %v611_v3 }
  0xfb   : > { %v3847_v56 = vpop.eup %3846  ;;  %v4142_v62 = vpop.f32.mrb[10].mxu0  ;;  %v3069_v11 = vadd.f32 -1.0, %v3845_v55  ;;  %v4197_v36 = vsel %vm506_vm10, %v4059_v44, %v3053_v10  ;;  %vm525_vm10 = vcmp.gt.f32.partialorder %v4116_v25, 0.0 }
  0xfc   : > { %v3849_v59 = vpop.eup %3848  ;;  %v3052_v60 = vadd.f32 -1.0, %v3847_v56  ;;  %v4144_v1 = vpop.f32.mrb[10].mxu1  ;;  %6216 = vst [vmem:[#allocation6_spill] sm:$0xff] %v4197_v36 }
  0xfd   : > { %v4156_v7 = vpop.f32.mrb[11].mxu0  ;;  %v4158_v9 = vpop.f32.mrb[11].mxu1  ;;  %v3068_v14 = vadd.f32 -1.0, %v3849_v59  ;;  %v4202_v37 = vsel %vm522_vm11, %v4062_v45, %v3069_v11  ;;  %v583_v11 = vmul.f32 1.442695, %v544_v23  ;;  %vm510_vm11 = vcmp.gt.f32.partialorder %v4113_v24, 0.0 }
  0xfe   : > { %v4164_v12 = vsel %vm505_vm12, %v4068_v49, %v3052_v60  ;;  %v3851_v15 = vpop.eup %3850  ;;  %vm526_vm12 = vcmp.gt.f32.partialorder %v4119_v28, 0.0 }
  0xff   : > { %v752_v16 = vrot.slane %v4164_v12, 1  ;;  %v786_v17 = vrot.slane %v4164_v12, 2  ;;  %v4174_v19 = vpop.f32.mrb[12].mxu0  ;;  %v3853_v20 = vpop.eup %3852  ;;  %v4181_v22 = vsel %vm521_vm13, %v4071_v50, %v3068_v14  ;;  %v6191_v32 = vrot.slane %v4164_v12, 3 }
 0x100   : > { %v4176_v49 = vpop.f32.mrb[12].mxu1  ;;  %v4185_v27 = vpop.f32.mrb[13].mxu0  ;;  %v760_v34 = vrot.slane %v4181_v22, 1  ;;  %v794_v50 = vrot.slane %v4181_v22, 2  ;;  %v3055_v41 = vadd.f32 -1.0, %v3851_v15  ;;  %v828_v47 = vrot.slane %v4181_v22, 3 }
 0x101   : > { %v4187_v31 = vpop.f32.mrb[13].mxu1  ;;  %v3855_v29 = vpop.eup %3854  ;;  %v1006_v33 = vsel %vm276_vm0, %v4164_v12, %v752_v16  ;;  %v3054_v44 = vadd.f32 -1.0, %v3853_v20  ;;  %v615_v14 = vmul.f32 1.442695, %v560_v26  ;;  %v4229_v15 = vadd.f32 %v4053_v39, %v4121_v30 }
 0x102   : > { %v1024_v40 = vsel %vm1022_vm4, %v1006_v33, %v786_v17  ;;  %v1014_v53 = vsel %vm276_vm0, %v4181_v22, %v760_v34  ;;  %v3857_v45 = vpop.eup %3856  ;;  %v3071_v59 = vadd.f32 -1.0, %v3855_v29  ;;  %v4240_v23 = vsel %vm508_vm14, %v4085_v63, %v3055_v41 }
 0x103   : > { %v4208_v46 = vsel %vm1040_vm5, %v1024_v40, %v6191_v32  ;;  %v4213_v55 = vpop.f32.mrb[14].mxu0  ;;  %v1032_v57 = vsel %vm1022_vm4, %v1014_v53, %v794_v50  ;;  %v3859_v3 = vpop.eup %3858  ;;  %v543_v40 = vmin.f32 %v4172_v18, 0.0  ;;  %v1171_v53 = vsel %vm276_vm0, %v760_v34, %v794_v50 }
 0x104   : > { %6217 = vst [vmem:[#allocation7_spill] sm:$0xff] %v4208_v46  ;;  %v4215_v56 = vpop.f32.mrb[14].mxu1  ;;  %v4220_v60 = vpop.f32.mrb[15].mxu0  ;;  %v4225_v10 = vsel %vm1040_vm5, %v1032_v57, %v828_v47  ;;  %v4245_v30 = vsel %vm507_vm15, %v4091_v5, %v3054_v44  ;;  %v3070_v26 = vadd.f32 -1.0, %v3857_v45  ;;  %v4252_v34 = vsel %vm524_vm1, %v4088_v0, %v3071_v59 }
 0x105   : > { %v4222_v61 = vpop.f32.mrb[15].mxu1  ;;  %6218 = vst [vmem:[#allocation8_spill] sm:$0xff] %v4225_v10  ;;  %v3861_v57 = vpop.eup %3860  ;;  %v3056_v50 = vadd.f32 -1.0, %v3859_v3  ;;  %v4256_v41 = vsel %vm276_vm0, %v752_v16, %v786_v17  ;;  %v1138_v5 = vrot.slane %v4181_v22, 4  ;;  %v1188_v0 = vsel %vm1022_vm4, %v1171_v53, %v828_v47 }
 0x106   : > { %v3863_v29 = vpop.eup %3862  ;;  %v4262_v44 = vsel %vm523_vm2, %v4097_v8, %v3070_v26  ;;  %v753_v3 = vrot.slane %v4245_v30, 1  ;;  %v787_v33 = vrot.slane %v4245_v30, 2  ;;  %v3072_v22 = vadd.f32 -1.0, %v3861_v57 }
 0x107   : > { %v3865_v45 = vpop.eup %3864  ;;  %3866 = vpow2.f32 %v583_v11  ;;  %v761_v26 = vrot.slane %v4262_v44, 1  ;;  %v795_v47 = vrot.slane %v4262_v44, 2  ;;  %v4278_v53 = vsel %vm509_vm3, %v4108_v21, %v3056_v50 }
 0x108   : > { %v4281_v59 = vsel %vm1040_vm5, %v1188_v0, %v1138_v5  ;;  %v6193_v35 = vrot.slane %v4245_v30, 3  ;;  %v1131_v11 = vrot.slane %v4245_v30, 4  ;;  %v1007_v57 = vsel %vm276_vm0, %v4245_v30, %v753_v3 }
 0x109   : > { %v1164_v8 = vsel %vm276_vm0, %v753_v3, %v787_v33  ;;  %v3057_v17 = vadd.f32 -1.0, %v3863_v29  ;;  %v6192_v20 = vrot.slane %v4278_v53, 1  ;;  %v6194_v21 = vrot.slane %v4262_v44, 3 }
 0x10a   : > { %v3073_v50 = vadd.f32 -1.0, %v3865_v45  ;;  %v6195_v5 = vrot.slane %v4278_v53, 2  ;;  %v4295_v0 = vsel %vm525_vm10, %v4116_v25, %v3072_v22  ;;  %v1172_v16 = vsel %vm276_vm0, %v761_v26, %v795_v47 }
 0x10b   : > { %v1008_v3 = vsel %vm276_vm0, %v4278_v53, %v6192_v20  ;;  %v762_v29 = vrot.slane %v4295_v0, 1  ;;  %v796_v63 = vrot.slane %v4295_v0, 2  ;;  %v4305_v45 = vsel %vm1022_vm4, %v1007_v57, %v787_v33 }
 0x10c   : > { %v1181_v32 = vsel %vm1022_vm4, %v1164_v8, %v6193_v35  ;;  %v4313_v25 = vsel %vm1022_vm4, %v1008_v3, %v6195_v5  ;;  %3868 = vpow2.f32 %v615_v14  ;;  %v4318_v22 = vsel %vm510_vm11, %v4113_v24, %v3057_v17 }
 0x10d   : > { %6219 = vst [vmem:[#allocation9_spill] sm:$0xff] %v4313_v25  ;;  %v830_v20 = vrot.slane %v4295_v0, 3  ;;  %v1016_v33 = vsel %vm276_vm0, %v4295_v0, %v762_v29  ;;  %v581_v57 = vmul.f32 1.442695, %v543_v40  ;;  %v1015_v8 = vsel %vm276_vm0, %v4262_v44, %v761_v26 }
 0x10e   : > { %v1189_v3 = vsel %vm1022_vm4, %v1172_v16, %v6194_v21  ;;  %v4331_v14 = vsel %vm526_vm12, %v4119_v28, %v3073_v50  ;;  %v1034_v24 = vsel %vm1022_vm4, %v1016_v33, %v796_v63  ;;  %vm512_vm13 = vcmp.gt.f32.partialorder %v4151_v4, 0.0 }
 0x10f   : > { %v4336_v17 = vsel %vm1040_vm5, %v1034_v24, %v830_v20  ;;  %3870 = vpow2.f32 %v581_v57  ;;  %v559_v40 = vmin.f32 %v4229_v15, 0.0  ;;  %v4341_v26 = vadd.f32 %v4129_v42, %v4053_v39 }
 0x110   : > { %6220 = vst [vmem:[#allocation10_spill] sm:$0xff] %v4336_v17  ;;  %v1139_v35 = vrot.slane %v4262_v44, 4  ;;  %v4346_v28 = vadd.f32 %v4131_v43, %v4053_v39  ;;  %v4350_v50 = vadd.f32 %v4053_v39, %v4134_v51  ;;  %v4354_v33 = vadd.f32 %v4053_v39, %v4136_v52 }
 0x111   : > { %v3867_v16 = vpop.eup %3866  ;;  %v4357_v57 = vsel %vm1040_vm5, %v1181_v32, %v1131_v11  ;;  %v4360_v42 = vsel %vm1022_vm4, %v1015_v8, %v795_v47  ;;  %vm528_vm14 = vcmp.gt.f32.partialorder %v4154_v6, 0.0  ;;  %v613_v5 = vmul.f32 1.442695, %v559_v40 }
 0x112   : > { %v4366_v43 = vsel %vm1040_vm5, %v1189_v3, %v1139_v35  ;;  %v546_v52 = vmin.f32 %v4341_v26, 0.0  ;;  %v3059_v11 = vadd.f32 -1.0, %v3867_v16  ;;  %v562_v47 = vmin.f32 %v4346_v28, 0.0 }
 0x113   : > { %6221 = vst [vmem:[#allocation11_spill] sm:$0xff] %v4366_v43  ;;  %v545_v8 = vmin.f32 %v4350_v50, 0.0  ;;  %vm511_vm15 = vcmp.gt.f32.partialorder %v4172_v18, 0.0  ;;  %3872 = vpow2.f32 %v613_v5  ;;  %v561_v24 = vmin.f32 %v4354_v33, 0.0 }
 0x114   : > { %v587_v21 = vmul.f32 1.442695, %v546_v52  ;;  %v4377_v35 = vadd.f32 %v4142_v62, %v4053_v39  ;;  %v619_v3 = vmul.f32 1.442695, %v562_v47  ;;  %v4381_v32 = vadd.f32 %v4144_v1, %v4053_v39 }
 0x115   : > { %v585_v40 = vmul.f32 1.442695, %v545_v8  ;;  %v4385_v16 = vadd.f32 %v4053_v39, %v4156_v7  ;;  %v617_v52 = vmul.f32 1.442695, %v561_v24  ;;  %v1173_v62 = vsel %vm276_vm0, %v762_v29, %v796_v63 }
 0x116   : > { %v3869_v51 = vpop.eup %3868  ;;  %3874 = vpow2.f32 %v587_v21  ;;  %v548_v48 = vmin.f32 %v4377_v35, 0.0  ;;  %v4393_v47 = vsel %vm512_vm13, %v4151_v4, %v3059_v11  ;;  %v564_v1 = vmin.f32 %v4381_v32, 0.0 }
 0x117   : > { %3876 = vpow2.f32 %v619_v3  ;;  %v3075_v8 = vadd.f32 -1.0, %v3869_v51  ;;  %v547_v38 = vmin.f32 %v4385_v16, 0.0  ;;  %v6222_v63 = vrot.slane %v4278_v53, 2 }
 0x118   : > { %3878 = vpow2.f32 %v585_v40  ;;  %v591_v7 = vmul.f32 1.442695, %v548_v48  ;;  %v6223_v29 = vrot.slane %v4278_v53, 1  ;;  %v4408_v51 = vsel %vm1022_vm4, %v1173_v62, %v830_v20 }
 0x119   : > { %v3871_v5 = vpop.eup %3870  ;;  %3880 = vpow2.f32 %v617_v52  ;;  %vm527_vm1 = vcmp.gt.f32.partialorder %v4229_v15, 0.0  ;;  %v623_v48 = vmul.f32 1.442695, %v564_v1  ;;  %v589_v21 = vmul.f32 1.442695, %v547_v38 }
 0x11a   : > { %v4404_v4 = vsel %vm276_vm0, %v6223_v29, %v6222_v63  ;;  %v3058_v24 = vadd.f32 -1.0, %v3871_v5  ;;  %v4417_v52 = vsel %vm528_vm14, %v4154_v6, %v3075_v8  ;;  %3882 = vpow2.f32 %v591_v7 }
 0x11b   : > { %6224 = vst [vmem:[#allocation12_spill] sm:$0xff] %v4417_v52  ;;  %v4421_v20 = vadd.f32 %v4053_v39, %v4158_v9  ;;  %vm514_vm2 = vcmp.gt.f32.partialorder %v4341_v26, 0.0  ;;  %3884 = vpow2.f32 %v589_v21  ;;  %vm530_vm3 = vcmp.gt.f32.partialorder %v4346_v28, 0.0 }
 0x11c   : > { %v4427_v1 = vsel %vm511_vm15, %v4172_v18, %v3058_v24  ;;  %vm513_vm10 = vcmp.gt.f32.partialorder %v4350_v50, 0.0  ;;  %3886 = vpow2.f32 %v623_v48  ;;  %vm529_vm11 = vcmp.gt.f32.partialorder %v4354_v33, 0.0 }
 0x11d   : > { %v3873_v38 = vpop.eup %3872  ;;  %v755_v5 = vrot.slane %v4427_v1, 1  ;;  %v789_v6 = vrot.slane %v4427_v1, 2  ;;  %v6202_v63 = vrot.slane %v4427_v1, 3  ;;  %v563_v29 = vmin.f32 %v4421_v20, 0.0 }
 0x11e   : > { %v3074_v7 = vadd.f32 -1.0, %v3873_v38  ;;  %v4449_v9 = vadd.f32 %v4174_v19, %v4053_v39  ;;  %v4455_v13 = vadd.f32 %v4176_v49, %v4053_v39  ;;  %v4459_v40 = vadd.f32 %v4053_v39, %v4185_v27 }
 0x11f   : > { %v1166_v62 = vsel %vm276_vm0, %v755_v5, %v789_v6  ;;  %v1133_v19 = vrot.slane %v4427_v1, 4  ;;  %v4466_v11 = vadd.f32 %v4053_v39, %v4187_v31  ;;  %vm516_vm12 = vcmp.gt.f32.partialorder %v4377_v35, 0.0 }
 0x120   : > { %v3875_v18 = vpop.eup %3874  ;;  %v4445_v48 = vsel %vm527_vm1, %v4229_v15, %v3074_v7  ;;  %v1009_v7 = vsel %vm276_vm0, %v4427_v1, %v755_v5  ;;  %v1183_v49 = vsel %vm1022_vm4, %v1166_v62, %v6202_v63  ;;  %vm532_vm13 = vcmp.gt.f32.partialorder %v4381_v32, 0.0 }
 0x121   : > { %v3877_v3 = vpop.eup %3876  ;;  %6225 = vst [vmem:[#allocation13_spill] sm:$0xff] %v4445_v48  ;;  %v3061_v38 = vadd.f32 -1.0, %v3875_v18  ;;  %v763_v24 = vrot.slane %v4445_v48, 1  ;;  %v797_v8 = vrot.slane %v4445_v48, 2  ;;  %vm515_vm14 = vcmp.gt.f32.partialorder %v4385_v16, 0.0 }
 0x122   : > { %v3879_v21 = vpop.eup %3878  ;;  %v621_v62 = vmul.f32 1.442695, %v563_v29  ;;  %v550_v63 = vmin.f32 %v4449_v9, 0.0  ;;  %v4485_v46 = vsel %vm1022_vm4, %v1009_v7, %v789_v6  ;;  %v566_v17 = vmin.f32 %v4455_v13, 0.0 }
 0x123   : > { %v3881_v15 = vpop.eup %3880  ;;  %v3060_v18 = vadd.f32 -1.0, %v3879_v21  ;;  %v1017_v27 = vsel %vm276_vm0, %v4445_v48, %v763_v24  ;;  %v4477_v5 = vsel %vm514_vm2, %v4341_v26, %v3061_v38  ;;  %v1174_v31 = vsel %vm276_vm0, %v763_v24, %v797_v8 }
 0x124   : > { %v3077_v21 = vadd.f32 -1.0, %v3877_v3  ;;  %v3883_v54 = vpop.eup %3882  ;;  %v3076_v38 = vadd.f32 -1.0, %v3881_v15  ;;  %v4494_v3 = vsel %vm1040_vm5, %v1183_v49, %v1133_v19  ;;  %v4497_v24 = vsel %vm1022_vm4, %v1017_v27, %v797_v8 }
 0x125   : > { %v4490_v26 = vsel %vm513_vm10, %v4350_v50, %v3060_v18  ;;  %v3885_v10 = vpop.eup %3884  ;;  %6226 = vst [vmem:[#allocation14_spill] sm:$0xff] %v4497_v24  ;;  %v1141_v29 = vrot.slane %v4445_v48, 4  ;;  %v6227_v25 = vrot.slane %v4445_v48, 3  ;;  %v3063_v27 = vadd.f32 -1.0, %v3883_v54 }
 0x126   : > { %v3887_v7 = vpop.eup %3886  ;;  %v756_v18 = vrot.slane %v4490_v26, 1  ;;  %v790_v52 = vrot.slane %v4490_v26, 2  ;;  %v4510_v8 = vsel %vm530_vm3, %v4346_v28, %v3077_v21  ;;  %v824_v19 = vrot.slane %v4490_v26, 3 }
 0x127   : > { %v1191_v50 = vsel %vm1022_vm4, %v1174_v31, %v6227_v25  ;;  %v4516_v49 = vsel %vm529_vm11, %v4354_v33, %v3076_v38  ;;  %v3062_v6 = vadd.f32 -1.0, %v3885_v10  ;;  %v3079_v48 = vadd.f32 -1.0, %v3887_v7 }
 0x128   : > { %v1010_v25 = vsel %vm276_vm0, %v4490_v26, %v756_v18  ;;  %v764_v31 = vrot.slane %v4516_v49, 1  ;;  %v798_v15 = vrot.slane %v4516_v49, 2  ;;  %v832_v21 = vrot.slane %v4516_v49, 3 }
 0x129   : > { %v1028_v28 = vsel %vm1022_vm4, %v1010_v25, %v790_v52  ;;  %v4526_v43 = vsel %vm1040_vm5, %v1191_v50, %v1141_v29  ;;  %v1167_v33 = vsel %vm276_vm0, %v756_v18, %v790_v52  ;;  %v4540_v7 = vsel %vm516_vm12, %v4377_v35, %v3063_v27 }
 0x12a   : > { %v4529_v54 = vsel %vm1040_vm5, %v1028_v28, %v824_v19  ;;  %v1018_v38 = vsel %vm276_vm0, %v4516_v49, %v764_v31  ;;  %v1175_v25 = vsel %vm276_vm0, %v764_v31, %v798_v15  ;;  %v4550_v18 = vsel %vm515_vm14, %v4385_v16, %v3062_v6 }
 0x12b   : > { %v1036_v24 = vsel %vm1022_vm4, %v1018_v38, %v798_v15  ;;  %v4554_v15 = vsel %vm1022_vm4, %v1167_v33, %v824_v19  ;;  %v4560_v27 = vsel %vm532_vm13, %v4381_v32, %v3079_v48  ;;  %v757_v16 = vrot.slane %v4550_v18, 1 }
 0x12c   : > { %v4545_v52 = vsel %vm1040_vm5, %v1036_v24, %v832_v21  ;;  %v4563_v24 = vsel %vm1022_vm4, %v1175_v25, %v832_v21  ;;  %v791_v6 = vrot.slane %v4550_v18, 2  ;;  %3888 = vpow2.f32 %v621_v62 }
 0x12d   : > { %6228 = vst [vmem:[#allocation15_spill] sm:$0xff] %v4545_v52  ;;  %v595_v19 = vmul.f32 1.442695, %v550_v63  ;;  %v627_v33 = vmul.f32 1.442695, %v566_v17  ;;  %v6209_v32 = vrot.slane %v4550_v18, 3  ;;  %v1011_v17 = vsel %vm276_vm0, %v4550_v18, %v757_v16 }
 0x12e   : > { %v549_v48 = vmin.f32 %v4459_v40, 0.0  ;;  %v1168_v25 = vsel %vm276_vm0, %v757_v16, %v791_v6  ;;  %vm531_vm15 = vcmp.gt.f32.partialorder %v4421_v20, 0.0  ;;  %v565_v10 = vmin.f32 %v4466_v11, 0.0 }
 0x12f   : > { %3890 = vpow2.f32 %v595_v19  ;;  %v4581_v62 = vadd.f32 %v4213_v55, %v4053_v39  ;;  %v4585_v21 = vadd.f32 %v4215_v56, %v4053_v39  ;;  %v4589_v35 = vadd.f32 %v4053_v39, %v4220_v60 }
 0x130   : > { %3892 = vpow2.f32 %v627_v33  ;;  %v593_v63 = vmul.f32 1.442695, %v549_v48  ;;  %v625_v29 = vmul.f32 1.442695, %v565_v10  ;;  %v4593_v19 = vadd.f32 %v4053_v39, %v4222_v61 }
 0x131   : > { %v1185_v55 = vsel %vm1022_vm4, %v1168_v25, %v6209_v32  ;;  %v552_v10 = vmin.f32 %v4581_v62, 0.0  ;;  %v1135_v33 = vrot.slane %v4550_v18, 4  ;;  %vm518_vm1 = vcmp.gt.f32.partialorder %v4449_v9, 0.0 }
 0x132   : > { %3894 = vpow2.f32 %v593_v63  ;;  %v568_v60 = vmin.f32 %v4585_v21, 0.0  ;;  %v4605_v39 = vsel %vm1022_vm4, %v1011_v17, %v791_v6  ;;  %vm534_vm2 = vcmp.gt.f32.partialorder %v4455_v13, 0.0 }
 0x133   : > { %3896 = vpow2.f32 %v625_v29  ;;  %v599_v61 = vmul.f32 1.442695, %v552_v10  ;;  %v551_v48 = vmin.f32 %v4589_v35, 0.0  ;;  %v567_v25 = vmin.f32 %v4593_v19, 0.0 }
 0x134   : > { %v4611_v63 = vsel %vm1040_vm5, %v1185_v55, %v1135_v33  ;;  %v631_v56 = vmul.f32 1.442695, %v568_v60  ;;  %v6229_v16 = vrot.slane %v4164_v12, 3  ;;  %v6230_v50 = vrot.slane %v4262_v44, 3 }
 0x135   : > { %vm533_vm3 = vcmp.gt.f32.partialorder %v4466_v11, 0.0  ;;  %3898 = vpow2.f32 %v599_v61  ;;  %v597_v17 = vmul.f32 1.442695, %v551_v48  ;;  %v6206_v10 = vrot.slane %v4197_v36, 7 }
 0x136   : > { %v1180_v29 = vsel %vm1022_vm4, %v4256_v41, %v6229_v16  ;;  %v1051_v6 = vsel %vm1040_vm5, %v4360_v42, %v6230_v50  ;;  %v6231_v55 = vrot.slane %v4164_v12, 4  ;;  %v3889_v60 = vpop.eup %3888  ;;  %3900 = vpow2.f32 %v631_v56 }
 0x137   : > { %v629_v38 = vmul.f32 1.442695, %v567_v25  ;;  %v6232_v41 = vrot.slane %v4197_v36, 5  ;;  %v6233_v16 = vrot.slane %v4252_v34, 4  ;;  %v3078_v50 = vadd.f32 -1.0, %v3889_v60 }
 0x138   : > { %v1197_v33 = vsel %vm1040_vm5, %v1180_v29, %v6231_v55  ;;  %vm517_vm10 = vcmp.gt.f32.partialorder %v4459_v40, 0.0  ;;  %v6234_v61 = vrot.slane %v4197_v36, 6  ;;  %v6208_v48 = vrot.slane %v4252_v34, 7 }
 0x139   : > { %v1214_v44 = vsel %vm1058_vm6, %v1197_v33, %v6232_v41  ;;  %v1069_v42 = vsel %vm1058_vm6, %v1051_v6, %v6233_v16  ;;  %v6235_v56 = vrot.slane %v4252_v34, 5  ;;  %v3891_v29 = vpop.eup %3890  ;;  %3902 = vpow2.f32 %v597_v17 }
 0x13a   : > { %v1231_v12 = vsel %vm1076_vm7, %v1214_v44, %v6234_v61  ;;  %v6236_v6 = vrot.slane %v4252_v34, 6  ;;  %v6237_v60 = vrot.slane %v4202_v37, 5  ;;  %v3893_v44 = vpop.eup %3892  ;;  %v4653_v16 = vsel %vm531_vm15, %v4421_v20, %v3078_v50 }
 0x13b   : > { %v1087_v25 = vsel %vm1076_vm7, %v1069_v42, %v6235_v56  ;;  %v1248_v55 = vsel %vm1094_vm8, %v1231_v12, %v6206_v10  ;;  %v3065_v17 = vadd.f32 -1.0, %v3891_v29  ;;  %v765_v12 = vrot.slane %v4653_v16, 1 }
 0x13c   : > { %v1105_v33 = vsel %vm1094_vm8, %v1087_v25, %v6236_v6  ;;  %v1222_v41 = vsel %vm1058_vm6, %v4281_v59, %v6237_v60  ;;  %v4657_v42 = vsel %vm1112_vm9, %v1248_v55, %v4197_v36  ;;  %v799_v59 = vrot.slane %v4653_v16, 2  ;;  %v3895_v25 = vpop.eup %3894 }
 0x13d   : > { %v4662_v61 = vsel %vm1112_vm9, %v1105_v33, %v6208_v48  ;;  %v6207_v56 = vrot.slane %v4653_v16, 3  ;;  %3904 = vpow2.f32 %v629_v38  ;;  %v1143_v20 = vrot.slane %v4653_v16, 4  ;;  %v3897_v6 = vpop.eup %3896 }
 0x13e   : > { %v4671_v50 = vsel %vm518_vm1, %v4449_v9, %v3065_v17  ;;  %v3081_v29 = vadd.f32 -1.0, %v3893_v44  ;;  %v3632_v55 = vpack.i.bf16 %v4140_v58, %v4657_v42  ;;  %v1019_v33 = vsel %vm276_vm0, %v4653_v16, %v765_v12 }
 0x13f   : > { %v1176_v60 = vsel %vm276_vm0, %v765_v12, %v799_v59  ;;  %vm520_vm11 = vcmp.gt.f32.partialorder %v4581_v62, 0.0  ;;  %vm536_vm12 = vcmp.gt.f32.partialorder %v4585_v21, 0.0  ;;  %v6238_v44 = vrot.slane %v4202_v37, 6  ;;  %v3899_v48 = vpop.eup %3898 }
 0x140   : > { %v1193_v38 = vsel %vm1022_vm4, %v1176_v60, %v6207_v56  ;;  %3633 = vrot.lane.b32.xlu0 %v3632_v55, %s3938_s21  ;;  %v4690_v12 = vsel %vm1022_vm4, %v1019_v33, %v799_v59  ;;  %v4695_v10 = vsel %vm534_vm2, %v4455_v13, %v3081_v29  ;;  %v3064_v60 = vadd.f32 -1.0, %v3895_v25  ;;  %v3901_v59 = vpop.eup %3900 }
 0x141   : > { %v1239_v17 = vsel %vm1076_vm7, %v1222_v41, %v6238_v44  ;;  %v3080_v56 = vadd.f32 -1.0, %v3897_v6  ;;  %v4698_v9 = vsel %vm1040_vm5, %v1193_v38, %v1143_v20  ;;  %vm535_vm13 = vcmp.gt.f32.partialorder %v4593_v19, 0.0 }
 0x142   : > { %v4708_v13 = vsel %vm517_vm10, %v4459_v40, %v3064_v60  ;;  %v3067_v20 = vadd.f32 -1.0, %v3899_v48  ;;  %vm519_vm14 = vcmp.gt.f32.partialorder %v4589_v35, 0.0  ;;  %v3083_v55 = vadd.f32 -1.0, %v3901_v59 }
 0x143   : > { %v4713_v25 = vsel %vm533_vm3, %v4466_v11, %v3080_v56  ;;  %v758_v6 = vrot.slane %v4708_v13, 1  ;;  %v792_v38 = vrot.slane %v4708_v13, 2  ;;  %v826_v44 = vrot.slane %v4708_v13, 3  ;;  %v3903_v33 = vpop.eup %3902 }
 0x144   : > { %v766_v40 = vrot.slane %v4713_v25, 1  ;;  %v800_v60 = vrot.slane %v4713_v25, 2  ;;  %v834_v41 = vrot.slane %v4713_v25, 3  ;;  %v6239_v11 = vrot.slane %v4202_v37, 7 }
 0x145   : > { %v1012_v56 = vsel %vm276_vm0, %v4708_v13, %v758_v6  ;;  %v1169_v29 = vsel %vm276_vm0, %v758_v6, %v792_v38  ;;  %v4732_v31 = vsel %vm520_vm11, %v4581_v62, %v3067_v20  ;;  %vm1518_vm15 = vcmask 261120  }
 0x146   : > { %v1256_v48 = vsel %vm1094_vm8, %v1239_v17, %v6239_v11  ;;  %v1030_v28 = vsel %vm1022_vm4, %v1012_v56, %v792_v38  ;;  %v1020_v36 = vsel %vm276_vm0, %v4713_v25, %v766_v40  ;;  %v1177_v17 = vsel %vm276_vm0, %v766_v40, %v800_v60 }
 0x147   : > { %v3905_v32 = vpop.eup %3904  ;;  %v4740_v11 = vsel %vm1040_vm5, %v1030_v28, %v826_v44  ;;  %v4743_v6 = vsel %vm1022_vm4, %v1169_v29, %v826_v44  ;;  %v1038_v62 = vsel %vm1022_vm4, %v1020_v36, %v800_v60  ;;  %v4751_v38 = vsel %vm1022_vm4, %v1177_v17, %v834_v41 }
 0x148   : > { %6240 = vst [vmem:[#allocation16_spill] sm:$0xff] %v4740_v11  ;;  %v4748_v20 = vsel %vm1040_vm5, %v1038_v62, %v834_v41  ;;  %v4757_v28 = vsel %vm536_vm12, %v4585_v21, %v3083_v55  ;;  %v3066_v62 = vadd.f32 -1.0, %v3903_v33  ;;  %v3082_v41 = vadd.f32 -1.0, %v3905_v32 }
 0x149   : > { %6241 = vst [vmem:[#allocation17_spill] sm:$0xff] %v4748_v20  ;;  %v4766_v17 = vsel %vm1112_vm9, %v1256_v48, %v4202_v37  ;;  %v939_v21 = vrot.slane %v4240_v23, 6  ;;  %v973_v55 = vrot.slane %v4240_v23, 7  ;;  %v6242_v44 = vrot.slane %v4245_v30, 3 }
 0x14a   : > { %v1307_v59 = vrot.slane %v4766_v17, 7  ;;  %v4778_v33 = vsel %vm519_vm14, %v4589_v35, %v3066_v62  ;;  %v4783_v32 = vsel %vm535_vm13, %v4593_v19, %v3082_v41  ;;  %v6243_v60 = vrot.slane %v4240_v23, 4 }
 0x14b   : > { %v1043_v36 = vsel %vm1040_vm5, %v4305_v45, %v6242_v44  ;;  %v759_v30 = vrot.slane %v4778_v33, 1  ;;  %v793_v45 = vrot.slane %v4778_v33, 2  ;;  %v6244_v35 = vrot.slane %v4278_v53, 3 }
 0x14c   : > { %v1061_v40 = vsel %vm1058_vm6, %v1043_v36, %v6243_v60  ;;  %v1137_v19 = vrot.slane %v4778_v33, 4  ;;  %v767_v41 = vrot.slane %v4783_v32, 1  ;;  %v801_v29 = vrot.slane %v4783_v32, 2 }
 0x14d   : > { %v1182_v62 = vsel %vm1022_vm4, %v4404_v4, %v6244_v35  ;;  %v1013_v36 = vsel %vm276_vm0, %v4778_v33, %v759_v30  ;;  %v1170_v60 = vsel %vm276_vm0, %v759_v30, %v793_v45  ;;  %v1341_v58 = vsel %vm276_vm0, 0.0, %v1307_v59 }
 0x14e   : > { %v6245_v48 = vrot.slane %v4240_v23, 5  ;;  %v6246_v4 = vrot.slane %v4778_v33, 3  ;;  %v1021_v20 = vsel %vm276_vm0, %v4783_v32, %v767_v41  ;;  %v1145_v56 = vrot.slane %v4783_v32, 4 }
 0x14f   : > { %v1178_v52 = vsel %vm276_vm0, %v767_v41, %v801_v29  ;;  %v4815_v11 = vsel %vm1022_vm4, %v1013_v36, %v793_v45  ;;  %v4821_v30 = vsel %vm1022_vm4, %v1021_v20, %v801_v29  ;;  %v6248_v41 = vrot.slane %v4278_v53, 4 }
 0x150   : > { %v1079_v44 = vsel %vm1076_vm7, %v1061_v40, %v6245_v48  ;;  %v1187_v35 = vsel %vm1022_vm4, %v1170_v60, %v6246_v4  ;;  %v3642_v40 = vpack.i.bf16 %v1341_v58, %v4662_v61  ;;  %v6247_v48 = vrot.slane %v4783_v32, 3 }
 0x151   : > { %v4818_v59 = vsel %vm1040_vm5, %v1187_v35, %v1137_v19  ;;  %v1097_v4 = vsel %vm1094_vm8, %v1079_v44, %v939_v21  ;;  %v1199_v45 = vsel %vm1040_vm5, %v1182_v62, %v6248_v41  ;;  %v6249_v36 = vrot.slane %v4657_v42, 7 }
 0x152   : > { %v4827_v60 = vsel %vm1022_vm4, %v1178_v52, %v6247_v48  ;;  %3643 = vrot.lane.b32.xlu0 %v3642_v40, %s3939_s22  ;;  %v1115_v58 = vsel %vm1112_vm9, %v1097_v4, %v973_v55  ;;  %v6250_v20 = vrot.slane %v4318_v22, 5  ;;  %v6251_v29 = vrot.slane %v4240_v23, 5 }
 0x153   : > { %v1333_v19 = vsel %vm276_vm0, 0.0, %v6249_v36  ;;  %v6252_v62 = vrot.slane %v4295_v0, 4  ;;  %v6253_v35 = vrot.slane %v4318_v22, 6  ;;  %v6254_v41 = vrot.slane %v4331_v14, 5 }
 0x154   : > { %v1216_v52 = vsel %vm1058_vm6, %v1199_v45, %v6250_v20  ;;  %v1215_v44 = vsel %vm1058_vm6, %v4357_v57, %v6251_v29  ;;  %v3637_v48 = vpack.i.bf16 %v1333_v19, %v1115_v58  ;;  %v6255_v36 = vrot.slane %v4318_v22, 7 }
 0x155   : > { %v1207_v42 = vsel %vm1040_vm5, %v4408_v51, %v6252_v62  ;;  %v1233_v40 = vsel %vm1076_vm7, %v1216_v52, %v6253_v35  ;;  %v1232_v4 = vsel %vm1076_vm7, %v1215_v44, %v939_v21  ;;  %v6256_v20 = vrot.slane %v4331_v14, 6 }
 0x156   : > { %v1224_v45 = vsel %vm1058_vm6, %v1207_v42, %v6254_v41  ;;  %v1250_v57 = vsel %vm1094_vm8, %v1233_v40, %v6255_v36  ;;  %v1249_v0 = vsel %vm1094_vm8, %v1232_v4, %v973_v55  ;;  %v6257_v29 = vrot.slane %v4393_v47, 5  ;;  %3638 = vrot.lane.b32.xlu1 %v3637_v48, %s3939_s22 }
 0x157   : > { %v1241_v51 = vsel %vm1076_vm7, %v1224_v45, %v6256_v20  ;;  %v1267_v21 = vsel %vm1112_vm9, %v1250_v57, %v4318_v22  ;;  %v4872_v52 = vsel %vm1112_vm9, %v1249_v0, %v4240_v23  ;;  %v6258_v55 = vrot.slane %v4331_v14, 7 }
 0x158   : > { %v1217_v19 = vsel %vm1058_vm6, %v4494_v3, %v6257_v29  ;;  %v6259_v62 = vrot.slane %v4393_v47, 6  ;;  %v1301_v35 = vrot.slane %v1267_v21, 7  ;;  %v3652_v40 = vpack.i.bf16 %v1115_v58, %v1267_v21 }
 0x159   : > { %v1258_v44 = vsel %vm1094_vm8, %v1241_v51, %v6258_v55  ;;  %v1300_v3 = vrot.slane %v4872_v52, 7  ;;  %v6260_v41 = vrot.slane %v4393_v47, 7  ;;  %v6261_v36 = vrot.slane %v4427_v1, 3 }
 0x15a   : > { %v1234_v42 = vsel %vm1076_vm7, %v1217_v19, %v6259_v62  ;;  %v4883_v4 = vsel %vm1112_vm9, %v1258_v44, %v4331_v14  ;;  %v6262_v20 = vrot.slane %v4393_v47, 4  ;;  %v1335_v51 = vsel %vm276_vm0, 0.0, %v1301_v35  ;;  %3653 = vrot.lane.b32.xlu1 %v3652_v40, %s3938_s21 }
 0x15b   : > { %v1309_v48 = vrot.slane %v4883_v4, 7  ;;  %v3657_v23 = vpack.i.bf16 %v4662_v61, %v4883_v4  ;;  %v1251_v45 = vsel %vm1094_vm8, %v1234_v42, %v6260_v41  ;;  %v1045_v58 = vsel %vm1040_vm5, %v4485_v46, %v6261_v36 }
 0x15c   : > { %v4896_v57 = vsel %vm276_vm0, 0.0, %v1300_v3  ;;  %v4900_v0 = vsel %vm1112_vm9, %v1251_v45, %v4393_v47  ;;  %v1063_v61 = vsel %vm1058_vm6, %v1045_v58, %v6262_v20  ;;  %v6263_v1 = vrot.slane %v4393_v47, 5 }
 0x15d   : > { %v3647_v29 = vpack.i.bf16 %v4147_v2, %v4896_v57  ;;  %v1302_v46 = vrot.slane %v4900_v0, 7  ;;  %v6264_v21 = vrot.slane %v4490_v26, 4  ;;  %v6265_v44 = vmov %v6259_v62 }
 0x15e   : > { %v1081_v19 = vsel %vm1076_vm7, %v1063_v61, %v6263_v1  ;;  %v6266_v42 = vrot.slane %v4477_v5, 5  ;;  %v977_v40 = vrot.slane %v4540_v7, 7  ;;  %v6267_v3 = vrot.slane %v4550_v18, 3  ;;  %3658 = vrot.lane.b32.xlu1 %v3657_v23, %s3938_s21 }
 0x15f   : > { %v1201_v55 = vsel %vm1040_vm5, %v4554_v15, %v6264_v21  ;;  %v1099_v62 = vsel %vm1094_vm8, %v1081_v19, %v6265_v44  ;;  %3648 = vrot.lane.b32.xlu0 %v3647_v29, %s3940_s23  ;;  %v4930_v26 = vsel %vm276_vm0, 0.0, %v1302_v46  ;;  %v6268_v15 = vrot.slane %v4393_v47, 7 }
 0x160   : > { %v1218_v35 = vsel %vm1058_vm6, %v1201_v55, %v6266_v42  ;;  %v1047_v41 = vsel %vm1040_vm5, %v4605_v39, %v6267_v3  ;;  %v6269_v36 = vrot.slane %v4477_v5, 6  ;;  %v6270_v20 = vrot.slane %v4540_v7, 4 }
 0x161   : > { %v1117_v45 = vsel %vm1112_vm9, %v1099_v62, %v6268_v15  ;;  %v3667_v39 = vpack.i.bf16 %v4872_v52, %v4930_v26  ;;  %v6271_v29 = vrot.slane %v4477_v5, 7  ;;  %v6272_v47 = vrot.slane %v4540_v7, 5 }
 0x162   : > { %v1235_v58 = vsel %vm1076_vm7, %v1218_v35, %v6269_v36  ;;  %v1065_v18 = vsel %vm1058_vm6, %v1047_v41, %v6270_v20  ;;  %v3662_v61 = vpack.i.bf16 %v1335_v51, %v1117_v45  ;;  %v6273_v21 = vrot.slane %v4540_v7, 6 }
 0x163   : > { %v1252_v46 = vsel %vm1094_vm8, %v1235_v58, %v6271_v29  ;;  %v1083_v1 = vsel %vm1076_vm7, %v1065_v18, %v6272_v47  ;;  %v6274_v44 = vmov %v6272_v47  ;;  %v6275_v62 = vrot.slane %v4708_v13, 4  ;;  %3668 = vrot.lane.b32.xlu0 %v3667_v39, %s3940_s23 }
 0x164   : > { %v1269_v19 = vsel %vm1112_vm9, %v1252_v46, %v4477_v5  ;;  %v1101_v55 = vsel %vm1094_vm8, %v1083_v1, %v6273_v21  ;;  %v1219_v51 = vsel %vm1058_vm6, %v4611_v63, %v6274_v44  ;;  %v6276_v41 = vmov %v6273_v21  ;;  %3663 = vrot.lane.b32.xlu1 %v3662_v61, %s3939_s22 }
 0x165   : > { %v1203_v42 = vsel %vm1040_vm5, %v4743_v6, %v6275_v62  ;;  %v1303_v35 = vrot.slane %v1269_v19, 7  ;;  %v3672_v3 = vpack.i.bf16 %v1117_v45, %v1269_v19  ;;  %v1119_v23 = vsel %vm1112_vm9, %v1101_v55, %v977_v40 }
 0x166   : > { %v1236_v15 = vsel %vm1076_vm7, %v1219_v51, %v6276_v41  ;;  %v6277_v58 = vrot.slane %v4671_v50, 5  ;;  %v979_v13 = vrot.slane %v4732_v31, 7  ;;  %v6278_v6 = vrot.slane %v4778_v33, 3 }
 0x167   : > { %v1253_v36 = vsel %vm1094_vm8, %v1236_v15, %v977_v40  ;;  %v1337_v20 = vsel %vm276_vm0, 0.0, %v1303_v35  ;;  %v6279_v39 = vrot.slane %v4671_v50, 6  ;;  %v6280_v29 = vrot.slane %v4732_v31, 4  ;;  %3673 = vrot.lane.b32.xlu0 %v3672_v3, %s3938_s21 }
 0x168   : > { %v1220_v63 = vsel %vm1058_vm6, %v1203_v42, %v6277_v58  ;;  %v1049_v45 = vsel %vm1040_vm5, %v4815_v11, %v6278_v6  ;;  %v4980_v18 = vsel %vm1112_vm9, %v1253_v36, %v4540_v7  ;;  %v3677_v33 = vpack.i.bf16 %v1337_v20, %v1119_v23  ;;  %v6286_v42 = vld [vmem:[#allocation11_spill] sm:$0xff] }
 0x169   : > { %v1237_v40 = vsel %vm1076_vm7, %v1220_v63, %v6279_v39  ;;  %v1067_v46 = vsel %vm1058_vm6, %v1049_v45, %v6280_v29  ;;  %v1304_v47 = vrot.slane %v4980_v18, 7  ;;  %v6281_v11 = vrot.slane %v4671_v50, 7 }
 0x16a   : > { %v6282_v7 = vrot.slane %v4732_v31, 5  ;;  %v6283_v55 = vrot.slane %v4732_v31, 6  ;;  %v6285_v62 = vrot.slane %v4252_v34, 5  ;;  %v6288_v20 = vrot.slane %v4252_v34, 6 }
 0x16b   : > { %v1254_v1 = vsel %vm1094_vm8, %v1237_v40, %v6281_v11  ;;  %v5011_v41 = vsel %vm276_vm0, 0.0, %v1304_v47  ;;  %3678 = vrot.lane.b32.xlu0 %v3677_v33, %s3939_s22  ;;  %vm1527_vm1 = vcmask 523264   ;;  %vm1536_vm2 = vcmask 785408  }
 0x16c   : > { %v1085_v19 = vsel %vm1076_vm7, %v1067_v46, %v6282_v7  ;;  %v1271_v21 = vsel %vm1112_vm9, %v1254_v1, %v4671_v50  ;;  %v6284_v61 = vmov %v6282_v7  ;;  %v1223_v35 = vsel %vm1058_vm6, %v6286_v42, %v6285_v62  ;;  %v6290_v46 = vld [vmem:[#allocation12_spill] sm:$0xff] }
 0x16d   : > { %v1103_v44 = vsel %vm1094_vm8, %v1085_v19, %v6283_v55  ;;  %v1221_v51 = vsel %vm1058_vm6, %v4818_v59, %v6284_v61  ;;  %v1305_v15 = vrot.slane %v1271_v21, 7  ;;  %v3687_v36 = vpack.i.bf16 %v1119_v23, %v1271_v21 }
 0x16e   : > { %v1121_v58 = vsel %vm1112_vm9, %v1103_v44, %v979_v13  ;;  %v3682_v63 = vpack.i.bf16 %v4900_v0, %v5011_v41  ;;  %v6287_v59 = vmov %v6283_v55  ;;  %v1240_v3 = vsel %vm1076_vm7, %v1223_v35, %v6288_v20 }
 0x16f   : > { %v3697_v6 = vpack.i.bf16 %v1121_v58, %v4766_v17  ;;  %v1238_v45 = vsel %vm1076_vm7, %v1221_v51, %v6287_v59  ;;  %v1339_v39 = vsel %vm276_vm0, 0.0, %v1305_v15  ;;  %v6289_v23 = vrot.slane %v4252_v34, 7  ;;  %v6296_v51 = vld [vmem:[#allocation14_spill] sm:$0xff] }
 0x170   : > { %v1255_v40 = vsel %vm1094_vm8, %v1238_v45, %v979_v13  ;;  %v6291_v47 = vrot.slane %v6290_v46, 5  ;;  %3683 = vrot.lane.b32.xlu1 %v3682_v63, %s3940_s23  ;;  %v3692_v11 = vpack.i.bf16 %v1339_v39, %v1121_v58  ;;  %v6292_v13 = vrot.slane %v6290_v46, 6 }
 0x171   : > { %v1257_v29 = vsel %vm1094_vm8, %v1240_v3, %v6289_v23  ;;  %v5035_v1 = vsel %vm1112_vm9, %v1255_v40, %v4732_v31  ;;  %v6293_v55 = vrot.slane %v6290_v46, 7  ;;  %v6294_v31 = vld [vmem:[#allocation13_spill] sm:$0xff]  ;;  %v1212_v62 = vsel %vm1040_vm5, %v4827_v60, %v1145_v56  ;;  %3698 = vrot.lane.b32.xlu0 %v3697_v6, %s3938_s21 }
 0x172   : > { %v1225_v17 = vsel %vm1058_vm6, %v4526_v43, %v6291_v47  ;;  %v5039_v7 = vsel %vm1112_vm9, %v1257_v29, %v4252_v34  ;;  %v1306_v21 = vrot.slane %v5035_v1, 7  ;;  %v6295_v61 = vrot.slane %v6294_v31, 3 }
 0x173   : > { %v1242_v19 = vsel %vm1076_vm7, %v1225_v17, %v6292_v13  ;;  %v1308_v43 = vrot.slane %v5039_v7, 7  ;;  %v6297_v42 = vrot.slane %v6290_v46, 4  ;;  %v6298_v15 = vrot.slane %v4516_v49, 4 }
 0x174   : > { %v1259_v44 = vsel %vm1094_vm8, %v1242_v19, %v6293_v55  ;;  %v1053_v34 = vsel %vm1040_vm5, %v6296_v51, %v6295_v61  ;;  %v5070_v63 = vsel %vm276_vm0, 0.0, %v1306_v21  ;;  %v6299_v56 = vmov %v6291_v47  ;;  %3688 = vrot.lane.b32.xlu1 %v3687_v36, %s3938_s21 }
 0x175   : > { %v5060_v33 = vsel %vm1112_vm9, %v1259_v44, %v6290_v46  ;;  %v1071_v35 = vsel %vm1058_vm6, %v1053_v34, %v6297_v42  ;;  %v1209_v58 = vsel %vm1040_vm5, %v4563_v24, %v6298_v15  ;;  %v5079_v45 = vsel %vm276_vm0, 0.0, %v1309_v48 }
 0x176   : > { %v1310_v59 = vrot.slane %v5060_v33, 7  ;;  %v1089_v60 = vsel %vm1076_vm7, %v1071_v35, %v6299_v56  ;;  %v3707_v49 = vpack.i.bf16 %v4980_v18, %v5070_v63  ;;  %v5085_v24 = vsel %vm276_vm0, 0.0, %v1308_v43 }
 0x177   : > { %v6300_v20 = vmov %v6292_v13  ;;  %v6301_v39 = vrot.slane %v4510_v8, 5  ;;  %v3702_v4 = vpack.i.bf16 %v5035_v1, %v5085_v24  ;;  %v6302_v48 = vmov %v6293_v55 }
 0x178   : > { %v1107_v3 = vsel %vm1094_vm8, %v1089_v60, %v6300_v20  ;;  %v6303_v23 = vrot.slane %v4510_v8, 6  ;;  %v6304_v47 = vrot.slane %v4560_v27, 5  ;;  %v5107_v13 = vsel %vm276_vm0, 0.0, %v1310_v59  ;;  %3693 = vrot.lane.b32.xlu1 %v3692_v11, %s3939_s22  ;;  %3708 = vrot.lane.b32.xlu0 %v3707_v49, %s3940_s23 }
 0x179   : > { %v1226_v40 = vsel %vm1058_vm6, %v1209_v58, %v6301_v39  ;;  %v1125_v36 = vsel %vm1112_vm9, %v1107_v3, %v6302_v48  ;;  %v6305_v19 = vrot.slane %v4510_v8, 7  ;;  %v6306_v21 = vrot.slane %v4560_v27, 6 }
 0x17a   : > { %v1243_v29 = vsel %vm1076_vm7, %v1226_v40, %v6303_v23  ;;  %v1227_v17 = vsel %vm1058_vm6, %v4698_v9, %v6304_v47  ;;  %v3717_v6 = vpack.i.bf16 %v5079_v45, %v1125_v36  ;;  %v6307_v44 = vrot.slane %v4560_v27, 7  ;;  %v697_v23 = vld [vmem:[%s6187_s1 + $0x10] sm:$0xff] }
 0x17b   : > { %v1260_v46 = vsel %vm1094_vm8, %v1243_v29, %v6305_v19  ;;  %v1244_v43 = vsel %vm1076_vm7, %v1227_v17, %v6306_v21  ;;  %v6308_v31 = vrot.slane %v4653_v16, 3  ;;  %v6309_v51 = vrot.slane %v4713_v25, 4 }
 0x17c   : > { %v1277_v55 = vsel %vm1112_vm9, %v1260_v46, %v4510_v8  ;;  %v1261_v9 = vsel %vm1094_vm8, %v1244_v43, %v6307_v44  ;;  %v6310_v58 = vrot.slane %v4560_v27, 4  ;;  %v6311_v25 = vmov %v6304_v47  ;;  %3703 = vrot.lane.b32.xlu1 %v3702_v4, %s3940_s23 }
 0x17d   : > { %v1055_v61 = vsel %vm1040_vm5, %v4690_v12, %v6308_v31  ;;  %v1211_v34 = vsel %vm1040_vm5, %v4751_v38, %v6309_v51  ;;  %v1311_v42 = vrot.slane %v1277_v55, 7  ;;  %v3722_v35 = vpack.i.bf16 %v1125_v36, %v1277_v55  ;;  %v713_v36 = vld [vmem:[%s6187_s1 + $0x90] sm:$0xff]  ;;  %v698_v55 = vld [vmem:[%s6187_s1 + $0x18] sm:$0xff] }
 0x17e   : > { %v5132_v15 = vsel %vm1112_vm9, %v1261_v9, %v4560_v27  ;;  %v1073_v16 = vsel %vm1058_vm6, %v1055_v61, %v6310_v58  ;;  %v3712_v12 = vpack.i.bf16 %v5039_v7, %v5107_v13  ;;  %v6312_v11 = vrot.slane %v4695_v10, 5  ;;  %v716_v27 = vld [vmem:[%s6187_s1 + $0xa8] sm:$0xff] }
 0x17f   : > { %v1091_v38 = vsel %vm1076_vm7, %v1073_v16, %v6311_v25  ;;  %v6313_v56 = vrot.slane %v4757_v28, 5  ;;  %v6314_v45 = vmov %v6306_v21  ;;  %v1345_v49 = vsel %vm276_vm0, 0.0, %v1311_v42 }
 0x180   : > { %v1228_v59 = vsel %vm1058_vm6, %v1211_v34, %v6312_v11  ;;  %v1109_v20 = vsel %vm1094_vm8, %v1091_v38, %v6314_v45  ;;  %v6315_v3 = vrot.slane %v4695_v10, 6  ;;  %v6316_v40 = vrot.slane %v4757_v28, 6  ;;  %3713 = vrot.lane.b32.xlu0 %v3712_v12, %s3940_s23  ;;  %v700_v12 = vld [vmem:[%s6187_s1 + $0x28] sm:$0xff]  ;;  %3718 = vrot.lane.b32.xlu1 %v3717_v6, %s3939_s22 }
 0x181   : > { %v1229_v60 = vsel %vm1058_vm6, %v1212_v62, %v6313_v56  ;;  %v714_v62 = vld [vmem:[%s6187_s1 + $0x98] sm:$0xff]  ;;  %v1312_v29 = vrot.slane %v5132_v15, 7  ;;  %v6317_v47 = vmov %v6307_v44  ;;  %v6318_v19 = vrot.slane %v4695_v10, 7  ;;  %v715_v44 = vld [vmem:[%s6187_s1 + $0xa0] sm:$0xff] }
 0x182   : > { %v1245_v39 = vsel %vm1076_vm7, %v1228_v59, %v6315_v3  ;;  %v1246_v48 = vsel %vm1076_vm7, %v1229_v60, %v6316_v40  ;;  %v5172_v17 = vsel %vm1112_vm9, %v1109_v20, %v6317_v47  ;;  %v6319_v21 = vrot.slane %v4757_v28, 7  ;;  %v699_v56 = vld [vmem:[%s6187_s1 + $0x20] sm:$0xff]  ;;  %v717_v20 = vld [vmem:[%s6187_s1 + $0xb0] sm:$0xff] }
 0x183   : > { %v1262_v46 = vsel %vm1094_vm8, %v1245_v39, %v6318_v19  ;;  %v885_v9 = vrot.slane %v4757_v28, 4  ;;  %v3732_v31 = vpack.i.bf16 %v1345_v49, %v5172_v17  ;;  %v6320_v16 = vrot.slane %v4783_v32, 3  ;;  %v718_v49 = vld [vmem:[%s6187_s1 + $0xb8] sm:$0xff]  ;;  %v701_v19 = vld [vmem:[%s6187_s1 + $0x30] sm:$0xff] }
 0x184   : > { %v1263_v43 = vsel %vm1094_vm8, %v1246_v48, %v6319_v21  ;;  %v1279_v61 = vsel %vm1112_vm9, %v1262_v46, %v4695_v10  ;;  %v3466_v38 = vpack.c.bf16 %v714_v62, %v713_v36  ;;  %v3468_v11 = vpack.c.bf16 %v698_v55, %v697_v23  ;;  %v6324_v48 = vld [vmem:[#allocation9_spill] sm:$0xff]  ;;  %3723 = vrot.lane.b32.xlu0 %v3722_v35, %s3938_s21  ;;  %v719_v46 = vld [vmem:[%s6187_s1 + $0xc0] sm:$0xff] }
 0x185   : > { %v5196_v51 = vsel %vm1112_vm9, %v1263_v43, %v4757_v28  ;;  %v1313_v34 = vrot.slane %v1279_v61, 7  ;;  %v3737_v42 = vpack.i.bf16 %v5172_v17, %v1279_v61  ;;  %v1057_v4 = vsel %vm1040_vm5, %v4821_v30, %v6320_v16  ;;  %v704_v61 = vld [vmem:[%s6187_s1 + $0x48] sm:$0xff] }
 0x186   : > { %v1314_v58 = vrot.slane %v5196_v51, 7  ;;  %v1075_v25 = vsel %vm1058_vm6, %v1057_v4, %v885_v9  ;;  %v3470_v59 = vpack.c.bf16 %v716_v27, %v715_v44  ;;  %v5213_v60 = vsel %vm276_vm0, 0.0, %v1312_v29  ;;  %3467 = vmatprep.subr.bf16.mxu1 %v3466_v38  ;;  %v703_v9 = vld [vmem:[%s6187_s1 + $0x40] sm:$0xff] }
 0x187   : > { %v6321_v32 = vrot.slane %v4757_v28, 5  ;;  %v5219_v45 = vsel %vm276_vm0, 0.0, %v1313_v34  ;;  %v6322_v3 = vmov %v6316_v40  ;;  %v6323_v40 = vrot.slane %v4278_v53, 3  ;;  %3469 = vmatpush3.bf16.msra.mxu1 %v3468_v11  ;;  %v702_v28 = vld [vmem:[%s6187_s1 + $0x38] sm:$0xff] }
 0x188   : > { %v6325_v62 = vmov %v6319_v21  ;;  %v3472_v29 = vpack.c.bf16 %v700_v12, %v699_v56  ;;  %v3727_v6 = vpack.i.bf16 %v5060_v33, %v5213_v60  ;;  %v1348_v47 = vsel %vm276_vm0, 0.0, %v1314_v58  ;;  %3471 = vmatprep.subr.bf16.mxu1 %v3470_v59  ;;  %v720_v21 = vld [vmem:[%s6187_s1 + $0xc8] sm:$0xff]  ;;  %3733 = vrot.lane.b32.xlu0 %v3732_v31, %s3939_s22  ;;  %v6327_v56 = vld [vmem:[#allocation16_spill] sm:$0xff] }
 0x189   : > { %v1093_v30 = vsel %vm1076_vm7, %v1075_v25, %v6321_v32  ;;  %v1044_v36 = vsel %vm1040_vm5, %v6324_v48, %v6323_v40  ;;  %v3474_v53 = vpack.c.bf16 %v718_v49, %v717_v20  ;;  %v872_v35 = vrot.slane %v4318_v22, 4  ;;  %v721_v31 = vld [vmem:[%s6187_s1 + $0xd0] sm:$0xff] }
 0x18a   : > { %v1111_v39 = vsel %vm1094_vm8, %v1093_v30, %v6322_v3  ;;  %v878_v43 = vrot.slane %v4202_v37, 4  ;;  %v880_v55 = vrot.slane %v4331_v14, 4  ;;  %v874_v44 = vrot.slane %v4477_v5, 4  ;;  %3728 = vrot.lane.b32.xlu1 %v3727_v6, %s3940_s23  ;;  %v722_v30 = vld [vmem:[%s6187_s1 + $0xd8] sm:$0xff]  ;;  %v6334_v6 = vld [vmem:[#allocation8_spill] sm:$0xff] }
 0x18b   : > { %v1129_v23 = vsel %vm1112_vm9, %v1111_v39, %v6325_v62  ;;  %v876_v27 = vrot.slane %v4671_v50, 4  ;;  %v882_v34 = vrot.slane %v4510_v8, 4  ;;  %v3742_v58 = vpack.i.bf16 %v5132_v15, %v1348_v47  ;;  %3473 = vmatpush3.bf16.msra.mxu1 %v3472_v29 }
 0x18c   : > { %v3747_v17 = vpack.i.bf16 %v5219_v45, %v1129_v23  ;;  %v3476_v16 = vpack.c.bf16 %v702_v28, %v701_v19  ;;  %v1062_v4 = vsel %vm1058_vm6, %v1044_v36, %v872_v35  ;;  %3475 = vmatprep.subr.bf16.mxu1 %v3474_v53  ;;  %v3478_v25 = vpack.c.bf16 %v720_v21, %v719_v46 }
 0x18d   : > { %v6326_v38 = vrot.slane %v4318_v22, 5  ;;  %v1064_v59 = vsel %vm1058_vm6, %v4529_v54, %v874_v44  ;;  %v1066_v12 = vsel %vm1058_vm6, %v6327_v56, %v876_v27  ;;  %v3480_v32 = vpack.c.bf16 %v704_v61, %v703_v9  ;;  %3743 = vrot.lane.b32.xlu0 %v3742_v58, %s3940_s23  ;;  %v6339_v27 = vld [vmem:[#allocation10_spill] sm:$0xff]  ;;  %v6340_v61 = vld [vmem:[#allocation15_spill] sm:$0xff]  ;;  %v6344_v56 = vld [vmem:[#allocation17_spill] sm:$0xff] }
 0x18e   : > { %v6328_v45 = vrot.slane %v4318_v22, 6  ;;  %v6329_v49 = vrot.slane %v4477_v5, 5  ;;  %v6330_v3 = vrot.slane %v4671_v50, 5  ;;  %3738 = vrot.lane.b32.xlu1 %v3737_v42, %s3938_s21  ;;  %v6331_v40 = vrot.slane %v4318_v22, 7 }
 0x18f   : > { %v1080_v11 = vsel %vm1076_vm7, %v1062_v4, %v6326_v38  ;;  %v6332_v36 = vrot.slane %v4477_v5, 6  ;;  %v6333_v23 = vrot.slane %v4671_v50, 6  ;;  %v1068_v47 = vsel %vm1058_vm6, %v6334_v6, %v878_v43  ;;  %3477 = vmatpush3.bf16.msra.mxu1 %v3476_v16  ;;  %v705_v43 = vld [vmem:[%s6187_s1 + $0x50] sm:$0xff]  ;;  %v723_v16 = vld [vmem:[%s6187_s1 + $0xe0] sm:$0xff]  ;;  %v724_v4 = vld [vmem:[%s6187_s1 + $0xe8] sm:$0xff] }
 0x190   : > { %v1098_v20 = vsel %vm1094_vm8, %v1080_v11, %v6328_v45  ;;  %v1082_v54 = vsel %vm1076_vm7, %v1064_v59, %v6329_v49  ;;  %v1084_v39 = vsel %vm1076_vm7, %v1066_v12, %v6330_v3  ;;  %v884_v53 = vrot.slane %v4695_v10, 4  ;;  %3479 = vmatprep.subr.bf16.mxu1 %v3478_v25  ;;  %v725_v6 = vld [vmem:[%s6187_s1 + $0xf0] sm:$0xff] }
 0x191   : > { %v5297_v48 = vsel %vm1112_vm9, %v1098_v20, %v6331_v40  ;;  %v1100_v62 = vsel %vm1094_vm8, %v1082_v54, %v6332_v36  ;;  %v1102_v29 = vsel %vm1094_vm8, %v1084_v39, %v6333_v23  ;;  %v6335_v22 = vrot.slane %v4477_v5, 7  ;;  %v706_v5 = vld [vmem:[%s6187_s1 + $0x58] sm:$0xff] }
 0x192   : > { %v6336_v19 = vrot.slane %v4671_v50, 7  ;;  %v6337_v35 = vrot.slane %v4202_v37, 5  ;;  %v3482_v21 = vpack.c.bf16 %v722_v30, %v721_v31  ;;  %v6338_v44 = vrot.slane %v4202_v37, 6  ;;  %3748 = vrot.lane.b32.xlu1 %v3747_v17, %s3939_s22 }
 0x193   : > { %v5312_v42 = vsel %vm1112_vm9, %v1100_v62, %v6335_v22  ;;  %v1070_v9 = vsel %vm1058_vm6, %v6339_v27, %v880_v55  ;;  %v1072_v58 = vsel %vm1058_vm6, %v6340_v61, %v882_v34  ;;  %v6341_v25 = vrot.slane %v4202_v37, 7  ;;  %3481 = vmatpush3.bf16.msra.mxu1 %v3480_v32  ;;  %v707_v32 = vld [vmem:[%s6187_s1 + $0x60] sm:$0xff]  ;;  %v730_v27 = vld [vmem:[%s6187_s1 + $0x118] sm:$0xff] }
 0x194   : > { %v5317_v28 = vsel %vm1112_vm9, %v1102_v29, %v6336_v19  ;;  %v1086_v46 = vsel %vm1076_vm7, %v1068_v47, %v6337_v35  ;;  %v6342_v11 = vrot.slane %v4331_v14, 5  ;;  %v6343_v59 = vrot.slane %v4510_v8, 5  ;;  %3483 = vmatprep.subr.bf16.mxu1 %v3482_v21  ;;  %v726_v47 = vld [vmem:[%s6187_s1 + $0xf8] sm:$0xff]  ;;  %v709_v19 = vld [vmem:[%s6187_s1 + $0x70] sm:$0xff]  ;;  %v727_v35 = vld [vmem:[%s6187_s1 + $0x100] sm:$0xff] }
 0x195   : > { %v1104_v50 = vsel %vm1094_vm8, %v1086_v46, %v6338_v44  ;;  %v1074_v12 = vsel %vm1058_vm6, %v6344_v56, %v884_v53  ;;  %v6345_v31 = vrot.slane %v4331_v14, 6  ;;  %v6346_v30 = vrot.slane %v4510_v8, 6  ;;  %v728_v46 = vld [vmem:[%s6187_s1 + $0x108] sm:$0xff] }
 0x196   : > { %v5344_v38 = vsel %vm1112_vm9, %v1104_v50, %v6341_v25  ;;  %v1088_v55 = vsel %vm1076_vm7, %v1070_v9, %v6342_v11  ;;  %v1090_v34 = vsel %vm1076_vm7, %v1072_v58, %v6343_v59  ;;  %v6347_v20 = vrot.slane %v4695_v10, 5  ;;  %v712_v44 = vld [vmem:[%s6187_s1 + $0x88] sm:$0xff]  ;;  %v729_v50 = vld [vmem:[%s6187_s1 + $0x110] sm:$0xff] }
 0x197   : > { %v1106_v37 = vsel %vm1094_vm8, %v1088_v55, %v6345_v31  ;;  %v1108_v45 = vsel %vm1094_vm8, %v1090_v34, %v6346_v30  ;;  %v3484_v54 = vpack.c.bf16 %v706_v5, %v705_v43  ;;  %v6348_v3 = vrot.slane %v4331_v14, 7  ;;  %v708_v14 = vld [vmem:[%s6187_s1 + $0x68] sm:$0xff]  ;;  %v711_v5 = vld [vmem:[%s6187_s1 + $0x80] sm:$0xff] }
 0x198   : > { %v1092_v49 = vsel %vm1076_vm7, %v1074_v12, %v6347_v20  ;;  %v6349_v17 = vrot.slane %v4510_v8, 7  ;;  %v6350_v36 = vrot.slane %v4695_v10, 6  ;;  %v3486_v23 = vpack.c.bf16 %v724_v4, %v723_v16  ;;  %v6352_v16 = vld [vmem:[#allocation6_spill] sm:$0xff]  ;;  %v6353_v25 = vld [vmem:[#allocation7_spill] sm:$0xff] }
 0x199   : > { %v5367_v39 = vsel %vm1112_vm9, %v1106_v37, %v6348_v3  ;;  %v6351_v29 = vrot.slane %v4695_v10, 7  ;;  %3485 = vmatpush3.bf16.msra.mxu1 %v3484_v54  ;;  %v3488_v53 = vpack.c.bf16 %v708_v14, %v707_v32  ;;  %v3490_v22 = vpack.c.bf16 %v726_v47, %v725_v6  ;;  %v710_v10 = vld [vmem:[%s6187_s1 + $0x78] sm:$0xff]  ;;  %v731_v32 = vld [vmem:[%s6187_s1 + $0x120] sm:$0xff]  ;;  %v732_v14 = vld [vmem:[%s6187_s1 + $0x128] sm:$0xff] }
 0x19a   : > { %v5372_v40 = vsel %vm1112_vm9, %v1108_v45, %v6349_v17  ;;  %v1110_v62 = vsel %vm1094_vm8, %v1092_v49, %v6350_v36  ;;  %3487 = vmatprep.subr.bf16.mxu1 %v3486_v23  ;;  %v3492_v21 = vpack.c.bf16 %v710_v10, %v709_v19  ;;  %v3494_v43 = vpack.c.bf16 %v728_v46, %v727_v35 }
 0x19b   : > { %v5386_v8 = vsel %vm1112_vm9, %v1110_v62, %v6351_v29  ;;  %v3496_v9 = vpack.c.bf16 %v712_v44, %v711_v5  ;;  %v3498_v61 = vpack.c.bf16 %v730_v27, %v729_v50  ;;  %v870_v4 = vrot.slane %v6352_v16, 4 }
 0x19c   : > { %v1298_v55 = vrot.slane %v4147_v2, 7  ;;  %v6354_v56 = vrot.slane %v6352_v16, 5  ;;  %v6355_v30 = vrot.slane %v6352_v16, 6  ;;  %v6356_v2 = vrot.slane %v6352_v16, 7 }
 0x19d   : > { %3489 = vmatpush3.bf16.msra.mxu1 %v3488_v53  ;;  %v1060_v11 = vsel %vm1058_vm6, %v6353_v25, %v870_v4 }
 0x19e   : > { %3491 = vmatprep.subr.bf16.mxu1 %v3490_v22  ;;  %v1078_v12 = vsel %vm1076_vm7, %v1060_v11, %v6354_v56  ;;  %v1332_v20 = vsel %vm276_vm0, 0.0, %v1298_v55 }
 0x19f   : > { %v1096_v45 = vsel %vm1094_vm8, %v1078_v12, %v6355_v30 }
 0x1a0   : > { %v1114_v3 = vsel %vm1112_vm9, %v1096_v45, %v6356_v2 }
 0x1a1   : > { %3493 = vmatpush3.bf16.msra.mxu1 %v3492_v21 }
 0x1a2   : > { %3495 = vmatprep.subr.bf16.mxu1 %v3494_v43  ;;  %v3502_v43 = vpack.c.bf16 %v732_v14, %v731_v32 }
 0x1a5   : > { %3497 = vmatpush3.bf16.msra.mxu1 %v3496_v9 }
 0x1a6   : > { %3499 = vmatprep.subr.bf16.mxu1 %v3498_v61 }
 0x1b2   : > { %v3634_v58 = vpop.permute.xlu0 %3633 }
 0x1b3   : > { %v3636_v31 = vunpack.i.h.bf16 %v3634_v58  ;;  %v3635_v37 = vunpack.i.l.bf16 %v3634_v58 }
 0x1b5   : > { %v1519_v17 = vsel %vm1518_vm15, %v1332_v20, %v3636_v31  ;;  %v1545_v23 = vsel %vm1518_vm15, %v1114_v3, %v3635_v37 }
 0x1c4   : > { %v5422_v59 = vpop.permute.xlu0 %3643 }
 0x1c8   : > { %v3639_v34 = vpop.permute.xlu1 %3638 }
 0x1c9   : > { %v3641_v29 = vunpack.i.h.bf16 %v3639_v34  ;;  %v3640_v6 = vunpack.i.l.bf16 %v3639_v34 }
 0x1cc   : > { %v3654_v49 = vpop.permute.xlu1 %3653 }
 0x1cd   : > { %v3656_v47 = vunpack.i.h.bf16 %v3654_v49  ;;  %v3655_v53 = vunpack.i.l.bf16 %v3654_v49 }
 0x1cf   : > { %v1546_v27 = vsel %vm1518_vm15, %v5297_v48, %v3655_v53  ;;  %v1520_v9 = vsel %vm1518_vm15, %v4896_v57, %v3656_v47 }
 0x1d0   : > { %v5442_v22 = vpop.permute.xlu1 %3658 }
 0x1d1   : > { %v3649_v54 = vpop.permute.xlu0 %3648 }
 0x1d2   : > { %v3651_v36 = vunpack.i.h.bf16 %v3649_v54  ;;  %v3650_v62 = vunpack.i.l.bf16 %v3649_v54 }
 0x1d4   : > { %v1528_v19 = vsel %vm1527_vm1, %v1519_v17, %v3651_v36  ;;  %v1553_v10 = vsel %vm1527_vm1, %v1545_v23, %v3650_v62 }
 0x1d5   : > { %v1561_v35 = vsel %vm1536_vm2, %v1553_v10, %v3640_v6  ;;  %v1537_v46 = vsel %vm1536_vm2, %v1528_v19, %v3641_v29  ;;  %v3669_v21 = vpop.permute.xlu0 %3668 }
 0x1d6   : > { %1653 = vmatprep.mubr.f32.mxu1 %v1561_v35  ;;  %v3671_v5 = vunpack.i.h.bf16 %v3669_v21  ;;  %v3670_v44 = vunpack.i.l.bf16 %v3669_v21  ;;  %v3664_v50 = vpop.permute.xlu1 %3663  ;;  %v3660_v35 = vunpack.i.l.bf16 %v5442_v22 }
 0x1d7   : > { %1654 = vmatmul.mubr.f32.vlgmr.msra.gmra.mrb[16].mxu1 %v1537_v46  ;;  %v3666_v58 = vunpack.i.h.bf16 %v3664_v50  ;;  %v3665_v16 = vunpack.i.l.bf16 %v3664_v50 }
 0x1d8   : > { %v1554_v4 = vsel %vm1527_vm1, %v1546_v27, %v3670_v44  ;;  %v1529_v25 = vsel %vm1527_vm1, %v1520_v9, %v3671_v5  ;;  %3501 = vmatpush3.bf16.msra.mxu1 %v3498_v61 }
 0x1d9   : > { %v3674_v11 = vpop.permute.xlu0 %3673  ;;  %3503 = vmatprep.subr.bf16.mxu1 %v3502_v43  ;;  %v1562_v56 = vsel %vm1536_vm2, %v1554_v4, %v3665_v16  ;;  %v1538_v12 = vsel %vm1536_vm2, %v1529_v25, %v3666_v58  ;;  %v3645_v58 = vunpack.i.l.bf16 %v5422_v59  ;;  %v3661_v4 = vunpack.i.h.bf16 %v5442_v22 }
 0x1da   : > { %v3676_v55 = vunpack.i.h.bf16 %v3674_v11  ;;  %v3675_v34 = vunpack.i.l.bf16 %v3674_v11  ;;  %1658 = vmatprep.mubr.f32.mxu1 %v1562_v56 }
 0x1db   : > { %1659 = vmatmul.mubr.f32.gmra.mrb[18].mxu1 %v1538_v12 }
 0x1dc   : > { %3505 = vmatpush3.bf16.msra.mxu1 %v3502_v43  ;;  %v1547_v61 = vsel %vm1518_vm15, %v5312_v42, %v3675_v34  ;;  %v1521_v20 = vsel %vm1518_vm15, %v4930_v26, %v3676_v55  ;;  %v3646_v55 = vunpack.i.h.bf16 %v5422_v59 }
 0x1dd   : > { %v3679_v31 = vpop.permute.xlu0 %3678 }
 0x1de   : > { %v3681_v30 = vunpack.i.h.bf16 %v3679_v31  ;;  %v3680_v45 = vunpack.i.l.bf16 %v3679_v31 }
 0x1e2   : > { %v3684_v48 = vpop.permute.xlu1 %3683 }
 0x1e3   : > { %v3686_v57 = vunpack.i.h.bf16 %v3684_v48  ;;  %v3685_v37 = vunpack.i.l.bf16 %v3684_v48  ;;  %v3699_v36 = vpop.permute.xlu0 %3698 }
 0x1e4   : > { %v3701_v42 = vunpack.i.h.bf16 %v3699_v36  ;;  %v3700_v29 = vunpack.i.l.bf16 %v3699_v36 }
 0x1e5   : > { %v1555_v49 = vsel %vm1527_vm1, %v1547_v61, %v3685_v37  ;;  %v1530_v54 = vsel %vm1527_vm1, %v1521_v20, %v3686_v57 }
 0x1e6   : > { %v3689_v2 = vpop.permute.xlu1 %3688  ;;  %v1563_v3 = vsel %vm1536_vm2, %v1555_v49, %v3680_v45  ;;  %v1539_v17 = vsel %vm1536_vm2, %v1530_v54, %v3681_v30  ;;  %v1523_v16 = vsel %vm1518_vm15, %v5070_v63, %v3701_v42  ;;  %v1550_v63 = vsel %vm1518_vm15, %v5367_v39, %v3660_v35 }
 0x1e7   : > { %1663 = vmatprep.mubr.f32.mxu1 %v1563_v3  ;;  %v3691_v62 = vunpack.i.h.bf16 %v3689_v2  ;;  %v3690_v23 = vunpack.i.l.bf16 %v3689_v2  ;;  %v1524_v45 = vsel %vm1518_vm15, %v5085_v24, %v3661_v4 }
 0x1e8   : > { %1664 = vmatmul.mubr.f32.gmra.mrb[20].mxu1 %v1539_v17 }
 0x1e9   : > { %v1548_v19 = vsel %vm1518_vm15, %v5317_v28, %v3690_v23  ;;  %v1522_v10 = vsel %vm1518_vm15, %v5011_v41, %v3691_v62  ;;  %v1549_v41 = vsel %vm1518_vm15, %v5344_v38, %v3700_v29 }
 0x1ea   : > { %v3694_v32 = vpop.permute.xlu1 %3693  ;;  %v3709_v14 = vpop.permute.xlu0 %3708 }
 0x1eb   : > { %v3711_v6 = vunpack.i.h.bf16 %v3709_v14  ;;  %v3710_v26 = vunpack.i.l.bf16 %v3709_v14  ;;  %v3696_v47 = vunpack.i.h.bf16 %v3694_v32  ;;  %v3695_v53 = vunpack.i.l.bf16 %v3694_v32 }
 0x1ed   : > { %v1556_v21 = vsel %vm1527_vm1, %v1548_v19, %v3710_v26  ;;  %v1531_v43 = vsel %vm1527_vm1, %v1522_v10, %v3711_v6 }
 0x1ee   : > { %v3704_v46 = vpop.permute.xlu1 %3703  ;;  %v1564_v27 = vsel %vm1536_vm2, %v1556_v21, %v3695_v53  ;;  %v1540_v9 = vsel %vm1536_vm2, %v1531_v43, %v3696_v47 }
 0x1ef   : > { %v3706_v5 = vunpack.i.h.bf16 %v3704_v46  ;;  %v3705_v44 = vunpack.i.l.bf16 %v3704_v46  ;;  %1668 = vmatprep.mubr.f32.mxu1 %v1564_v27  ;;  %v1868_v27 = vld [vmem:[%s6187_s1 + $0x1d8] sm:$0xff] }
 0x1f0   : > { %1669 = vmatmul.mubr.f32.gmra.mrb[22].mxu1 %v1540_v9 }
 0x1f1   : > { %v1557_v25 = vsel %vm1527_vm1, %v1549_v41, %v3705_v44  ;;  %v1532_v11 = vsel %vm1527_vm1, %v1523_v16, %v3706_v5  ;;  %v1850_v44 = vld [vmem:[%s6187_s1 + $0x148] sm:$0xff]  ;;  %v1852_v41 = vld [vmem:[%s6187_s1 + $0x158] sm:$0xff] }
 0x1f2   : > { %v3714_v50 = vpop.permute.xlu0 %3713  ;;  %v3719_v56 = vpop.permute.xlu1 %3718  ;;  %v1565_v12 = vsel %vm1536_vm2, %v1557_v25, %v3645_v58  ;;  %v1541_v37 = vsel %vm1536_vm2, %v1532_v11, %v3646_v55 }
 0x1f3   : > { %v3715_v28 = vunpack.i.l.bf16 %v3714_v50  ;;  %v3716_v34 = vunpack.i.h.bf16 %v3714_v50  ;;  %v3721_v48 = vunpack.i.h.bf16 %v3719_v56  ;;  %v3720_v31 = vunpack.i.l.bf16 %v3719_v56  ;;  %1673 = vmatprep.mubr.f32.mxu1 %v1565_v12  ;;  %v1867_v50 = vld [vmem:[%s6187_s1 + $0x1d0] sm:$0xff] }
 0x1f4   : > { %1674 = vmatmul.mubr.f32.gmra.mrb[24].mxu1 %v1541_v37  ;;  %v3514_v58 = vpack.c.bf16 %v1868_v27, %v1867_v50 }
 0x1f5   : > { %v1558_v30 = vsel %vm1527_vm1, %v1550_v63, %v3715_v28  ;;  %v1533_v20 = vsel %vm1527_vm1, %v1524_v45, %v3716_v34  ;;  %v1851_v28 = vld [vmem:[%s6187_s1 + $0x150] sm:$0xff] }
 0x1f6   : > { %v3724_v57 = vpop.permute.xlu0 %3723  ;;  %v1566_v59 = vsel %vm1536_vm2, %v1558_v30, %v3720_v31  ;;  %v1542_v39 = vsel %vm1536_vm2, %v1533_v20, %v3721_v48  ;;  %v3516_v16 = vpack.c.bf16 %v1852_v41, %v1851_v28 }
 0x1f7   : > { %v3726_v38 = vunpack.i.h.bf16 %v3724_v57  ;;  %v3725_v22 = vunpack.i.l.bf16 %v3724_v57  ;;  %1678 = vmatprep.mubr.f32.mxu1 %v1566_v59 }
 0x1f8   : > { %1679 = vmatmul.mubr.f32.gmra.mrb[26].mxu1 %v1542_v39 }
 0x1f9   : > { %v1551_v36 = vsel %vm1518_vm15, %v5372_v40, %v3725_v22  ;;  %v1525_v62 = vsel %vm1518_vm15, %v5107_v13, %v3726_v38 }
 0x1fa   : > { %v3734_v2 = vpop.permute.xlu0 %3733 }
 0x1fb   : > { %v3736_v3 = vunpack.i.h.bf16 %v3734_v2  ;;  %v3735_v17 = vunpack.i.l.bf16 %v3734_v2 }
 0x1fc   : > { %v3729_v61 = vpop.permute.xlu1 %3728 }
 0x1fd   : > { %v3731_v49 = vunpack.i.h.bf16 %v3729_v61  ;;  %v3730_v54 = vunpack.i.l.bf16 %v3729_v61 }
 0x1ff   : > { %v1559_v24 = vsel %vm1527_vm1, %v1551_v36, %v3730_v54  ;;  %v1534_v23 = vsel %vm1527_vm1, %v1525_v62, %v3731_v49  ;;  %v3744_v6 = vpop.permute.xlu0 %3743 }
 0x200   : > { %v3739_v32 = vpop.permute.xlu1 %3738  ;;  %v1567_v14 = vsel %vm1536_vm2, %v1559_v24, %v3735_v17  ;;  %v3746_v26 = vunpack.i.h.bf16 %v3744_v6  ;;  %v3745_v47 = vunpack.i.l.bf16 %v3744_v6  ;;  %v1543_v53 = vsel %vm1536_vm2, %v1534_v23, %v3736_v3  ;;  %v3084_v3 = vld [vmem:[%s6187_s1 + $0x3f1] ss:$0 sm:$0xff] }
 0x201   : > { %v3741_v42 = vunpack.i.h.bf16 %v3739_v32  ;;  %v3740_v29 = vunpack.i.l.bf16 %v3739_v32  ;;  %1683 = vmatprep.mubr.f32.mxu1 %v1567_v14 }
 0x202   : > { %1684 = vmatmul.mubr.f32.gmra.mrb[28].mxu1 %v1543_v53 }
 0x203   : > { %v1552_v13 = vsel %vm1518_vm15, %v5386_v8, %v3740_v29  ;;  %v1526_v40 = vsel %vm1518_vm15, %v5213_v60, %v3741_v42  ;;  %v1849_v8 = vld [vmem:[%s6187_s1 + $0x140] sm:$0xff] }
 0x204   : > { %v3749_v19 = vpop.permute.xlu1 %3748  ;;  %v1560_v46 = vsel %vm1527_vm1, %v1552_v13, %v3745_v47  ;;  %v1535_v21 = vsel %vm1527_vm1, %v1526_v40, %v3746_v26  ;;  %v3512_v9 = vpack.c.bf16 %v1850_v44, %v1849_v8 }
 0x205   : > { %v3751_v10 = vunpack.i.h.bf16 %v3749_v19  ;;  %v3750_v35 = vunpack.i.l.bf16 %v3749_v19 }
 0x207   : > { %v1568_v43 = vsel %vm1536_vm2, %v1560_v46, %v3750_v35  ;;  %v1544_v5 = vsel %vm1536_vm2, %v1535_v21, %v3751_v10 }
 0x208   : > { %1688 = vmatprep.mubr.f32.mxu1 %v1568_v43 }
 0x209   : > { %1689 = vmatmul.mubr.f32.gmra.mrb[30].mxu1 %v1544_v5 }
 0x20a   : > { %3382 = vmatprep.mubr.msk.f32.mxu1 %vm1518_vm15, %v4872_v52  ;;  %v1863_v52 = vld [vmem:[%s6187_s1 + $0x1b0] sm:$0xff] }
 0x20d   : > { %3383 = vmatmul.mubr.msk.f32.vlgmr.msra.gmra.mrb[32].mxu1 %vm1518_vm15, %v4900_v0  ;;  %v1864_v0 = vld [vmem:[%s6187_s1 + $0x1b8] sm:$0xff] }
 0x20e   : > { %3385 = vmatprep.mubr.msk.f32.mxu1 %vm1518_vm15, %v4980_v18  ;;  %v1847_v18 = vld [vmem:[%s6187_s1 + $0x130] sm:$0xff] }
 0x211   : > { %3386 = vmatmul.mubr.msk.f32.gmra.mrb[34].mxu1 %vm1518_vm15, %v5035_v1  ;;  %v3506_v1 = vpack.c.bf16 %v1864_v0, %v1863_v52 }
 0x212   : > { %3388 = vmatprep.mubr.msk.f32.mxu1 %vm1518_vm15, %v5039_v7  ;;  %v1848_v7 = vld [vmem:[%s6187_s1 + $0x138] sm:$0xff] }
 0x213   : > { %3507 = vmatprep.subr.bf16.mxu0 %v3506_v1 }
 0x215   : > { %3389 = vmatmul.mubr.msk.f32.gmra.mrb[36].mxu1 %vm1518_vm15, %v5060_v33  ;;  %v1865_v33 = vld [vmem:[%s6187_s1 + $0x1c0] sm:$0xff] }
 0x216   : > { %3391 = vmatprep.mubr.msk.f32.mxu1 %vm1518_vm15, %v5132_v15  ;;  %v1866_v15 = vld [vmem:[%s6187_s1 + $0x1c8] sm:$0xff] }
 0x217   : > { %v3510_v60 = vpack.c.bf16 %v1866_v15, %v1865_v33 }
 0x219   : > { %3392 = vmatmul.mubr.msk.f32.gmra.mrb[38].mxu1 %vm1518_vm15, %v5196_v51  ;;  %v3508_v51 = vpack.c.bf16 %v1848_v7, %v1847_v18 }
 0x21b   : > { %3509 = vmatpush3.bf16.msra.mxu0 %v3508_v51 }
 0x21c   : > { %3511 = vmatprep.subr.bf16.mxu0 %v3510_v60 }
 0x21f   : > { %3513 = vmatpush3.bf16.msra.mxu0 %v3512_v9 }
 0x220   : > { %3515 = vmatprep.subr.bf16.mxu0 %v3514_v58 }
 0x223   : > { %3517 = vmatpush3.bf16.msra.mxu0 %v3516_v16 }
 0x2aa   : > { %v3182_v4 = vpop.f32.mrb[16].mxu1 }
 0x2ab   : > { %v3183_v25 = vpop.f32.mrb[17].mxu1 }
 0x2ac   : > { %v3184_v11 = vadd.f32 %v3183_v25, %v3182_v4 }
 0x2ae   : > { %v3185_v55 = vpop.f32.mrb[18].mxu1  ;;  %v1656_v24 = vadd.f32 %v3184_v11, %v3084_v3 }
 0x2af   : > { %v3186_v34 = vpop.f32.mrb[19].mxu1 }
 0x2b0   : > { %v3187_v56 = vadd.f32 %v3186_v34, %v3185_v55 }
 0x2b2   : > { %v1661_v36 = vadd.f32 %v3187_v56, %v3084_v3 }
 0x2bb   : > { %v3188_v12 = vpop.f32.mrb[20].mxu1 }
 0x2bc   : > { %v3189_v48 = vpop.f32.mrb[21].mxu1 }
 0x2bd   : > { %v3190_v31 = vadd.f32 %v3189_v48, %v3188_v12 }
 0x2bf   : > { %v1666_v47 = vadd.f32 %v3190_v31, %v3084_v3 }
 0x2c3   : > { %v3191_v57 = vpop.f32.mrb[22].mxu1 }
 0x2c4   : > { %v3192_v63 = vpop.f32.mrb[23].mxu1 }
 0x2c5   : > { %v3193_v38 = vadd.f32 %v3192_v63, %v3191_v57  ;;  %v1869_v63 = vld [vmem:[%s6187_s1 + $0x1e0] sm:$0xff] }
 0x2c7   : > { %v3194_v22 = vpop.f32.mrb[24].mxu1  ;;  %v1671_v29 = vadd.f32 %v3193_v38, %v3084_v3  ;;  %v1870_v38 = vld [vmem:[%s6187_s1 + $0x1e8] sm:$0xff] }
 0x2c8   : > { %v3195_v37 = vpop.f32.mrb[25].mxu1 }
 0x2c9   : > { %v3196_v30 = vadd.f32 %v3195_v37, %v3194_v22 }
 0x2cb   : > { %v3197_v59 = vpop.f32.mrb[26].mxu1  ;;  %v1676_v5 = vadd.f32 %v3196_v30, %v3084_v3 }
 0x2cc   : > { %v3198_v45 = vpop.f32.mrb[27].mxu1 }
 0x2cd   : > { %v3199_v61 = vadd.f32 %v3198_v45, %v3197_v59  ;;  %v3518_v45 = vpack.c.bf16 %v1870_v38, %v1869_v63 }
 0x2cf   : > { %v1681_v46 = vadd.f32 %v3199_v61, %v3084_v3  ;;  %3519 = vmatprep.subr.bf16.mxu0 %v3518_v45 }
 0x2d5   : > { %v3200_v20 = vpop.f32.mrb[28].mxu1 }
 0x2d6   : > { %v3201_v49 = vpop.f32.mrb[29].mxu1 }
 0x2d7   : > { %v3202_v54 = vadd.f32 %v3201_v49, %v3200_v20 }
 0x2d9   : > { %v1686_v8 = vadd.f32 %v3202_v54, %v3084_v3 }
 0x2dc   : > { %v3203_v2 = vpop.f32.mrb[30].mxu1 }
 0x2dd   : > { %v3204_v39 = vpop.f32.mrb[31].mxu1 }
 0x2de   : > { %v3205_v17 = vadd.f32 %v3204_v39, %v3203_v2 }
 0x2e0   : > { %v3384_v62 = vpop.f32.mrb[32].mxu1  ;;  %v1691_v15 = vadd.f32 %v3205_v17, %v3084_v3 }
 0x2e1   : > { %v1766_v23 = vadd.f32 %v3384_v62, %v1661_v36  ;;  %v1760_v32 = vpop.f32.mrb[33].mxu1 }
 0x2e2   : > { %v5563_v14 = vadd.f32 %v1760_v32, %v1656_v24 }
 0x2e3   : > { %v1808_v42 = vmin.f32 %v1766_v23, 0.0  ;;  %vm1800_vm7 = vcmp.gt.f32.partialorder %v1766_v23, 0.0 }
 0x2e4   : > { %v1807_v6 = vmin.f32 %v5563_v14, 0.0  ;;  %v3387_v26 = vpop.f32.mrb[34].mxu1  ;;  %vm1799_vm8 = vcmp.gt.f32.partialorder %v5563_v14, 0.0 }
 0x2e5   : > { %v1817_v53 = vmul.f32 1.442695, %v1808_v42  ;;  %v5566_v13 = vadd.f32 %v3387_v26, %v1671_v29  ;;  %v1770_v40 = vpop.f32.mrb[35].mxu1 }
 0x2e6   : > { %v1815_v19 = vmul.f32 1.442695, %v1807_v6  ;;  %v5568_v10 = vadd.f32 %v1770_v40, %v1666_v47 }
 0x2e7   : > { %3906 = vpow2.f32 %v1817_v53  ;;  %v1810_v35 = vmin.f32 %v5566_v13, 0.0  ;;  %vm1802_vm9 = vcmp.gt.f32.partialorder %v5566_v13, 0.0 }
 0x2e8   : > { %3908 = vpow2.f32 %v1815_v19  ;;  %v1809_v21 = vmin.f32 %v5568_v10, 0.0  ;;  %v3390_v43 = vpop.f32.mrb[36].mxu1  ;;  %vm1801_vm3 = vcmp.gt.f32.partialorder %v5568_v10, 0.0 }
 0x2e9   : > { %v1821_v52 = vmul.f32 1.442695, %v1810_v35  ;;  %v5572_v0 = vadd.f32 %v3390_v43, %v1681_v46  ;;  %v1780_v18 = vpop.f32.mrb[37].mxu1 }
 0x2ea   : > { %v1819_v1 = vmul.f32 1.442695, %v1809_v21  ;;  %v5574_v7 = vadd.f32 %v1780_v18, %v1676_v5 }
 0x2eb   : > { %3910 = vpow2.f32 %v1821_v52  ;;  %v1812_v33 = vmin.f32 %v5572_v0, 0.0  ;;  %vm1804_vm10 = vcmp.gt.f32.partialorder %v5572_v0, 0.0 }
 0x2ec   : > { %3912 = vpow2.f32 %v1819_v1  ;;  %v1811_v51 = vmin.f32 %v5574_v7, 0.0  ;;  %v3393_v60 = vpop.f32.mrb[38].mxu1  ;;  %vm1803_vm11 = vcmp.gt.f32.partialorder %v5574_v7, 0.0 }
 0x2ed   : > { %v1825_v44 = vmul.f32 1.442695, %v1812_v33  ;;  %v5578_v50 = vadd.f32 %v3393_v60, %v1691_v15  ;;  %v1790_v27 = vpop.f32.mrb[39].mxu1  ;;  %v6357_v15 = vld [vmem:[#allocation4_spill] sm:$0xff] }
 0x2ee   : > { %v1823_v9 = vmul.f32 1.442695, %v1811_v51  ;;  %v5580_v58 = vadd.f32 %v1790_v27, %v1686_v8 }
 0x2ef   : > { %3914 = vpow2.f32 %v1825_v44  ;;  %v1814_v28 = vmin.f32 %v5578_v50, 0.0  ;;  %vm1806_vm12 = vcmp.gt.f32.partialorder %v5578_v50, 0.0 }
 0x2f0   : > { %3916 = vpow2.f32 %v1823_v9  ;;  %v1813_v41 = vmin.f32 %v5580_v58, 0.0  ;;  %vm1805_vm13 = vcmp.gt.f32.partialorder %v5580_v58, 0.0 }
 0x2f1   : > { %v3907_v16 = vpop.eup %3906  ;;  %v1829_v4 = vmul.f32 1.442695, %v1814_v28 }
 0x2f2   : > { %v3909_v25 = vpop.eup %3908  ;;  %v3094_v11 = vadd.f32 -1.0, %v3907_v16  ;;  %v1827_v55 = vmul.f32 1.442695, %v1813_v41 }
 0x2f3   : > { %v3093_v34 = vadd.f32 -1.0, %v3909_v25  ;;  %3918 = vpow2.f32 %v1829_v4 }
 0x2f4   : > { %v5586_v56 = vsel %vm1800_vm7, %v1766_v23, %v3094_v11  ;;  %3920 = vpow2.f32 %v1827_v55 }
 0x2f5   : > { %v3911_v12 = vpop.eup %3910  ;;  %v1893_v48 = vrot.slane %v5586_v56, 1  ;;  %v1909_v31 = vrot.slane %v5586_v56, 2  ;;  %v1925_v57 = vrot.slane %v5586_v56, 3  ;;  %v1965_v37 = vrot.slane %v5586_v56, 4 }
 0x2f6   : > { %v3913_v22 = vpop.eup %3912  ;;  %v5604_v30 = vsel %vm1799_vm8, %v5563_v14, %v3093_v34  ;;  %v3096_v59 = vadd.f32 -1.0, %v3911_v12 }
 0x2f7   : > { %v1892_v61 = vrot.slane %v5604_v30, 1  ;;  %v1908_v20 = vrot.slane %v5604_v30, 2  ;;  %v1924_v49 = vrot.slane %v5604_v30, 3  ;;  %v3095_v54 = vadd.f32 -1.0, %v3913_v22 }
 0x2f8   : > { %v5613_v2 = vsel %vm1802_vm9, %v5566_v13, %v3096_v59  ;;  %v1964_v39 = vrot.slane %v5604_v30, 4  ;;  %v1981_v3 = vsel %vm276_vm0, %v1893_v48, %v1909_v31  ;;  %v1941_v17 = vsel %vm276_vm0, %v5586_v56, %v1893_v48 }
 0x2f9   : > { %v3915_v36 = vpop.eup %3914  ;;  %v5621_v62 = vsel %vm276_vm0, %v5604_v30, %v1892_v61  ;;  %v1895_v24 = vrot.slane %v5613_v2, 1  ;;  %v1911_v23 = vrot.slane %v5613_v2, 2  ;;  %v1927_v32 = vrot.slane %v5613_v2, 3 }
 0x2fa   : > { %v3917_v14 = vpop.eup %3916  ;;  %v1967_v42 = vrot.slane %v5613_v2, 4  ;;  %v5631_v29 = vsel %vm1801_vm3, %v5568_v10, %v3095_v54  ;;  %v3098_v6 = vadd.f32 -1.0, %v3915_v36  ;;  %v1980_v26 = vsel %vm276_vm0, %v1892_v61, %v1908_v20  ;;  %v6358_v54 = vld [vmem:[#allocation5_spill] sm:$0xff] }
 0x2fb   : > { %v1894_v47 = vrot.slane %v5631_v29, 1  ;;  %v1910_v53 = vrot.slane %v5631_v29, 2  ;;  %v1926_v13 = vrot.slane %v5631_v29, 3  ;;  %v1966_v40 = vrot.slane %v5631_v29, 4 }
 0x2fc   : > { %v5643_v19 = vsel %vm1804_vm10, %v5572_v0, %v3098_v6  ;;  %v3097_v10 = vadd.f32 -1.0, %v3917_v14  ;;  %v1988_v35 = vsel %vm1022_vm4, %v1980_v26, %v1924_v49  ;;  %v1989_v46 = vsel %vm1022_vm4, %v1981_v3, %v1925_v57 }
 0x2fd   : > { %v3919_v21 = vpop.eup %3918  ;;  %v5653_v43 = vsel %vm276_vm0, %v5631_v29, %v1894_v47  ;;  %v1897_v5 = vrot.slane %v5643_v19, 1  ;;  %v1913_v52 = vrot.slane %v5643_v19, 2  ;;  %v1996_v0 = vsel %vm1040_vm5, %v1988_v35, %v1964_v39 }
 0x2fe   : > { %v3921_v18 = vpop.eup %3920  ;;  %v5661_v1 = vsel %vm1803_vm11, %v5574_v7, %v3097_v10  ;;  %v3100_v33 = vadd.f32 -1.0, %v3919_v21  ;;  %v3752_v51 = vpack.i.bf16 %v6357_v15, %v1996_v0  ;;  %v2014_v60 = vrot.slane %v1996_v0, 7 }
 0x2ff   : > { %v1896_v8 = vrot.slane %v5661_v1, 1  ;;  %v1912_v44 = vrot.slane %v5661_v1, 2  ;;  %v1928_v27 = vrot.slane %v5661_v1, 3  ;;  %v3099_v9 = vadd.f32 -1.0, %v3921_v18 }
 0x300   : > { %v5670_v28 = vsel %vm1806_vm12, %v5578_v50, %v3100_v33  ;;  %3753 = vrot.lane.b32.xlu0 %v3752_v51, %s3938_s21  ;;  %v5674_v7 = vsel %vm1040_vm5, %v1989_v46, %v1965_v37  ;;  %v1983_v41 = vsel %vm276_vm0, %v1895_v24, %v1911_v23  ;;  %v1949_v16 = vsel %vm1022_vm4, %v1941_v17, %v1909_v31 }
 0x301   : > { %v5680_v4 = vsel %vm276_vm0, %v5661_v1, %v1896_v8  ;;  %v1899_v25 = vrot.slane %v5670_v28, 1  ;;  %v1915_v11 = vrot.slane %v5670_v28, 2  ;;  %v1931_v50 = vrot.slane %v5670_v28, 3 }
 0x302   : > { %v1971_v55 = vrot.slane %v5670_v28, 4  ;;  %v5689_v34 = vsel %vm1805_vm13, %v5580_v58, %v3099_v9  ;;  %v2015_v12 = vrot.slane %v5674_v7, 7  ;;  %v1991_v48 = vsel %vm1022_vm4, %v1983_v41, %v1927_v32 }
 0x303   : > { %v1898_v31 = vrot.slane %v5689_v34, 1  ;;  %v1914_v63 = vrot.slane %v5689_v34, 2  ;;  %v1930_v38 = vrot.slane %v5689_v34, 3  ;;  %v5697_v22 = vsel %vm1040_vm5, %v1991_v48, %v1967_v42 }
 0x304   : > { %v5700_v37 = vsel %vm276_vm0, 0.0, %v2015_v12  ;;  %v2017_v59 = vrot.slane %v5697_v22, 7  ;;  %v1957_v58 = vsel %vm1040_vm5, %v1949_v16, %v1925_v57  ;;  %v2032_v45 = vsel %vm276_vm0, 0.0, %v2014_v60 }
 0x305   : > { %v5709_v61 = vsel %vm276_vm0, %v5689_v34, %v1898_v31  ;;  %v3757_v39 = vpack.i.bf16 %v6358_v54, %v5700_v37  ;;  %v3762_v3 = vpack.i.bf16 %v2032_v45, %v1957_v58  ;;  %v1943_v17 = vsel %vm276_vm0, %v5613_v2, %v1895_v24  ;;  %v1853_v45 = vld [vmem:[%s6187_s1 + $0x160] sm:$0xff] }
 0x306   : > { %v5716_v36 = vsel %vm276_vm0, 0.0, %v2017_v59  ;;  %v1951_v56 = vsel %vm1022_vm4, %v1943_v17, %v1911_v23  ;;  %v1982_v57 = vsel %vm276_vm0, %v1894_v47, %v1910_v53  ;;  %v1929_v14 = vrot.slane %v5643_v19, 3 }
 0x307   : > { %3758 = vrot.lane.b32.xlu0 %v3757_v39, %s3940_s23  ;;  %v3772_v42 = vpack.i.bf16 %v5674_v7, %v5716_v36  ;;  %v1959_v6 = vsel %vm1040_vm5, %v1951_v56, %v1927_v32  ;;  %v1990_v2 = vsel %vm1022_vm4, %v1982_v57, %v1926_v13  ;;  %v1945_v24 = vsel %vm276_vm0, %v5643_v19, %v1897_v5 }
 0x308   : > { %v1998_v23 = vsel %vm1040_vm5, %v1990_v2, %v1966_v40  ;;  %v1953_v26 = vsel %vm1022_vm4, %v1945_v24, %v1913_v52  ;;  %v1970_v47 = vrot.slane %v5689_v34, 4  ;;  %v1986_v32 = vsel %vm276_vm0, %v1898_v31, %v1914_v63  ;;  %v1856_v24 = vld [vmem:[%s6187_s1 + $0x178] sm:$0xff]  ;;  %v1859_v34 = vld [vmem:[%s6187_s1 + $0x190] sm:$0xff] }
 0x309   : > { %3773 = vrot.lane.b32.xlu1 %v3772_v42, %s3940_s23  ;;  %v2016_v10 = vrot.slane %v1998_v23, 7  ;;  %v3767_v35 = vpack.i.bf16 %v1957_v58, %v1998_v23  ;;  %v5744_v46 = vsel %vm1040_vm5, %v1953_v26, %v1929_v14  ;;  %v1994_v40 = vsel %vm1022_vm4, %v1986_v32, %v1930_v38  ;;  %v1873_v23 = vld [vmem:[%s6187_s1 + $0x200] sm:$0xff] }
 0x30a   : > { %v2002_v21 = vsel %vm1040_vm5, %v1994_v40, %v1970_v47  ;;  %v1968_v0 = vrot.slane %v5661_v1, 4  ;;  %v1984_v18 = vsel %vm276_vm0, %v1896_v8, %v1912_v44  ;;  %v1969_v33 = vrot.slane %v5643_v19, 4  ;;  %v1854_v19 = vld [vmem:[%s6187_s1 + $0x168] sm:$0xff] }
 0x30b   : > { %3763 = vrot.lane.b32.xlu0 %v3762_v3, %s3939_s22  ;;  %v2034_v15 = vsel %vm276_vm0, 0.0, %v2016_v10  ;;  %v2020_v51 = vrot.slane %v2002_v21, 7  ;;  %v3792_v60 = vpack.i.bf16 %v5744_v46, %v2002_v21  ;;  %v1992_v9 = vsel %vm1022_vm4, %v1984_v18, %v1928_v27 }
 0x30c   : > { %v3777_v41 = vpack.i.bf16 %v2034_v15, %v1959_v6  ;;  %v2000_v16 = vsel %vm1040_vm5, %v1992_v9, %v1968_v0  ;;  %v1985_v8 = vsel %vm276_vm0, %v1897_v5, %v1913_v52  ;;  %v1987_v12 = vsel %vm276_vm0, %v1899_v25, %v1915_v11  ;;  %v1858_v0 = vld [vmem:[%s6187_s1 + $0x188] sm:$0xff] }
 0x30d   : > { %v2018_v48 = vrot.slane %v2000_v16, 7  ;;  %v3782_v31 = vpack.i.bf16 %v1959_v6, %v2000_v16  ;;  %v1993_v59 = vsel %vm1022_vm4, %v1985_v8, %v1929_v14  ;;  %v1995_v58 = vsel %vm1022_vm4, %v1987_v12, %v1931_v50  ;;  %v1871_v14 = vld [vmem:[%s6187_s1 + $0x1f0] sm:$0xff]  ;;  %v1862_v9 = vld [vmem:[%s6187_s1 + $0x1a8] sm:$0xff]  ;;  %v1880_v16 = vld [vmem:[%s6187_s1 + $0x238] sm:$0xff] }
 0x30e   : > { %3778 = vrot.lane.b32.xlu1 %v3777_v41, %s3939_s22  ;;  %v2001_v5 = vsel %vm1040_vm5, %v1993_v59, %v1969_v33  ;;  %v2003_v52 = vsel %vm1040_vm5, %v1995_v58, %v1971_v55  ;;  %v1947_v39 = vsel %vm276_vm0, %v5670_v28, %v1899_v25  ;;  %v2038_v3 = vsel %vm276_vm0, 0.0, %v2020_v51  ;;  %v1872_v55 = vld [vmem:[%s6187_s1 + $0x1f8] sm:$0xff]  ;;  %v1855_v25 = vld [vmem:[%s6187_s1 + $0x170] sm:$0xff]  ;;  %v1874_v28 = vld [vmem:[%s6187_s1 + $0x208] sm:$0xff] }
 0x30f   : > { %3768 = vrot.lane.b32.xlu0 %v3767_v35, %s3938_s21  ;;  %v2021_v17 = vrot.slane %v2003_v52, 7  ;;  %v2019_v56 = vrot.slane %v2001_v5, 7  ;;  %v1955_v57 = vsel %vm1022_vm4, %v1947_v39, %v1915_v11  ;;  %v2036_v6 = vsel %vm276_vm0, 0.0, %v2018_v48  ;;  %v1876_v33 = vld [vmem:[%s6187_s1 + $0x218] sm:$0xff]  ;;  %v1879_v41 = vld [vmem:[%s6187_s1 + $0x230] sm:$0xff] }
 0x310   : > { %v1963_v42 = vsel %vm1040_vm5, %v1955_v57, %v1931_v50  ;;  %v1948_v11 = vsel %vm1022_vm4, %v5621_v62, %v1908_v20  ;;  %v3520_v2 = vpack.c.bf16 %v1854_v19, %v1853_v45  ;;  %v3807_v47 = vpack.i.bf16 %v2036_v6, %v5744_v46  ;;  %v1857_v46 = vld [vmem:[%s6187_s1 + $0x180] sm:$0xff] }
 0x311   : > { %v2039_v50 = vsel %vm276_vm0, 0.0, %v2021_v17  ;;  %v3802_v26 = vpack.i.bf16 %v2038_v3, %v1963_v42  ;;  %v2161_v20 = vrot.slane %v2003_v52, 4  ;;  %v5820_v32 = vsel %vm276_vm0, 0.0, %v2019_v56 }
 0x312   : > { %3793 = vrot.lane.b32.xlu1 %v3792_v60, %s3938_s21  ;;  %v3797_v62 = vpack.i.bf16 %v2001_v5, %v2039_v50  ;;  %v5825_v10 = vsel %vm1040_vm5, %v1948_v11, %v1924_v49  ;;  %3521 = vmatpush3.bf16.msra.mxu0 %v3520_v2  ;;  %v3522_v35 = vpack.c.bf16 %v1872_v55, %v1871_v14  ;;  %v2153_v18 = vrot.slane %v5697_v22, 4  ;;  %v1875_v49 = vld [vmem:[%s6187_s1 + $0x210] sm:$0xff] }
 0x313   : > { %3783 = vrot.lane.b32.xlu0 %v3782_v31, %s3938_s21  ;;  %v3524_v40 = vpack.c.bf16 %v1856_v24, %v1855_v25  ;;  %v3526_v21 = vpack.c.bf16 %v1874_v28, %v1873_v23  ;;  %v1950_v30 = vsel %vm1022_vm4, %v5653_v43, %v1910_v53  ;;  %v1954_v15 = vsel %vm1022_vm4, %v5709_v61, %v1914_v63 }
 0x314   : > { %v3787_v51 = vpack.i.bf16 %v5697_v22, %v5820_v32  ;;  %3523 = vmatprep.subr.bf16.mxu0 %v3522_v35  ;;  %v1958_v53 = vsel %vm1040_vm5, %v1950_v30, %v1926_v13  ;;  %v5857_v43 = vsel %vm1040_vm5, %v1954_v15, %v1930_v38  ;;  %v1952_v60 = vsel %vm1022_vm4, %v5680_v4, %v1912_v44  ;;  %v1860_v44 = vld [vmem:[%s6187_s1 + $0x198] sm:$0xff]  ;;  %v1878_v38 = vld [vmem:[%s6187_s1 + $0x228] sm:$0xff] }
 0x315   : > { %v3528_v63 = vpack.c.bf16 %v1858_v0, %v1857_v46  ;;  %v5867_v29 = vsel %vm1040_vm5, %v1952_v60, %v1928_v27  ;;  %v3530_v13 = vpack.c.bf16 %v1876_v33, %v1875_v49  ;;  %v5878_v4 = vsel %vm1058_vm6, %v5674_v7, %v2153_v18  ;;  %v1877_v27 = vld [vmem:[%s6187_s1 + $0x220] sm:$0xff] }
 0x316   : > { %3798 = vrot.lane.b32.xlu1 %v3797_v62, %s3940_s23  ;;  %3525 = vmatpush3.bf16.msra.mxu0 %v3524_v40  ;;  %v5881_v1 = vsel %vm1058_vm6, %v2001_v5, %v2161_v20  ;;  %v3532_v22 = vpack.c.bf16 %v1860_v44, %v1859_v34  ;;  %v3534_v61 = vpack.c.bf16 %v1878_v38, %v1877_v27  ;;  %v1861_v7 = vld [vmem:[%s6187_s1 + $0x1a0] sm:$0xff]  ;;  %v2013_v58 = vrot.slane %v6358_v54, 7  ;;  %v1882_v20 = vld [vmem:[%s6187_s1 + $0x248] sm:$0xff] }
 0x317   : > { %3788 = vrot.lane.b32.xlu0 %v3787_v51, %s3940_s23  ;;  %3527 = vmatprep.subr.bf16.mxu0 %v3526_v21  ;;  %v3536_v8 = vpack.c.bf16 %v1862_v9, %v1861_v7  ;;  %v3538_v12 = vpack.c.bf16 %v1880_v16, %v1879_v41  ;;  %vm3942_vm5 = vmmov 0  }
 0x318   : > { %v2031_v5 = vsel %vm276_vm0, 0.0, %v2013_v58 }
 0x31a   : > { %3803 = vrot.lane.b32.xlu1 %v3802_v26, %s3939_s22  ;;  %3529 = vmatpush3.bf16.msra.mxu0 %v3528_v63 }
 0x31b   : > { %3531 = vmatprep.subr.bf16.mxu0 %v3530_v13 }
 0x31e   : > { %3808 = vrot.lane.b32.xlu1 %v3807_v47, %s3939_s22  ;;  %3533 = vmatpush3.bf16.msra.mxu0 %v3532_v22  ;;  %v1881_v47 = vld [vmem:[%s6187_s1 + $0x240] sm:$0xff] }
 0x31f   : > { %3535 = vmatprep.subr.bf16.mxu0 %v3534_v61  ;;  %v3542_v15 = vpack.c.bf16 %v1882_v20, %v1881_v47  ;;  %v2351_v47 = vld [vmem:[%s6187_s1 + $0x260] sm:$0xff]  ;;  %v2352_v20 = vld [vmem:[%s6187_s1 + $0x268] sm:$0xff] }
 0x322   : > { %3537 = vmatpush3.bf16.msra.mxu0 %v3536_v8 }
 0x323   : > { %3539 = vmatprep.subr.bf16.mxu0 %v3538_v12 }
 0x372   : > { %v3754_v48 = vpop.permute.xlu0 %3753 }
 0x373   : > { %v3756_v52 = vunpack.i.h.bf16 %v3754_v48  ;;  %v3755_v39 = vunpack.i.l.bf16 %v3754_v48 }
 0x375   : > { %v2125_v62 = vsel %vm1518_vm15, %v2031_v5, %v3756_v52 }
 0x379   : > { %v3759_v31 = vpop.permute.xlu0 %3758 }
 0x37a   : > { %v3761_v17 = vunpack.i.h.bf16 %v3759_v31  ;;  %v3760_v56 = vunpack.i.l.bf16 %v3759_v31 }
 0x37b   : > { %v3774_v59 = vpop.permute.xlu1 %3773 }
 0x37c   : > { %v3776_v55 = vunpack.i.h.bf16 %v3774_v59  ;;  %v3775_v25 = vunpack.i.l.bf16 %v3774_v59  ;;  %v2129_v21 = vsel %vm1527_vm1, %v2125_v62, %v3761_v17  ;;  %v2369_v62 = vld [vmem:[%s6187_s1 + $0x2f0] sm:$0xff] }
 0x37d   : > { %v3764_v45 = vpop.permute.xlu0 %3763 }
 0x37e   : > { %v3766_v42 = vunpack.i.h.bf16 %v3764_v45  ;;  %v3765_v6 = vunpack.i.l.bf16 %v3764_v45 }
 0x380   : > { %v3779_v19 = vpop.permute.xlu1 %3778  ;;  %v2133_v30 = vsel %vm1536_vm2, %v2129_v21, %v3766_v42  ;;  %v6359_v42 = vmov 0.0   ;;  %v2353_v21 = vld [vmem:[%s6187_s1 + $0x270] sm:$0xff] }
 0x381   : > { %v3769_v3 = vpop.permute.xlu0 %3768  ;;  %v3781_v11 = vunpack.i.h.bf16 %v3779_v19  ;;  %v3780_v2 = vunpack.i.l.bf16 %v3779_v19 }
 0x382   : > { %v3771_v57 = vunpack.i.h.bf16 %v3769_v3  ;;  %v3770_v14 = vunpack.i.l.bf16 %v3769_v3 }
 0x384   : > { %v2126_v54 = vsel %vm1518_vm15, %v5700_v37, %v3771_v57  ;;  %v2138_v24 = vsel %vm1518_vm15, %v1958_v53, %v3770_v14  ;;  %v3794_v23 = vpop.permute.xlu1 %3793  ;;  %v2137_v37 = vsel %vm1518_vm15, %v5825_v10, %v3755_v39  ;;  %v2383_v14 = vld [vmem:[%s6187_s1 + $0x360] sm:$0xff] }
 0x385   : > { %v2130_v28 = vsel %vm1527_vm1, %v2126_v54, %v3776_v55  ;;  %v2142_v50 = vsel %vm1527_vm1, %v2138_v24, %v3775_v25  ;;  %v3784_v26 = vpop.permute.xlu0 %3783  ;;  %v2141_v46 = vsel %vm1527_vm1, %v2137_v37, %v3760_v56  ;;  %v3796_v51 = vunpack.i.h.bf16 %v3794_v23  ;;  %v2350_v24 = vld [vmem:[%s6187_s1 + $0x258] sm:$0xff] }
 0x386   : > { %v2146_v35 = vsel %vm1536_vm2, %v2142_v50, %v3780_v2  ;;  %v2134_v40 = vsel %vm1536_vm2, %v2130_v28, %v3781_v11  ;;  %v2145_v33 = vsel %vm1536_vm2, %v2141_v46, %v3765_v6  ;;  %v3795_v53 = vunpack.i.l.bf16 %v3794_v23  ;;  %v2365_v6 = vld [vmem:[%s6187_s1 + $0x2d0] sm:$0xff]  ;;  %v2366_v11 = vld [vmem:[%s6187_s1 + $0x2d8] sm:$0xff]  ;;  %v2367_v23 = vld [vmem:[%s6187_s1 + $0x2e0] sm:$0xff] }
 0x387   : > { %v2152_v0 = vrot.slane %v2146_v35, 4  ;;  %v2151_v18 = vrot.slane %v2134_v40, 4  ;;  %v3786_v44 = vunpack.i.h.bf16 %v3784_v26  ;;  %v3785_v27 = vunpack.i.l.bf16 %v3784_v26  ;;  %v2349_v2 = vld [vmem:[%s6187_s1 + $0x250] sm:$0xff]  ;;  %v2368_v28 = vld [vmem:[%s6187_s1 + $0x2e8] sm:$0xff]  ;;  %v2370_v37 = vld [vmem:[%s6187_s1 + $0x2f8] sm:$0xff] }
 0x388   : > { %v3799_v49 = vpop.permute.xlu1 %3798  ;;  %v2128_v22 = vsel %vm1518_vm15, %v5820_v32, %v3796_v51  ;;  %v2140_v61 = vsel %vm1518_vm15, %v5857_v43, %v3795_v53  ;;  %v3941_v55 = vmov 0.0|0.0   ;;  %v3546_v54 = vpack.c.bf16 %v2366_v11, %v2365_v6  ;;  %v2354_v46 = vld [vmem:[%s6187_s1 + $0x278] sm:$0xff] }
 0x389   : > { %v2166_v10 = vsel %vm1058_vm6, %v2145_v33, %v2152_v0  ;;  %v2165_v60 = vsel %vm1058_vm6, %v2133_v30, %v2151_v18  ;;  %v3801_v63 = vunpack.i.h.bf16 %v3799_v49  ;;  %v3800_v13 = vunpack.i.l.bf16 %v3799_v49  ;;  %v3789_v34 = vpop.permute.xlu0 %3788  ;;  %v2371_v0 = vld [vmem:[%s6187_s1 + $0x300] sm:$0xff]  ;;  %v2372_v18 = vld [vmem:[%s6187_s1 + $0x308] sm:$0xff] }
 0x38a   : > { %2245 = vmatprep.mubr.f32.mxu0 %v2166_v10  ;;  %v3791_v8 = vunpack.i.h.bf16 %v3789_v34  ;;  %v3790_v48 = vunpack.i.l.bf16 %v3789_v34  ;;  %v2127_v32 = vsel %vm1518_vm15, %v5716_v36, %v3786_v44  ;;  %v2139_v43 = vsel %vm1518_vm15, %v5867_v29, %v3785_v27  ;;  %v2381_v36 = vld [vmem:[%s6187_s1 + $0x350] sm:$0xff]  ;;  %v2382_v29 = vld [vmem:[%s6187_s1 + $0x358] sm:$0xff]  ;;  %3547 = vmatprep.subr.bf16.mxu1 %v3546_v54  ;;  %v2355_v33 = vld [vmem:[%s6187_s1 + $0x280] sm:$0xff] }
 0x38b   : > { %2246 = vmatmul.mubr.f32.vlgmr.msra.gmra.mrb[16].mxu0 %v2165_v60  ;;  %v2132_v41 = vsel %vm1527_vm1, %v2128_v22, %v3801_v63  ;;  %v2144_v16 = vsel %vm1527_vm1, %v2140_v61, %v3800_v13  ;;  %v3579_v25 = vpack.c.bf16 %v2382_v29, %v2381_v36  ;;  %v3548_v50 = vpack.c.bf16 %v2350_v24, %v2349_v2  ;;  %v3101_v34 = vld [vmem:[%s6187_s1 + $0x3f2] ss:$0 sm:$0xff] }
 0x38c   : > { %v3804_v38 = vpop.permute.xlu1 %3803  ;;  %3541 = vmatpush3.bf16.msra.mxu0 %v3538_v12  ;;  %v2143_v19 = vsel %vm1527_vm1, %v2139_v43, %v3790_v48  ;;  %v2131_v52 = vsel %vm1527_vm1, %v2127_v32, %v3791_v8  ;;  %v3550_v26 = vpack.c.bf16 %v2368_v28, %v2367_v23  ;;  %v3552_v35 = vpack.c.bf16 %v2352_v20, %v2351_v47 }
 0x38d   : > { %v3806_v7 = vunpack.i.h.bf16 %v3804_v38  ;;  %v3805_v9 = vunpack.i.l.bf16 %v3804_v38  ;;  %3543 = vmatprep.subr.bf16.mxu0 %v3542_v15  ;;  %3549 = vmatpush3.bf16.msra.mxu1 %v3548_v50  ;;  %v3554_v40 = vpack.c.bf16 %v2370_v37, %v2369_v62  ;;  %v3556_v30 = vpack.c.bf16 %v2354_v46, %v2353_v21  ;;  %v2359_v37 = vld [vmem:[%s6187_s1 + $0x2a0] sm:$0xff] }
 0x38e   : > { %3551 = vmatprep.subr.bf16.mxu1 %v3550_v26  ;;  %v3558_v49 = vpack.c.bf16 %v2372_v18, %v2371_v0  ;;  %v6360_v26 = vld [vmem:[#allocation2_spill] sm:$0xff]  ;;  %v2377_v18 = vld [vmem:[%s6187_s1 + $0x330] sm:$0xff] }
 0x38f   : > { %v2136_v31 = vsel %vm1536_vm2, %v2132_v41, %v3806_v7  ;;  %v2148_v59 = vsel %vm1536_vm2, %v2144_v16, %v3805_v9 }
 0x390   : > { %v3809_v12 = vpop.permute.xlu1 %3808  ;;  %3545 = vmatpush3.bf16.msra.mxu0 %v3542_v15  ;;  %v2160_v5 = vrot.slane %v2148_v59, 4  ;;  %v2159_v39 = vrot.slane %v2136_v31, 4  ;;  %v2356_v15 = vld [vmem:[%s6187_s1 + $0x288] sm:$0xff]  ;;  %v2373_v31 = vld [vmem:[%s6187_s1 + $0x310] sm:$0xff]  ;;  %v2374_v59 = vld [vmem:[%s6187_s1 + $0x318] sm:$0xff] }
 0x391   : > { %v3811_v58 = vunpack.i.h.bf16 %v3809_v12  ;;  %v3810_v45 = vunpack.i.l.bf16 %v3809_v12  ;;  %3578 = vmatprep.subr.bf16.mxu0 %v3941_v55  ;;  %3553 = vmatpush3.bf16.msra.mxu1 %v3552_v35  ;;  %v3560_v51 = vpack.c.bf16 %v2356_v15, %v2355_v33  ;;  %v2357_v12 = vld [vmem:[%s6187_s1 + $0x290] sm:$0xff]  ;;  %v3562_v43 = vpack.c.bf16 %v2374_v59, %v2373_v31  ;;  %v2360_v35 = vld [vmem:[%s6187_s1 + $0x2a8] sm:$0xff] }
 0x392   : > { %3555 = vmatprep.subr.bf16.mxu1 %v3554_v40  ;;  %v6361_v31 = vld [vmem:[#allocation3_spill] sm:$0xff] }
 0x393   : > { %v2147_v3 = vsel %vm1536_vm2, %v2143_v19, %v3810_v45  ;;  %v2135_v17 = vsel %vm1536_vm2, %v2131_v52, %v3811_v58  ;;  %v2358_v58 = vld [vmem:[%s6187_s1 + $0x298] sm:$0xff] }
 0x394   : > { %v2169_v56 = vsel %vm1058_vm6, %v2147_v3, %v2160_v5  ;;  %v2168_v57 = vsel %vm1058_vm6, %v2135_v17, %v2159_v39  ;;  %v3564_v5 = vpack.c.bf16 %v2358_v58, %v2357_v12  ;;  %v2375_v3 = vld [vmem:[%s6187_s1 + $0x320] sm:$0xff]  ;;  %v2376_v17 = vld [vmem:[%s6187_s1 + $0x328] sm:$0xff]  ;;  %v2415_v58 = vrot.slane %v6361_v31, 7 }
 0x395   : > { %2250 = vmatprep.mubr.f32.mxu0 %v2169_v56  ;;  %3557 = vmatpush3.bf16.msra.mxu1 %v3556_v30  ;;  %v2378_v30 = vld [vmem:[%s6187_s1 + $0x338] sm:$0xff] }
 0x396   : > { %2251 = vmatmul.mubr.f32.gmra.mrb[18].mxu0 %v2168_v57  ;;  %3559 = vmatprep.subr.bf16.mxu1 %v3558_v49 }
 0x397   : > { %3402 = vmatprep.mubr.msk.f32.mxu0 %vm1518_vm15, %v5878_v4  ;;  %v2384_v4 = vld [vmem:[%s6187_s1 + $0x368] sm:$0xff] }
 0x399   : > { %3561 = vmatpush3.bf16.msra.mxu1 %v3560_v51 }
 0x39a   : > { %3403 = vmatmul.mubr.msk.f32.vlgmr.msra.gmra.mrb[20].mxu0 %vm1518_vm15, %v5881_v1  ;;  %v3582_v1 = vpack.c.bf16 %v2384_v4, %v2383_v14  ;;  %3563 = vmatprep.subr.bf16.mxu1 %v3562_v43 }
 0x39b   : > { %3580 = vmatpush3.bf16.msra.mxu0 %v3579_v25  ;;  %3413 = vmatprep.mubr.msk.f32.mxu0 %vm3942_vm5, %v6359_v42 }
 0x39c   : > { %3581 = vmatprep.subr.bf16.mxu0 %v3941_v55 }
 0x39d   : > { %3565 = vmatpush3.bf16.msra.mxu1 %v3564_v5 }
 0x39f   : > { %3583 = vmatpush3.bf16.msra.mxu0 %v3582_v1  ;;  %v3566_v1 = vpack.c.bf16 %v2376_v17, %v2375_v3 }
 0x3a0   : > { %3584 = vmatprep.subr.bf16.mxu0 %v3941_v55 }
 0x3a1   : > { %3567 = vmatprep.subr.bf16.mxu1 %v3566_v1 }
 0x45e   : > { %v3250_v53 = vpop.f32.mrb[16].mxu0 }
 0x45f   : > { %v3251_v10 = vpop.f32.mrb[17].mxu0 }
 0x460   : > { %v3252_v60 = vadd.f32 %v3251_v10, %v3250_v53  ;;  %v2361_v53 = vld [vmem:[%s6187_s1 + $0x2b0] sm:$0xff]  ;;  %v2362_v10 = vld [vmem:[%s6187_s1 + $0x2b8] sm:$0xff] }
 0x462   : > { %v2248_v22 = vadd.f32 %v3252_v60, %v3101_v34 }
 0x469   : > { %v3253_v63 = vpop.f32.mrb[18].mxu0 }
 0x46a   : > { %v3254_v13 = vpop.f32.mrb[19].mxu0 }
 0x46b   : > { %v3255_v44 = vadd.f32 %v3254_v13, %v3253_v63 }
 0x46d   : > { %v2253_v27 = vadd.f32 %v3255_v44, %v3101_v34  ;;  %v3404_v38 = vpop.f32.mrb[20].mxu0  ;;  %v3568_v34 = vpack.c.bf16 %v2360_v35, %v2359_v37  ;;  %v2379_v44 = vld [vmem:[%s6187_s1 + $0x340] sm:$0xff] }
 0x46e   : > { %v2322_v61 = vpop.f32.mrb[21].mxu0 }
 0x46f   : > { %v2328_v7 = vadd.f32 %v3404_v38, %v2253_v27  ;;  %v2323_v9 = vadd.f32 %v2322_v61, %v2248_v22  ;;  %v2380_v27 = vld [vmem:[%s6187_s1 + $0x348] sm:$0xff]  ;;  %v3570_v22 = vpack.c.bf16 %v2378_v30, %v2377_v18  ;;  %3569 = vmatpush3.bf16.msra.mxu1 %v3568_v34 }
 0x471   : > { %v2334_v41 = vmin.f32 %v2328_v7, 0.0  ;;  %v2333_v16 = vmin.f32 %v2323_v9, 0.0  ;;  %vm2332_vm6 = vcmp.gt.f32.partialorder %v2328_v7, 0.0  ;;  %vm2331_vm14 = vcmp.gt.f32.partialorder %v2323_v9, 0.0  ;;  %3571 = vmatprep.subr.bf16.mxu1 %v3570_v22 }
 0x473   : > { %v2337_v8 = vmul.f32 1.442695, %v2334_v41  ;;  %v2335_v48 = vmul.f32 1.442695, %v2333_v16  ;;  %v3574_v41 = vpack.c.bf16 %v2380_v27, %v2379_v44  ;;  %v2363_v16 = vld [vmem:[%s6187_s1 + $0x2c0] sm:$0xff] }
 0x475   : > { %3922 = vpow2.f32 %v2337_v8  ;;  %v2364_v8 = vld [vmem:[%s6187_s1 + $0x2c8] sm:$0xff] }
 0x476   : > { %3924 = vpow2.f32 %v2335_v48  ;;  %v3576_v12 = vpack.c.bf16 %v2364_v8, %v2363_v16 }
 0x47f   : > { %v3923_v32 = vpop.eup %3922 }
 0x480   : > { %v3925_v45 = vpop.eup %3924  ;;  %v3105_v19 = vadd.f32 -1.0, %v3923_v32 }
 0x481   : > { %v3104_v52 = vadd.f32 -1.0, %v3925_v45 }
 0x482   : > { %v2342_v39 = vsel %vm2332_vm6, %v2328_v7, %v3105_v19 }
 0x483   : > { %v2347_v56 = vrot.slane %v2342_v39, 4  ;;  %v2388_v57 = vrot.slane %v2342_v39, 1  ;;  %v2400_v36 = vrot.slane %v2342_v39, 2  ;;  %v2341_v29 = vsel %vm2331_vm14, %v2323_v9, %v3104_v52 }
 0x484   : > { %v2344_v14 = vrot.slane %v2341_v29, 4  ;;  %v2386_v25 = vrot.slane %v2341_v29, 1  ;;  %v2398_v4 = vrot.slane %v2341_v29, 2  ;;  %v3572_v9 = vpack.c.bf16 %v2362_v10, %v2361_v53  ;;  %v2653_v10 = vld [vmem:[%s6187_s1 + $0x388] sm:$0xff] }
 0x485   : > { %v2401_v6 = vrot.slane %v2347_v56, 2  ;;  %v2389_v11 = vrot.slane %v2347_v56, 1  ;;  %v2408_v2 = vsel %vm276_vm0, %v2388_v57, %v2400_v36  ;;  %v6037_v54 = vsel %vm276_vm0, %v2342_v39, %v2388_v57 }
 0x486   : > { %v2406_v24 = vsel %vm276_vm0, %v2386_v25, %v2398_v4  ;;  %v2418_v23 = vrot.slane %v2408_v2, 7  ;;  %v2387_v28 = vrot.slane %v2344_v14, 1  ;;  %v2399_v50 = vrot.slane %v2344_v14, 2  ;;  %3573 = vmatpush3.bf16.msra.mxu1 %v3572_v9  ;;  %v2729_v9 = vld [vmem:[%s6187_s1 + $0x398] sm:$0xff] }
 0x487   : > { %v3812_v47 = vpack.i.bf16 %v6360_v26, %v2406_v24  ;;  %v2397_v20 = vsel %vm276_vm0, %v2347_v56, %v2389_v11  ;;  %v2409_v62 = vsel %vm276_vm0, %v2389_v11, %v2401_v6  ;;  %v2416_v60 = vrot.slane %v2406_v24, 7  ;;  %3575 = vmatprep.subr.bf16.mxu1 %v3574_v41 }
 0x488   : > { %v2428_v40 = vsel %vm276_vm0, 0.0, %v2418_v23  ;;  %v2407_v21 = vsel %vm276_vm0, %v2387_v28, %v2399_v50  ;;  %v2489_v46 = vrot.slane %v2409_v62, 6  ;;  %v2395_v0 = vsel %vm276_vm0, %v2344_v14, %v2387_v28 }
 0x489   : > { %3813 = vrot.lane.b32.xlu0 %v3812_v47, %s3938_s21  ;;  %v3822_v49 = vpack.i.bf16 %v2428_v40, %v2397_v20  ;;  %v3817_v33 = vpack.i.bf16 %v2395_v0, %v2408_v2  ;;  %v2419_v15 = vrot.slane %v2409_v62, 7  ;;  %v2417_v51 = vrot.slane %v2407_v21, 7 }
 0x48a   : > { %v2495_v63 = vsel %vm1022_vm4, %v2407_v21, %v2489_v46  ;;  %v2394_v13 = vsel %vm276_vm0, %v2341_v29, %v2386_v25  ;;  %v2426_v48 = vsel %vm276_vm0, 0.0, %v2416_v60  ;;  %3577 = vmatpush3.bf16.msra.mxu1 %v3576_v12  ;;  %v2425_v39 = vsel %vm276_vm0, 0.0, %v2415_v58 }
 0x48b   : > { %3823 = vrot.lane.b32.xlu1 %v3822_v49, %s3939_s22  ;;  %3414 = vmatmul.mubr.msk.f32.vlgmr.msra.gmra.mrb[22].mxu0 %vm1518_vm15, %v2495_v63  ;;  %v2429_v38 = vsel %vm276_vm0, 0.0, %v2419_v15  ;;  %v2427_v7 = vsel %vm276_vm0, 0.0, %v2417_v51  ;;  %v3837_v32 = vpack.i.bf16 %v2426_v48, %v2395_v0  ;;  %v2651_v15 = vld [vmem:[%s6187_s1 + $0x378] sm:$0xff]  ;;  %v2652_v51 = vld [vmem:[%s6187_s1 + $0x380] sm:$0xff] }
 0x48c   : > { %v3827_v61 = vpack.i.bf16 %v2407_v21, %v2429_v38  ;;  %3424 = vmatprep.mubr.msk.f32.mxu0 %vm3942_vm5, %v6359_v42  ;;  %v3832_v59 = vpack.i.bf16 %v6361_v31, %v2427_v7  ;;  %v3588_v60 = vpack.c.bf16 %v2653_v10, %v2652_v51  ;;  %v2730_v48 = vld [vmem:[%s6187_s1 + $0x3a0] sm:$0xff]  ;;  %v2731_v31 = vld [vmem:[%s6187_s1 + $0x3a8] sm:$0xff] }
 0x48d   : > { %3818 = vrot.lane.b32.xlu0 %v3817_v33, %s3938_s21  ;;  %v2650_v33 = vld [vmem:[%s6187_s1 + $0x370] sm:$0xff]  ;;  %v3594_v12 = vpack.c.bf16 %v2731_v31, %v2730_v48 }
 0x48e   : > { %v3585_v53 = vpack.c.bf16 %v2651_v15, %v2650_v33 }
 0x48f   : > { %3828 = vrot.lane.b32.xlu1 %v3827_v61, %s3940_s23 }
 0x490   : > { %3586 = vmatpush3.bf16.msra.mxu0 %v3585_v53 }
 0x491   : > { %3833 = vrot.lane.b32.xlu0 %v3832_v59, %s3940_s23  ;;  %3587 = vmatprep.subr.bf16.mxu0 %v3941_v55 }
 0x493   : > { %3838 = vrot.lane.b32.xlu1 %v3837_v32, %s3939_s22  ;;  %v2806_v32 = vld [vmem:[%s6187_s1 + $0x3b0] sm:$0xff] }
 0x494   : > { %3589 = vmatpush3.bf16.msra.mxu0 %v3588_v60 }
 0x495   : > { %3590 = vmatprep.subr.bf16.mxu0 %v3941_v55 }
 0x4fb   : > { %v3814_v43 = vpop.permute.xlu0 %3813 }
 0x4fc   : > { %v3816_v17 = vunpack.i.h.bf16 %v3814_v43  ;;  %v3815_v56 = vunpack.i.l.bf16 %v3814_v43  ;;  %v2807_v43 = vld [vmem:[%s6187_s1 + $0x3b8] sm:$0xff] }
 0x4fd   : > { %v3824_v45 = vpop.permute.xlu1 %3823  ;;  %v3597_v58 = vpack.c.bf16 %v2807_v43, %v2806_v32 }
 0x4fe   : > { %v3826_v29 = vunpack.i.h.bf16 %v3824_v45  ;;  %v3825_v14 = vunpack.i.l.bf16 %v3824_v45  ;;  %v2473_v26 = vsel %vm1518_vm15, %v2425_v39, %v3816_v17  ;;  %v2479_v62 = vsel %vm1518_vm15, %v2394_v13, %v3815_v56  ;;  %v3106_v13 = vld [vmem:[%s6187_s1 + $0x3f3] ss:$0 sm:$0xff] }
 0x4ff   : > { %v3819_v19 = vpop.permute.xlu0 %3818  ;;  %v2884_v39 = vld [vmem:[%s6187_s1 + $0x3d0] sm:$0xff] }
 0x500   : > { %v3821_v5 = vunpack.i.h.bf16 %v3819_v19  ;;  %v3820_v52 = vunpack.i.l.bf16 %v3819_v19  ;;  %v2808_v19 = vld [vmem:[%s6187_s1 + $0x3c0] sm:$0xff] }
 0x501   : > { %v3829_v3 = vpop.permute.xlu1 %3828 }
 0x502   : > { %v3831_v57 = vunpack.i.h.bf16 %v3829_v3  ;;  %v3830_v36 = vunpack.i.l.bf16 %v3829_v3  ;;  %v2474_v25 = vsel %vm1518_vm15, %v2427_v7, %v3821_v5  ;;  %v2480_v4 = vsel %vm1518_vm15, %v6037_v54, %v3820_v52  ;;  %v2728_v7 = vld [vmem:[%s6187_s1 + $0x390] sm:$0xff]  ;;  %v2809_v5 = vld [vmem:[%s6187_s1 + $0x3c8] sm:$0xff]  ;;  %v2885_v3 = vld [vmem:[%s6187_s1 + $0x3d8] sm:$0xff] }
 0x503   : > { %v3834_v1 = vpop.permute.xlu0 %3833  ;;  %v3591_v8 = vpack.c.bf16 %v2729_v9, %v2728_v7  ;;  %v3600_v52 = vpack.c.bf16 %v2809_v5, %v2808_v19  ;;  %v3603_v17 = vpack.c.bf16 %v2885_v3, %v2884_v39 }
 0x504   : > { %v2476_v6 = vsel %vm1527_vm1, %v2474_v25, %v3831_v57  ;;  %v2482_v11 = vsel %vm1527_vm1, %v2480_v4, %v3830_v36  ;;  %v3836_v2 = vunpack.i.h.bf16 %v3834_v1  ;;  %v3835_v24 = vunpack.i.l.bf16 %v3834_v1  ;;  %v2886_v57 = vld [vmem:[%s6187_s1 + $0x3e0] sm:$0xff]  ;;  %v2887_v36 = vld [vmem:[%s6187_s1 + $0x3e8] sm:$0xff]  ;;  %v2649_v25 = vld [vmem:[%s6187_s1 + $0x3f4] sm:$0x1] }
 0x505   : > { %v2478_v23 = vsel %vm1536_vm2, %v2476_v6, %v3826_v29  ;;  %v3839_v28 = vpop.permute.xlu1 %3838  ;;  %v2484_v50 = vsel %vm1536_vm2, %v2482_v11, %v3825_v14  ;;  %v3606_v29 = vpack.c.bf16 %v2887_v36, %v2886_v57 }
 0x506   : > { %v2487_v47 = vrot.slane %v2478_v23, 6  ;;  %v3841_v20 = vunpack.i.h.bf16 %v3839_v28  ;;  %v2475_v54 = vsel %vm1527_vm1, %v2473_v26, %v3836_v2  ;;  %v3840_v37 = vunpack.i.l.bf16 %v3839_v28 }
 0x507   : > { %v2488_v35 = vrot.slane %v2484_v50, 6  ;;  %v2481_v40 = vsel %vm1527_vm1, %v2479_v62, %v3835_v24 }
 0x508   : > { %v2477_v21 = vsel %vm1536_vm2, %v2475_v54, %v3841_v20  ;;  %v2483_v46 = vsel %vm1536_vm2, %v2481_v40, %v3840_v37 }
 0x509   : > { %v2493_v0 = vsel %vm1022_vm4, %v2477_v21, %v2487_v47  ;;  %v2494_v18 = vsel %vm1022_vm4, %v2483_v46, %v2488_v35  ;;  %vm2962_vm4 = vcmask 253952  }
 0x50a   : > { %2567 = vmatprep.mubr.f32.mxu1 %v2494_v18 }
 0x50b   : > { %2568 = vmatmul.mubr.f32.vlgmr.msra.gmra.mrb[40].mxu1 %v2493_v0 }
 0x55e   : > { %v2639_v30 = vpop.f32.mrb[22].mxu0 }
 0x55f   : > { %v3415_v49 = vpop.f32.mrb[23].mxu0 }
 0x5de   : > { %v3294_v63 = vpop.f32.mrb[40].mxu1 }
 0x5df   : > { %v3295_v34 = vpop.f32.mrb[41].mxu1 }
 0x5e0   : > { %v3296_v44 = vadd.f32 %v3295_v34, %v3294_v63 }
 0x5e2   : > { %v2570_v27 = vadd.f32 %v3296_v44, %v3106_v13 }
 0x5e4   : > { %v2640_v38 = vadd.f32 %v2639_v30, %v2570_v27 }
 0x5e6   : > { %v2644_v22 = vmin.f32 %v2640_v38, 0.0  ;;  %vm2643_vm0 = vcmp.gt.f32.partialorder %v2640_v38, 0.0 }
 0x5e8   : > { %v2645_v61 = vmul.f32 1.442695, %v2644_v22 }
 0x5ea   : > { %3926 = vpow2.f32 %v2645_v61 }
 0x5f4   : > { %v3927_v41 = vpop.eup %3926 }
 0x5f5   : > { %v3108_v16 = vadd.f32 -1.0, %v3927_v41 }
 0x5f7   : > { %v2648_v59 = vsel %vm2643_vm0, %v2640_v38, %v3108_v16 }
 0x5f8   : > { %3425 = vmatmul.mubr.msk.f32.vlgmr.msra.gmra.mrb[24].mxu0 %vm1518_vm15, %v2648_v59  ;;  %v2732_v45 = vrot.slane %v2648_v59, 1  ;;  %v2810_v56 = vrot.slane %v2648_v59, 2  ;;  %v2888_v14 = vrot.slane %v2648_v59, 3 }
 0x5f9   : > { %3592 = vmatpush3.bf16.msra.mxu0 %v3591_v8  ;;  %3435 = vmatprep.mubr.msk.f32.mxu0 %vm3942_vm5, %v6359_v42 }
 0x5fa   : > { %3593 = vmatprep.subr.bf16.mxu0 %v3941_v55 }
 0x5fd   : > { %3595 = vmatpush3.bf16.msra.mxu0 %v3594_v12 }
 0x5fe   : > { %3596 = vmatprep.subr.bf16.mxu0 %v3941_v55 }
 0x600   : > { %3436 = vmatmul.mubr.msk.f32.vlgmr.msra.gmra.mrb[24].mxu0 %vm1518_vm15, %v2732_v45 }
 0x601   : > { %3598 = vmatpush3.bf16.msra.mxu0 %v3597_v58  ;;  %3446 = vmatprep.mubr.msk.f32.mxu0 %vm3942_vm5, %v6359_v42 }
 0x602   : > { %3599 = vmatprep.subr.bf16.mxu0 %v3941_v55 }
 0x605   : > { %3601 = vmatpush3.bf16.msra.mxu0 %v3600_v52 }
 0x606   : > { %3602 = vmatprep.subr.bf16.mxu0 %v3941_v55 }
 0x608   : > { %3447 = vmatmul.mubr.msk.f32.vlgmr.msra.gmra.mrb[24].mxu0 %vm1518_vm15, %v2810_v56 }
 0x609   : > { %3604 = vmatpush3.bf16.msra.mxu0 %v3603_v17  ;;  %3457 = vmatprep.mubr.msk.f32.mxu0 %vm3942_vm5, %v6359_v42 }
 0x60a   : > { %3605 = vmatprep.subr.bf16.mxu0 %v3941_v55 }
 0x60d   : > { %3607 = vmatpush3.bf16.msra.mxu0 %v3606_v29 }
 0x610   : > { %3458 = vmatmul.mubr.msk.f32.vlgmr.msra.gmra.mrb[24].mxu0 %vm1518_vm15, %v2888_v14 }
 0x6e3   : > { %v2957_v4 = vpop.f32.mrb[24].mxu0 }
 0x6e4   : > { %v3610_v1 = vadd.f32 %v2957_v4, %v2649_v25  ;;  %v3459_v6 = vpop.f32.mrb[25].mxu0 }
 0x6e6   : > { %2963 = vst.msk [vmem:[%s139_s20] sm:$0x1] %vm2962_vm4, %v3610_v1 }
 0x6e7 PF: > { %s12_s9 = sadd.s32 1, %s3934_s9  }
 0x6e8   : > { %p9_p4 = scmp.ge.s32.totalorder %s12_s9, 10  }
 0x6ea   :  { %11 = sbr.rel (!%p9_p4) target bundleno = 1 (0x1), region = 58 }

</bundles_post_ra>
